<compile_context>
chip_gen: v7x
topology: tpu7x:2x2x1
jax: 0.10.0
libtpu: 0.0.40
codegen_flags: <defaults>
</compile_context>

<pallas_src>
import functools

import jax
import jax.numpy as jnp
from jax import lax
from jax.experimental import pallas as pl
from jax.experimental.pallas import tpu as pltpu

WEIGHT_DTYPE = jnp.bfloat16   # MXU operand dtype (accumulation stays f32)
ACT_DTYPE = jnp.float32       # activation / epilogue dtype
LN_EPS = 1e-5
ROW_TILE_CAP = 256            # keeps double-buffered tiles small on v7x (64 MiB VMEM)


def _row_tile(n, cap=ROW_TILE_CAP):
    """Largest row tile <= cap that is a multiple of 8 and divides n (else full n)."""
    if n <= cap:
        return n
    t = (cap // 8) * 8
    while t >= 8:
        if n % t == 0:
            return t
        t -= 8
    return n


def _ln(y, g, b):
    mu = jnp.mean(y, axis=-1, keepdims=True)
    var = jnp.mean((y - mu) * (y - mu), axis=-1, keepdims=True)
    return (y - mu) * lax.rsqrt(var + LN_EPS) * g + b


# -----------------------------------------------------------------------------
# Pallas kernels
# -----------------------------------------------------------------------------
def _self_qkv_kernel(x_ref, pos_ref, wqk_ref, bqk_ref, wv_ref, bv_ref,
                     q_ref, k_ref, v_ref):
    # Fused Q/K projection from (x + pos) plus V projection from x, single call.
    d = wv_ref.shape[1]
    x = x_ref[...]
    xp = (x + pos_ref[...]).astype(wqk_ref.dtype)
    qk = jnp.dot(xp, wqk_ref[...], preferred_element_type=jnp.float32) + bqk_ref[...]
    q_ref[...] = qk[:, :d]
    k_ref[...] = qk[:, d:]
    v_ref[...] = jnp.dot(x.astype(wv_ref.dtype), wv_ref[...],
                         preferred_element_type=jnp.float32) + bv_ref[...]


def self_qkv_project(x2d, pos2d, ap):
    """query==key projection: returns (q, k, v), each (N, D). Q is pre-scaled."""
    n, d = x2d.shape
    tile = _row_tile(n)
    out_sd = jax.ShapeDtypeStruct((n, d), ACT_DTYPE)
    return pl.pallas_call(
        _self_qkv_kernel,
        out_shape=(out_sd, out_sd, out_sd),
        grid=(n // tile,),
        in_specs=[
            pl.BlockSpec((tile, d), lambda i: (i, 0)),
            pl.BlockSpec((tile, d), lambda i: (i, 0)),
            pl.BlockSpec((d, 2 * d), lambda i: (0, 0)),
            pl.BlockSpec((1, 2 * d), lambda i: (0, 0)),
            pl.BlockSpec((d, d), lambda i: (0, 0)),
            pl.BlockSpec((1, d), lambda i: (0, 0)),
        ],
        out_specs=(
            pl.BlockSpec((tile, d), lambda i: (i, 0)),
            pl.BlockSpec((tile, d), lambda i: (i, 0)),
            pl.BlockSpec((tile, d), lambda i: (i, 0)),
        ),
        compiler_params=pltpu.CompilerParams(dimension_semantics=("parallel",)),
    )(x2d, pos2d, ap["w_qk"], ap["b_qk"], ap["w_v"], ap["b_v"])


def _kv_kernel(mem_ref, pos_ref, wk_ref, bk_ref, wv_ref, bv_ref, k_ref, v_ref):
    # Cross-attention K from (memory + pos) and V from memory, one call.
    mem = mem_ref[...]
    mp = (mem + pos_ref[...]).astype(wk_ref.dtype)
    k_ref[...] = jnp.dot(mp, wk_ref[...], preferred_element_type=jnp.float32) + bk_ref[...]
    v_ref[...] = jnp.dot(mem.astype(wv_ref.dtype), wv_ref[...],
                         preferred_element_type=jnp.float32) + bv_ref[...]


def kv_project(mem2d, pos2d, ap):
    n, d = mem2d.shape
    tile = _row_tile(n)
    out_sd = jax.ShapeDtypeStruct((n, d), ACT_DTYPE)
    return pl.pallas_call(
        _kv_kernel,
        out_shape=(out_sd, out_sd),
        grid=(n // tile,),
        in_specs=[
            pl.BlockSpec((tile, d), lambda i: (i, 0)),
            pl.BlockSpec((tile, d), lambda i: (i, 0)),
            pl.BlockSpec((d, d), lambda i: (0, 0)),
            pl.BlockSpec((1, d), lambda i: (0, 0)),
            pl.BlockSpec((d, d), lambda i: (0, 0)),
            pl.BlockSpec((1, d), lambda i: (0, 0)),
        ],
        out_specs=(pl.BlockSpec((tile, d), lambda i: (i, 0)),
                   pl.BlockSpec((tile, d), lambda i: (i, 0))),
        compiler_params=pltpu.CompilerParams(dimension_semantics=("parallel",)),
    )(mem2d, pos2d, ap["w_k"], ap["b_k"], ap["w_v"], ap["b_v"])


def _attn_kernel(q_ref, k_ref, v_ref, bias_ref, o_ref, *, nhead):
    # blocks: q (1, Sq, D), k/v (1, Sk, D), bias (1, 1, Sk), out (1, Sq, D) lane-dense.
    d = q_ref.shape[2]
    dh = d // nhead
    q = q_ref[0].astype(jnp.bfloat16)   # 1/sqrt(dh) already folded into the Q projection
    k = k_ref[0].astype(jnp.bfloat16)
    v = v_ref[0].astype(jnp.bfloat16)
    bias = bias_ref[0]                  # (1, Sk) additive key-padding bias, f32
    dn = (((1,), (1,)), ((), ()))       # contract last dims: q @ k^T without transposing k
    outs = []
    for h in range(nhead):              # static unroll over heads; all heads stay in-kernel
        qh = q[:, h * dh:(h + 1) * dh]
        kh = k[:, h * dh:(h + 1) * dh]
        vh = v[:, h * dh:(h + 1) * dh]
        s = lax.dot_general(qh, kh, dn, preferred_element_type=jnp.float32) + bias
        s = s - jnp.max(s, axis=-1, keepdims=True)
        p = jnp.exp(s)
        p = p * pl.reciprocal(jnp.sum(p, axis=-1, keepdims=True), approx=True)
        outs.append(jnp.dot(p.astype(jnp.bfloat16), vh,
                            preferred_element_type=jnp.float32))
    o_ref[0] = jnp.concatenate(outs, axis=-1)   # (Sq, D) single lane-dense store


def attention_core(q, k, v, bias, nhead):
    """q: (B, Sq, D), k/v: (B, Sk, D), bias: (B, 1, Sk). Returns (B, Sq, D)."""
    b, sq, d = q.shape
    sk = k.shape[1]
    # TODO(synk): for very long Sk add an Sk grid axis with flash-style online-softmax
    # accumulators instead of materializing the full (Sq, Sk) scores (625x625 f32 still
    # fits comfortably in VMEM, so full materialization is fine at DETR sizes).
    return pl.pallas_call(
        functools.partial(_attn_kernel, nhead=nhead),
        out_shape=jax.ShapeDtypeStruct((b, sq, d), ACT_DTYPE),
        grid=(b,),
        in_specs=[
            pl.BlockSpec((1, sq, d), lambda i: (i, 0, 0)),
            pl.BlockSpec((1, sk, d), lambda i: (i, 0, 0)),
            pl.BlockSpec((1, sk, d), lambda i: (i, 0, 0)),
            pl.BlockSpec((1, 1, sk), lambda i: (i, 0, 0)),
        ],
        out_specs=pl.BlockSpec((1, sq, d), lambda i: (i, 0, 0)),
        compiler_params=pltpu.CompilerParams(dimension_semantics=("parallel",)),
    )(q, k, v, bias)


def _proj_res_norm_kernel(a_ref, w_ref, b_ref, r_ref, g_ref, be_ref, o_ref):
    # y = LayerNorm(residual + attn @ Wo + bo)
    a = a_ref[...].astype(w_ref.dtype)
    y = r_ref[...] + jnp.dot(a, w_ref[...], preferred_element_type=jnp.float32) + b_ref[...]
    o_ref[...] = _ln(y, g_ref[...], be_ref[...])


def proj_residual_norm(attn2d, w_t, b_row, resid2d, gamma_row, beta_row):
    n, d_in = attn2d.shape
    d_out = w_t.shape[1]
    tile = _row_tile(n)
    return pl.pallas_call(
        _proj_res_norm_kernel,
        out_shape=jax.ShapeDtypeStruct((n, d_out), ACT_DTYPE),
        grid=(n // tile,),
        in_specs=[
            pl.BlockSpec((tile, d_in), lambda i: (i, 0)),
            pl.BlockSpec((d_in, d_out), lambda i: (0, 0)),
            pl.BlockSpec((1, d_out), lambda i: (0, 0)),
            pl.BlockSpec((tile, d_out), lambda i: (i, 0)),
            pl.BlockSpec((1, d_out), lambda i: (0, 0)),
            pl.BlockSpec((1, d_out), lambda i: (0, 0)),
        ],
        out_specs=pl.BlockSpec((tile, d_out), lambda i: (i, 0)),
        compiler_params=pltpu.CompilerParams(dimension_semantics=("parallel",)),
    )(attn2d, w_t, b_row, resid2d, gamma_row, beta_row)


def _proj_res_norm_q_kernel(a_ref, w_ref, b_ref, r_ref, g_ref, be_ref,
                            qp_ref, wq_ref, bq_ref, o_ref, q_ref):
    # o = LayerNorm(residual + attn @ Wo + bo); q = (o + query_pos) @ Wq + bq
    a = a_ref[...].astype(w_ref.dtype)
    y = r_ref[...] + jnp.dot(a, w_ref[...], preferred_element_type=jnp.float32) + b_ref[...]
    ln = _ln(y, g_ref[...], be_ref[...])
    o_ref[...] = ln
    xq = (ln + qp_ref[...]).astype(wq_ref.dtype)
    q_ref[...] = jnp.dot(xq, wq_ref[...], preferred_element_type=jnp.float32) + bq_ref[...]


def proj_residual_norm_q(attn2d, w_t, b_row, resid2d, gamma_row, beta_row,
                         qpos2d, wq_t, bq_row):
    """Fused: post-attn projection + residual + LayerNorm, plus the cross-attention
    Q projection of (LN output + query_pos). Returns (ln_out, q_cross)."""
    n, d_in = attn2d.shape
    d = w_t.shape[1]
    tile = _row_tile(n)
    out_sd = jax.ShapeDtypeStruct((n, d), ACT_DTYPE)
    return pl.pallas_call(
        _proj_res_norm_q_kernel,
        out_shape=(out_sd, out_sd),
        grid=(n // tile,),
        in_specs=[
            pl.BlockSpec((tile, d_in), lambda i: (i, 0)),
            pl.BlockSpec((d_in, d), lambda i: (0, 0)),
            pl.BlockSpec((1, d), lambda i: (0, 0)),
            pl.BlockSpec((tile, d), lambda i: (i, 0)),
            pl.BlockSpec((1, d), lambda i: (0, 0)),
            pl.BlockSpec((1, d), lambda i: (0, 0)),
            pl.BlockSpec((tile, d), lambda i: (i, 0)),
            pl.BlockSpec((d, d), lambda i: (0, 0)),
            pl.BlockSpec((1, d), lambda i: (0, 0)),
        ],
        out_specs=(pl.BlockSpec((tile, d), lambda i: (i, 0)),
                   pl.BlockSpec((tile, d), lambda i: (i, 0))),
        compiler_params=pltpu.CompilerParams(dimension_semantics=("parallel",)),
    )(attn2d, w_t, b_row, resid2d, gamma_row, beta_row, qpos2d, wq_t, bq_row)


def _ffn_kernel(x_ref, w1_ref, b1_ref, w2_ref, b2_ref, g_ref, be_ref, o_ref):
    # y = LayerNorm(x + relu(x @ W1 + b1) @ W2 + b2)   (dropouts = identity)
    x = x_ref[...]
    h = jnp.dot(x.astype(w1_ref.dtype), w1_ref[...],
                preferred_element_type=jnp.float32) + b1_ref[...]
    h = jnp.maximum(h, 0.0)
    y = x + jnp.dot(h.astype(w2_ref.dtype), w2_ref[...],
                    preferred_element_type=jnp.float32) + b2_ref[...]
    o_ref[...] = _ln(y, g_ref[...], be_ref[...])


def ffn_residual_norm(x2d, w1_t, b1_row, w2_t, b2_row, gamma_row, beta_row):
    n, d = x2d.shape
    f = w1_t.shape[1]
    tile = _row_tile(n)
    return pl.pallas_call(
        _ffn_kernel,
        out_shape=jax.ShapeDtypeStruct((n, d), ACT_DTYPE),
        grid=(n // tile,),
        in_specs=[
            pl.BlockSpec((tile, d), lambda i: (i, 0)),
            pl.BlockSpec((d, f), lambda i: (0, 0)),
            pl.BlockSpec((1, f), lambda i: (0, 0)),
            pl.BlockSpec((f, d), lambda i: (0, 0)),
            pl.BlockSpec((1, d), lambda i: (0, 0)),
            pl.BlockSpec((1, d), lambda i: (0, 0)),
            pl.BlockSpec((1, d), lambda i: (0, 0)),
        ],
        out_specs=pl.BlockSpec((tile, d), lambda i: (i, 0)),
        compiler_params=pltpu.CompilerParams(dimension_semantics=("parallel",)),
    )(x2d, w1_t, b1_row, w2_t, b2_row, gamma_row, beta_row)


def _layernorm_kernel(x_ref, g_ref, b_ref, o_ref):
    o_ref[...] = _ln(x_ref[...], g_ref[...], b_ref[...])


def layer_norm(x2d, gamma_row, beta_row):
    n, d = x2d.shape
    tile = _row_tile(n)
    return pl.pallas_call(
        _layernorm_kernel,
        out_shape=jax.ShapeDtypeStruct((n, d), ACT_DTYPE),
        grid=(n // tile,),
        in_specs=[
            pl.BlockSpec((tile, d), lambda i: (i, 0)),
            pl.BlockSpec((1, d), lambda i: (0, 0)),
            pl.BlockSpec((1, d), lambda i: (0, 0)),
        ],
        out_specs=pl.BlockSpec((tile, d), lambda i: (i, 0)),
        compiler_params=pltpu.CompilerParams(dimension_semantics=("parallel",)),
    )(x2d, gamma_row, beta_row)


# -----------------------------------------------------------------------------
# Transformer layers (batch-major glue, all heavy lifting in the kernels above)
# -----------------------------------------------------------------------------
def encoder_layer_fwd(src, p, nhead, pos2d, bias):
    b, s, d = src.shape
    n = b * s
    ap = p["self_attn"]
    q, k, v = self_qkv_project(src.reshape(n, d), pos2d, ap)
    attn = attention_core(q.reshape(b, s, d), k.reshape(b, s, d), v.reshape(b, s, d),
                          bias, nhead)
    src = proj_residual_norm(attn.reshape(n, d), ap["w_o"], ap["b_o"],
                             src.reshape(n, d), p["norm1_g"], p["norm1_b"])
    src = ffn_residual_norm(src, p["lin1_w"], p["lin1_b"], p["lin2_w"], p["lin2_b"],
                            p["norm2_g"], p["norm2_b"])
    return src.reshape(b, s, d)


def decoder_layer_fwd(tgt, memory, p, nhead, pos2d, qpos2d, mem_bias, self_bias):
    b, nq, d = tgt.shape
    n = b * nq
    sk = memory.shape[1]
    m = b * sk
    # --- self-attention (post-norm) ---
    ap = p["self_attn"]
    ca = p["cross_attn"]
    q, k, v = self_qkv_project(tgt.reshape(n, d), qpos2d, ap)
    attn = attention_core(q.reshape(b, nq, d), k.reshape(b, nq, d), v.reshape(b, nq, d),
                          self_bias, nhead)
    # fused: out-proj + residual + norm1, plus cross-attn Q = (norm1(tgt)+query_pos) @ Wq
    tgt, qc = proj_residual_norm_q(attn.reshape(n, d), ap["w_o"], ap["b_o"],
                                   tgt.reshape(n, d), p["norm1_g"], p["norm1_b"],
                                   qpos2d, ca["w_q"], ca["b_q"])
    # --- cross-attention ---
    kc, vc = kv_project(memory.reshape(m, d), pos2d, ca)
    attn = attention_core(qc.reshape(b, nq, d), kc.reshape(b, sk, d), vc.reshape(b, sk, d),
                          mem_bias, nhead)
    tgt = proj_residual_norm(attn.reshape(n, d), ca["w_o"], ca["b_o"],
                             tgt, p["norm2_g"], p["norm2_b"])
    # --- feed-forward ---
    tgt = ffn_residual_norm(tgt, p["lin1_w"], p["lin1_b"], p["lin2_w"], p["lin2_b"],
                            p["norm3_g"], p["norm3_b"])
    return tgt.reshape(b, nq, d)


def transformer_forward(params, src, mask, query_embed, pos_embed, nhead):
    """src, pos_embed: (B, C, H, W); mask: (B, H, W) bool; query_embed: (Nq, C).

    Returns (hs, memory) with hs: (1, B, Nq, C), memory: (B, C, H, W), matching
    torch Transformer.forward (return_intermediate_dec=False).
    """
    bs, c, h, w = src.shape
    hw = h * w
    # batch-major (B, S, D): identical math to torch's (S, B, D), reshape-free between kernels
    src_seq = src.reshape(bs, c, hw).transpose(0, 2, 1).astype(jnp.float32)     # (B, HW, C)
    pos = pos_embed.reshape(bs, c, hw).transpose(0, 2, 1).astype(jnp.float32)   # (B, HW, C)
    pos2d = pos.reshape(bs * hw, c)
    nq = query_embed.shape[0]
    query_pos = jnp.broadcast_to(query_embed[None, :, :], (bs, nq, c)).astype(jnp.float32)
    qpos2d = query_pos.reshape(bs * nq, c)
    tgt = jnp.zeros((bs, nq, c), jnp.float32)

    # additive key-padding biases built once and reused by every layer
    mem_bias = jnp.where(mask.reshape(bs, 1, hw), jnp.float32(-1e9), jnp.float32(0.0))
    dec_self_bias = jnp.zeros((bs, 1, nq), jnp.float32)

    memory = src_seq
    for lp in params["encoder_layers"]:
        memory = encoder_layer_fwd(memory, lp, nhead, pos2d, mem_bias)

    out = tgt
    for lp in params["decoder_layers"]:
        out = decoder_layer_fwd(out, memory, lp, nhead, pos2d, qpos2d,
                                mem_bias, dec_self_bias)

    out = layer_norm(out.reshape(bs * nq, c), params["dec_norm_g"], params["dec_norm_b"])
    hs = out.reshape(bs, nq, c)[None]                       # (1, B, Nq, C) == torch hs.transpose(1,2)
    mem_out = memory.transpose(0, 2, 1).reshape(bs, c, h, w)
    return hs, mem_out


# -----------------------------------------------------------------------------
# Deterministic parameter init (xavier-uniform, pre-transposed / fused / scale-folded)
# -----------------------------------------------------------------------------
def _xavier(key, shape):
    fan_out, fan_in = shape
    bound = (6.0 / (fan_in + fan_out)) ** 0.5
    return jax.random.uniform(key, shape, jnp.float32, -bound, bound)


def _make_attn_params(keys, d_model, nhead):
    in_proj_w = _xavier(keys[0], (3 * d_model, d_model))    # torch (3D, D) layout
    in_proj_b = jnp.zeros((3 * d_model,), jnp.float32)
    out_w = _xavier(keys[1], (d_model, d_model))
    out_b = jnp.zeros((d_model,), jnp.float32)
    scale = 1.0 / float(d_model // nhead) ** 0.5
    w_q, w_k, w_v = jnp.split(in_proj_w, 3, axis=0)
    b_q, b_k, b_v = jnp.split(in_proj_b, 3)
    w_q_t = w_q.T * scale                                   # fold 1/sqrt(dh) into Q
    b_q_s = b_q * scale
    return {
        # fused [Q|K] for query==key attention (one matmul)
        "w_qk": jnp.concatenate([w_q_t, w_k.T], axis=1).astype(WEIGHT_DTYPE),  # (D, 2D)
        "b_qk": jnp.concatenate([b_q_s, b_k]).reshape(1, 2 * d_model),
        # separate pieces for cross-attention (query != key != value)
        "w_q": w_q_t.astype(WEIGHT_DTYPE), "b_q": b_q_s.reshape(1, d_model),
        "w_k": w_k.T.astype(WEIGHT_DTYPE), "b_k": b_k.reshape(1, d_model),
        "w_v": w_v.T.astype(WEIGHT_DTYPE), "b_v": b_v.reshape(1, d_model),
        "w_o": out_w.T.astype(WEIGHT_DTYPE), "b_o": out_b.reshape(1, d_model),
    }


def _ln_params(d_model):
    return jnp.ones((1, d_model), jnp.float32), jnp.zeros((1, d_model), jnp.float32)


def _make_encoder_layer_params(key, d_model, dim_ff, nhead):
    ks = jax.random.split(key, 4)
    n1g, n1b = _ln_params(d_model)
    n2g, n2b = _ln_params(d_model)
    return {
        "self_attn": _make_attn_params(ks[:2], d_model, nhead),
        "lin1_w": _xavier(ks[2], (dim_ff, d_model)).T.astype(WEIGHT_DTYPE),   # (D, F)
        "lin1_b": jnp.zeros((1, dim_ff), jnp.float32),
        "lin2_w": _xavier(ks[3], (d_model, dim_ff)).T.astype(WEIGHT_DTYPE),   # (F, D)
        "lin2_b": jnp.zeros((1, d_model), jnp.float32),
        "norm1_g": n1g, "norm1_b": n1b,
        "norm2_g": n2g, "norm2_b": n2b,
    }


def _make_decoder_layer_params(key, d_model, dim_ff, nhead):
    ks = jax.random.split(key, 6)
    n1g, n1b = _ln_params(d_model)
    n2g, n2b = _ln_params(d_model)
    n3g, n3b = _ln_params(d_model)
    return {
        "self_attn": _make_attn_params(ks[:2], d_model, nhead),
        "cross_attn": _make_attn_params(ks[2:4], d_model, nhead),
        "lin1_w": _xavier(ks[4], (dim_ff, d_model)).T.astype(WEIGHT_DTYPE),
        "lin1_b": jnp.zeros((1, dim_ff), jnp.float32),
        "lin2_w": _xavier(ks[5], (d_model, dim_ff)).T.astype(WEIGHT_DTYPE),
        "lin2_b": jnp.zeros((1, d_model), jnp.float32),
        "norm1_g": n1g, "norm1_b": n1b,
        "norm2_g": n2g, "norm2_b": n2b,
        "norm3_g": n3g, "norm3_b": n3b,
    }


def make_transformer_params(key, d_model, dim_ff, num_enc, num_dec, nhead):
    keys = jax.random.split(key, num_enc + num_dec)
    ng, nb = _ln_params(d_model)
    return {
        "encoder_layers": [_make_encoder_layer_params(keys[i], d_model, dim_ff, nhead)
                           for i in range(num_enc)],
        "decoder_layers": [_make_decoder_layer_params(keys[num_enc + i], d_model, dim_ff, nhead)
                           for i in range(num_dec)],
        "dec_norm_g": ng,
        "dec_norm_b": nb,
    }


# -----------------------------------------------------------------------------
# Demo
# -----------------------------------------------------------------------------
if __name__ == "__main__":
    D_MODEL = 32
    NHEAD = 4
    DIM_FF = 64
    NUM_ENC = 2
    NUM_DEC = 2
    B, H, W = 2, 4, 4
    NUM_QUERIES = 8

    root = jax.random.PRNGKey(0)
    k_params, k_src, k_pos, k_query = jax.random.split(root, 4)

    params = make_transformer_params(k_params, D_MODEL, DIM_FF, NUM_ENC, NUM_DEC, NHEAD)

    src = jax.random.normal(k_src, (B, D_MODEL, H, W), jnp.float32)
    pos_embed = jax.random.normal(k_pos, (B, D_MODEL, H, W), jnp.float32)
    query_embed = jax.random.normal(k_query, (NUM_QUERIES, D_MODEL), jnp.float32)
    # padding mask: last 3 spatial positions of batch 1 are padded
    mask = jnp.zeros((B, H, W), bool).at[1, -1, -3:].set(True)

    fwd = jax.jit(functools.partial(transformer_forward, nhead=NHEAD))
    hs, memory_out = fwd(params, src, mask, query_embed, pos_embed)
    jax.block_until_ready((hs, memory_out))

    assert hs.shape == (1, B, NUM_QUERIES, D_MODEL), hs.shape
    assert memory_out.shape == (B, D_MODEL, H, W), memory_out.shape
    assert bool(jnp.all(jnp.isfinite(hs))) and bool(jnp.all(jnp.isfinite(memory_out)))
    print("KERNEL_OK")
</pallas_src>

<mosaic_0001>
module attributes {stable_mosaic.version = 11 : i64} {
  func.func @_self_qkv_kernel(%arg0: i32, %arg1: memref<32x32xf32, #tpu.memory_space<vmem>>, %arg2: memref<32x32xf32, #tpu.memory_space<vmem>>, %arg3: memref<32x64xbf16, #tpu.memory_space<vmem>>, %arg4: memref<1x64xf32, #tpu.memory_space<vmem>>, %arg5: memref<32x32xbf16, #tpu.memory_space<vmem>>, %arg6: memref<1x32xf32, #tpu.memory_space<vmem>>, %arg7: memref<32x32xf32, #tpu.memory_space<vmem>>, %arg8: memref<32x32xf32, #tpu.memory_space<vmem>>, %arg9: memref<32x32xf32, #tpu.memory_space<vmem>>) attributes {dimension_semantics = [#tpu.dimension_semantics<parallel>], iteration_bounds = array<i64: 1>, scalar_prefetch = 0 : i64, scratch_operands = 0 : i64, tpu.core_type = #tpu.core_type<tc>, window_params = [{transform_indices = @transform_0, window_bounds = array<i64: 32, 32>}, {transform_indices = @transform_1, window_bounds = array<i64: 32, 32>}, {pipeline_mode = #tpu.pipeline_mode<synchronous>, transform_indices = @transform_2, window_bounds = array<i64: 32, 64>}, {pipeline_mode = #tpu.pipeline_mode<synchronous>, transform_indices = @transform_3, window_bounds = array<i64: 1, 64>}, {pipeline_mode = #tpu.pipeline_mode<synchronous>, transform_indices = @transform_4, window_bounds = array<i64: 32, 32>}, {pipeline_mode = #tpu.pipeline_mode<synchronous>, transform_indices = @transform_5, window_bounds = array<i64: 1, 32>}, {transform_indices = @transform_6, window_bounds = array<i64: 32, 32>}, {transform_indices = @transform_7, window_bounds = array<i64: 32, 32>}, {transform_indices = @transform_8, window_bounds = array<i64: 32, 32>}]} {
    %c0 = arith.constant 0 : index
    %c0_0 = arith.constant 0 : index
    %0 = vector.load %arg1[%c0, %c0_0] : memref<32x32xf32, #tpu.memory_space<vmem>>, vector<32x32xf32>
    %c0_1 = arith.constant 0 : index
    %c0_2 = arith.constant 0 : index
    %1 = vector.load %arg2[%c0_1, %c0_2] : memref<32x32xf32, #tpu.memory_space<vmem>>, vector<32x32xf32>
    %2 = arith.addf %0, %1 : vector<32x32xf32>
    %3 = arith.truncf %2 : vector<32x32xf32> to vector<32x32xbf16>
    %c0_3 = arith.constant 0 : index
    %c0_4 = arith.constant 0 : index
    %4 = vector.load %arg3[%c0_3, %c0_4] : memref<32x64xbf16, #tpu.memory_space<vmem>>, vector<32x64xbf16>
    %cst = arith.constant dense<0.000000e+00> : vector<32x64xf32>
    %5 = tpu.matmul %3, %4, %cst {dimension_numbers = #tpu.dot_dimension_numbers<[1], [0], [0], [1], [0, 0, 1, 1], [], []>} : vector<32x32xbf16>, vector<32x64xbf16>, vector<32x64xf32> -> vector<32x64xf32>
    %c0_5 = arith.constant 0 : index
    %c0_6 = arith.constant 0 : index
    %6 = vector.load %arg4[%c0_5, %c0_6] : memref<1x64xf32, #tpu.memory_space<vmem>>, vector<1x64xf32>
    %7 = vector.broadcast %6 : vector<1x64xf32> to vector<32x64xf32>
    %8 = arith.addf %5, %7 : vector<32x64xf32>
    %9 = vector.extract_strided_slice %8 {offsets = [0, 0], sizes = [32, 32], strides = [1, 1]} : vector<32x64xf32> to vector<32x32xf32>
    %c0_7 = arith.constant 0 : index
    %c0_8 = arith.constant 0 : index
    %10 = vector.load %arg7[%c0_7, %c0_8] : memref<32x32xf32, #tpu.memory_space<vmem>>, vector<32x32xf32>
    tpu.vector_store %arg7[%c0_7, %c0_8], %9 {strides = array<i32>} : memref<32x32xf32, #tpu.memory_space<vmem>>, vector<32x32xf32>,
    %11 = vector.extract_strided_slice %8 {offsets = [0, 32], sizes = [32, 32], strides = [1, 1]} : vector<32x64xf32> to vector<32x32xf32>
    %c0_9 = arith.constant 0 : index
    %c0_10 = arith.constant 0 : index
    %12 = vector.load %arg8[%c0_9, %c0_10] : memref<32x32xf32, #tpu.memory_space<vmem>>, vector<32x32xf32>
    tpu.vector_store %arg8[%c0_9, %c0_10], %11 {strides = array<i32>} : memref<32x32xf32, #tpu.memory_space<vmem>>, vector<32x32xf32>,
    %13 = arith.truncf %0 : vector<32x32xf32> to vector<32x32xbf16>
    %c0_11 = arith.constant 0 : index
    %c0_12 = arith.constant 0 : index
    %14 = vector.load %arg5[%c0_11, %c0_12] : memref<32x32xbf16, #tpu.memory_space<vmem>>, vector<32x32xbf16>
    %cst_13 = arith.constant dense<0.000000e+00> : vector<32x32xf32>
    %15 = tpu.matmul %13, %14, %cst_13 {dimension_numbers = #tpu.dot_dimension_numbers<[1], [0], [0], [1], [0, 0, 1, 1], [], []>} : vector<32x32xbf16>, vector<32x32xbf16>, vector<32x32xf32> -> vector<32x32xf32>
    %c0_14 = arith.constant 0 : index
    %c0_15 = arith.constant 0 : index
    %16 = vector.load %arg6[%c0_14, %c0_15] : memref<1x32xf32, #tpu.memory_space<vmem>>, vector<1x32xf32>
    %17 = vector.broadcast %16 : vector<1x32xf32> to vector<32x32xf32>
    %18 = arith.addf %15, %17 : vector<32x32xf32>
    %c0_16 = arith.constant 0 : index
    %c0_17 = arith.constant 0 : index
    %19 = vector.load %arg9[%c0_16, %c0_17] : memref<32x32xf32, #tpu.memory_space<vmem>>, vector<32x32xf32>
    tpu.vector_store %arg9[%c0_16, %c0_17], %18 {strides = array<i32>} : memref<32x32xf32, #tpu.memory_space<vmem>>, vector<32x32xf32>,
    return
  }
  func.func @transform_0(%arg0: i32) -> (i32, i32) {
    %c0_i32 = arith.constant 0 : i32
    %c0_i32_0 = arith.constant 0 : i32
    return %arg0, %c0_i32 : i32, i32
  }
  func.func @transform_1(%arg0: i32) -> (i32, i32) {
    %c0_i32 = arith.constant 0 : i32
    %c0_i32_0 = arith.constant 0 : i32
    return %arg0, %c0_i32 : i32, i32
  }
  func.func @transform_2(%arg0: i32) -> (i32, i32) {
    %c0_i32 = arith.constant 0 : i32
    %c0_i32_0 = arith.constant 0 : i32
    %c0_i32_1 = arith.constant 0 : i32
    return %c0_i32, %c0_i32_0 : i32, i32
  }
  func.func @transform_3(%arg0: i32) -> (i32, i32) {
    %c0_i32 = arith.constant 0 : i32
    %c0_i32_0 = arith.constant 0 : i32
    %c0_i32_1 = arith.constant 0 : i32
    return %c0_i32, %c0_i32_0 : i32, i32
  }
  func.func @transform_4(%arg0: i32) -> (i32, i32) {
    %c0_i32 = arith.constant 0 : i32
    %c0_i32_0 = arith.constant 0 : i32
    %c0_i32_1 = arith.constant 0 : i32
    return %c0_i32, %c0_i32_0 : i32, i32
  }
  func.func @transform_5(%arg0: i32) -> (i32, i32) {
    %c0_i32 = arith.constant 0 : i32
    %c0_i32_0 = arith.constant 0 : i32
    %c0_i32_1 = arith.constant 0 : i32
    return %c0_i32, %c0_i32_0 : i32, i32
  }
  func.func @transform_6(%arg0: i32) -> (i32, i32) {
    %c0_i32 = arith.constant 0 : i32
    %c0_i32_0 = arith.constant 0 : i32
    return %arg0, %c0_i32 : i32, i32
  }
  func.func @transform_7(%arg0: i32) -> (i32, i32) {
    %c0_i32 = arith.constant 0 : i32
    %c0_i32_0 = arith.constant 0 : i32
    return %arg0, %c0_i32 : i32, i32
  }
  func.func @transform_8(%arg0: i32) -> (i32, i32) {
    %c0_i32 = arith.constant 0 : i32
    %c0_i32_0 = arith.constant 0 : i32
    return %arg0, %c0_i32 : i32, i32
  }
}

module attributes {stable_mosaic.version = 11 : i64} {
  func.func @_attn_kernel(%arg0: i32, %arg1: memref<1x16x32xf32, #tpu.memory_space<vmem>>, %arg2: memref<1x16x32xf32, #tpu.memory_space<vmem>>, %arg3: memref<1x16x32xf32, #tpu.memory_space<vmem>>, %arg4: memref<1x1x16xf32, #tpu.memory_space<vmem>>, %arg5: memref<1x16x32xf32, #tpu.memory_space<vmem>>) attributes {dimension_semantics = [#tpu.dimension_semantics<parallel>], iteration_bounds = array<i64: 2>, scalar_prefetch = 0 : i64, scratch_operands = 0 : i64, tpu.core_type = #tpu.core_type<tc>, window_params = [{transform_indices = @transform_0, window_bounds = array<i64: 1, 16, 32>}, {transform_indices = @transform_1, window_bounds = array<i64: 1, 16, 32>}, {transform_indices = @transform_2, window_bounds = array<i64: 1, 16, 32>}, {transform_indices = @transform_3, window_bounds = array<i64: 1, 1, 16>}, {transform_indices = @transform_4, window_bounds = array<i64: 1, 16, 32>}]} {
    %c0 = arith.constant 0 : index
    %c0_0 = arith.constant 0 : index
    %c0_1 = arith.constant 0 : index
    %0 = vector.load %arg1[%c0, %c0_0, %c0_1] : memref<1x16x32xf32, #tpu.memory_space<vmem>>, vector<1x16x32xf32>
    %1 = vector.shape_cast %0 : vector<1x16x32xf32> to vector<16x32xf32>
    %2 = arith.truncf %1 : vector<16x32xf32> to vector<16x32xbf16>
    %c0_2 = arith.constant 0 : index
    %c0_3 = arith.constant 0 : index
    %c0_4 = arith.constant 0 : index
    %3 = vector.load %arg2[%c0_2, %c0_3, %c0_4] : memref<1x16x32xf32, #tpu.memory_space<vmem>>, vector<1x16x32xf32>
    %4 = vector.shape_cast %3 : vector<1x16x32xf32> to vector<16x32xf32>
    %5 = arith.truncf %4 : vector<16x32xf32> to vector<16x32xbf16>
    %c0_5 = arith.constant 0 : index
    %c0_6 = arith.constant 0 : index
    %c0_7 = arith.constant 0 : index
    %6 = vector.load %arg3[%c0_5, %c0_6, %c0_7] : memref<1x16x32xf32, #tpu.memory_space<vmem>>, vector<1x16x32xf32>
    %7 = vector.shape_cast %6 : vector<1x16x32xf32> to vector<16x32xf32>
    %8 = arith.truncf %7 : vector<16x32xf32> to vector<16x32xbf16>
    %c0_8 = arith.constant 0 : index
    %c0_9 = arith.constant 0 : index
    %c0_10 = arith.constant 0 : index
    %9 = vector.load %arg4[%c0_8, %c0_9, %c0_10] : memref<1x1x16xf32, #tpu.memory_space<vmem>>, vector<1x1x16xf32>
    %10 = vector.shape_cast %9 : vector<1x1x16xf32> to vector<1x16xf32>
    %11 = vector.extract_strided_slice %2 {offsets = [0, 0], sizes = [16, 8], strides = [1, 1]} : vector<16x32xbf16> to vector<16x8xbf16>
    %12 = vector.extract_strided_slice %5 {offsets = [0, 0], sizes = [16, 8], strides = [1, 1]} : vector<16x32xbf16> to vector<16x8xbf16>
    %13 = vector.extract_strided_slice %8 {offsets = [0, 0], sizes = [16, 8], strides = [1, 1]} : vector<16x32xbf16> to vector<16x8xbf16>
    %cst = arith.constant dense<0.000000e+00> : vector<16x16xf32>
    %14 = tpu.matmul %11, %12, %cst {dimension_numbers = #tpu.dot_dimension_numbers<[1], [1], [0], [0], [0, 0, 1, 0], [], []>} : vector<16x8xbf16>, vector<16x8xbf16>, vector<16x16xf32> -> vector<16x16xf32>
    %15 = vector.broadcast %10 : vector<1x16xf32> to vector<16x16xf32>
    %16 = arith.addf %14, %15 : vector<16x16xf32>
    %cst_11 = arith.constant dense<0xFF800000> : vector<16xf32>
    %17 = vector.multi_reduction <maximumf>, %16, %cst_11 [1] : vector<16x16xf32> to vector<16xf32>
    %18 = vector.shape_cast %17 : vector<16xf32> to vector<16x1xf32>
    %19 = vector.broadcast %18 : vector<16x1xf32> to vector<16x16xf32>
    %20 = arith.subf %16, %19 : vector<16x16xf32>
    %21 = math.exp %20 : vector<16x16xf32>
    %cst_12 = arith.constant dense<0.000000e+00> : vector<16xf32>
    %22 = vector.multi_reduction <add>, %21, %cst_12 [1] : vector<16x16xf32> to vector<16xf32>
    %23 = vector.shape_cast %22 : vector<16xf32> to vector<16x1xf32>
    %24 = tpu.reciprocal %23 {approx = true} : vector<16x1xf32> -> vector<16x1xf32>
    %25 = vector.broadcast %24 : vector<16x1xf32> to vector<16x16xf32>
    %26 = arith.mulf %21, %25 : vector<16x16xf32>
    %27 = arith.truncf %26 : vector<16x16xf32> to vector<16x16xbf16>
    %cst_13 = arith.constant dense<0.000000e+00> : vector<16x8xf32>
    %28 = tpu.matmul %27, %13, %cst_13 {dimension_numbers = #tpu.dot_dimension_numbers<[1], [0], [0], [1], [0, 0, 1, 1], [], []>} : vector<16x16xbf16>, vector<16x8xbf16>, vector<16x8xf32> -> vector<16x8xf32>
    %29 = vector.extract_strided_slice %2 {offsets = [0, 8], sizes = [16, 8], strides = [1, 1]} : vector<16x32xbf16> to vector<16x8xbf16>
    %30 = vector.extract_strided_slice %5 {offsets = [0, 8], sizes = [16, 8], strides = [1, 1]} : vector<16x32xbf16> to vector<16x8xbf16>
    %31 = vector.extract_strided_slice %8 {offsets = [0, 8], sizes = [16, 8], strides = [1, 1]} : vector<16x32xbf16> to vector<16x8xbf16>
    %cst_14 = arith.constant dense<0.000000e+00> : vector<16x16xf32>
    %32 = tpu.matmul %29, %30, %cst_14 {dimension_numbers = #tpu.dot_dimension_numbers<[1], [1], [0], [0], [0, 0, 1, 0], [], []>} : vector<16x8xbf16>, vector<16x8xbf16>, vector<16x16xf32> -> vector<16x16xf32>
    %33 = vector.broadcast %10 : vector<1x16xf32> to vector<16x16xf32>
    %34 = arith.addf %32, %33 : vector<16x16xf32>
    %cst_15 = arith.constant dense<0xFF800000> : vector<16xf32>
    %35 = vector.multi_reduction <maximumf>, %34, %cst_15 [1] : vector<16x16xf32> to vector<16xf32>
    %36 = vector.shape_cast %35 : vector<16xf32> to vector<16x1xf32>
    %37 = vector.broadcast %36 : vector<16x1xf32> to vector<16x16xf32>
    %38 = arith.subf %34, %37 : vector<16x16xf32>
    %39 = math.exp %38 : vector<16x16xf32>
    %cst_16 = arith.constant dense<0.000000e+00> : vector<16xf32>
    %40 = vector.multi_reduction <add>, %39, %cst_16 [1] : vector<16x16xf32> to vector<16xf32>
    %41 = vector.shape_cast %40 : vector<16xf32> to vector<16x1xf32>
    %42 = tpu.reciprocal %41 {approx = true} : vector<16x1xf32> -> vector<16x1xf32>
    %43 = vector.broadcast %42 : vector<16x1xf32> to vector<16x16xf32>
    %44 = arith.mulf %39, %43 : vector<16x16xf32>
    %45 = arith.truncf %44 : vector<16x16xf32> to vector<16x16xbf16>
    %cst_17 = arith.constant dense<0.000000e+00> : vector<16x8xf32>
    %46 = tpu.matmul %45, %31, %cst_17 {dimension_numbers = #tpu.dot_dimension_numbers<[1], [0], [0], [1], [0, 0, 1, 1], [], []>} : vector<16x16xbf16>, vector<16x8xbf16>, vector<16x8xf32> -> vector<16x8xf32>
    %47 = vector.extract_strided_slice %2 {offsets = [0, 16], sizes = [16, 8], strides = [1, 1]} : vector<16x32xbf16> to vector<16x8xbf16>
    %48 = vector.extract_strided_slice %5 {offsets = [0, 16], sizes = [16, 8], strides = [1, 1]} : vector<16x32xbf16> to vector<16x8xbf16>
    %49 = vector.extract_strided_slice %8 {offsets = [0, 16], sizes = [16, 8], strides = [1, 1]} : vector<16x32xbf16> to vector<16x8xbf16>
    %cst_18 = arith.constant dense<0.000000e+00> : vector<16x16xf32>
    %50 = tpu.matmul %47, %48, %cst_18 {dimension_numbers = #tpu.dot_dimension_numbers<[1], [1], [0], [0], [0, 0, 1, 0], [], []>} : vector<16x8xbf16>, vector<16x8xbf16>, vector<16x16xf32> -> vector<16x16xf32>
    %51 = vector.broadcast %10 : vector<1x16xf32> to vector<16x16xf32>
    %52 = arith.addf %50, %51 : vector<16x16xf32>
    %cst_19 = arith.constant dense<0xFF800000> : vector<16xf32>
    %53 = vector.multi_reduction <maximumf>, %52, %cst_19 [1] : vector<16x16xf32> to vector<16xf32>
    %54 = vector.shape_cast %53 : vector<16xf32> to vector<16x1xf32>
    %55 = vector.broadcast %54 : vector<16x1xf32> to vector<16x16xf32>
    %56 = arith.subf %52, %55 : vector<16x16xf32>
    %57 = math.exp %56 : vector<16x16xf32>
    %cst_20 = arith.constant dense<0.000000e+00> : vector<16xf32>
    %58 = vector.multi_reduction <add>, %57, %cst_20 [1] : vector<16x16xf32> to vector<16xf32>
    %59 = vector.shape_cast %58 : vector<16xf32> to vector<16x1xf32>
    %60 = tpu.reciprocal %59 {approx = true} : vector<16x1xf32> -> vector<16x1xf32>
    %61 = vector.broadcast %60 : vector<16x1xf32> to vector<16x16xf32>
    %62 = arith.mulf %57, %61 : vector<16x16xf32>
    %63 = arith.truncf %62 : vector<16x16xf32> to vector<16x16xbf16>
    %cst_21 = arith.constant dense<0.000000e+00> : vector<16x8xf32>
    %64 = tpu.matmul %63, %49, %cst_21 {dimension_numbers = #tpu.dot_dimension_numbers<[1], [0], [0], [1], [0, 0, 1, 1], [], []>} : vector<16x16xbf16>, vector<16x8xbf16>, vector<16x8xf32> -> vector<16x8xf32>
    %65 = vector.extract_strided_slice %2 {offsets = [0, 24], sizes = [16, 8], strides = [1, 1]} : vector<16x32xbf16> to vector<16x8xbf16>
    %66 = vector.extract_strided_slice %5 {offsets = [0, 24], sizes = [16, 8], strides = [1, 1]} : vector<16x32xbf16> to vector<16x8xbf16>
    %67 = vector.extract_strided_slice %8 {offsets = [0, 24], sizes = [16, 8], strides = [1, 1]} : vector<16x32xbf16> to vector<16x8xbf16>
    %cst_22 = arith.constant dense<0.000000e+00> : vector<16x16xf32>
    %68 = tpu.matmul %65, %66, %cst_22 {dimension_numbers = #tpu.dot_dimension_numbers<[1], [1], [0], [0], [0, 0, 1, 0], [], []>} : vector<16x8xbf16>, vector<16x8xbf16>, vector<16x16xf32> -> vector<16x16xf32>
    %69 = vector.broadcast %10 : vector<1x16xf32> to vector<16x16xf32>
    %70 = arith.addf %68, %69 : vector<16x16xf32>
    %cst_23 = arith.constant dense<0xFF800000> : vector<16xf32>
    %71 = vector.multi_reduction <maximumf>, %70, %cst_23 [1] : vector<16x16xf32> to vector<16xf32>
    %72 = vector.shape_cast %71 : vector<16xf32> to vector<16x1xf32>
    %73 = vector.broadcast %72 : vector<16x1xf32> to vector<16x16xf32>
    %74 = arith.subf %70, %73 : vector<16x16xf32>
    %75 = math.exp %74 : vector<16x16xf32>
    %cst_24 = arith.constant dense<0.000000e+00> : vector<16xf32>
    %76 = vector.multi_reduction <add>, %75, %cst_24 [1] : vector<16x16xf32> to vector<16xf32>
    %77 = vector.shape_cast %76 : vector<16xf32> to vector<16x1xf32>
    %78 = tpu.reciprocal %77 {approx = true} : vector<16x1xf32> -> vector<16x1xf32>
    %79 = vector.broadcast %78 : vector<16x1xf32> to vector<16x16xf32>
    %80 = arith.mulf %75, %79 : vector<16x16xf32>
    %81 = arith.truncf %80 : vector<16x16xf32> to vector<16x16xbf16>
    %cst_25 = arith.constant dense<0.000000e+00> : vector<16x8xf32>
    %82 = tpu.matmul %81, %67, %cst_25 {dimension_numbers = #tpu.dot_dimension_numbers<[1], [0], [0], [1], [0, 0, 1, 1], [], []>} : vector<16x16xbf16>, vector<16x8xbf16>, vector<16x8xf32> -> vector<16x8xf32>
    %83 = tpu.concatenate %28, %46, %64, %82 in 1 : vector<16x8xf32>, vector<16x8xf32>, vector<16x8xf32>, vector<16x8xf32> -> vector<16x32xf32>
    %c0_26 = arith.constant 0 : index
    %c0_27 = arith.constant 0 : index
    %c0_28 = arith.constant 0 : index
    %84 = vector.load %arg5[%c0_26, %c0_27, %c0_28] : memref<1x16x32xf32, #tpu.memory_space<vmem>>, vector<1x16x32xf32>
    %85 = vector.shape_cast %84 : vector<1x16x32xf32> to vector<16x32xf32>
    %86 = vector.shape_cast %83 : vector<16x32xf32> to vector<1x16x32xf32>
    tpu.vector_store %arg5[%c0_26, %c0_27, %c0_28], %86 {strides = array<i32>} : memref<1x16x32xf32, #tpu.memory_space<vmem>>, vector<1x16x32xf32>,
    return
  }
  func.func @transform_0(%arg0: i32) -> (i32, i32, i32) {
    %c0_i32 = arith.constant 0 : i32
    %c0_i32_0 = arith.constant 0 : i32
    %c0_i32_1 = arith.constant 0 : i32
    return %arg0, %c0_i32, %c0_i32_0 : i32, i32, i32
  }
  func.func @transform_1(%arg0: i32) -> (i32, i32, i32) {
    %c0_i32 = arith.constant 0 : i32
    %c0_i32_0 = arith.constant 0 : i32
    %c0_i32_1 = arith.constant 0 : i32
    return %arg0, %c0_i32, %c0_i32_0 : i32, i32, i32
  }
  func.func @transform_2(%arg0: i32) -> (i32, i32, i32) {
    %c0_i32 = arith.constant 0 : i32
    %c0_i32_0 = arith.constant 0 : i32
    %c0_i32_1 = arith.constant 0 : i32
    return %arg0, %c0_i32, %c0_i32_0 : i32, i32, i32
  }
  func.func @transform_3(%arg0: i32) -> (i32, i32, i32) {
    %c0_i32 = arith.constant 0 : i32
    %c0_i32_0 = arith.constant 0 : i32
    %c0_i32_1 = arith.constant 0 : i32
    return %arg0, %c0_i32, %c0_i32_0 : i32, i32, i32
  }
  func.func @transform_4(%arg0: i32) -> (i32, i32, i32) {
    %c0_i32 = arith.constant 0 : i32
    %c0_i32_0 = arith.constant 0 : i32
    %c0_i32_1 = arith.constant 0 : i32
    return %arg0, %c0_i32, %c0_i32_0 : i32, i32, i32
  }
}

module attributes {stable_mosaic.version = 11 : i64} {
  func.func @_proj_res_norm_kernel(%arg0: i32, %arg1: memref<32x32xf32, #tpu.memory_space<vmem>>, %arg2: memref<32x32xbf16, #tpu.memory_space<vmem>>, %arg3: memref<1x32xf32, #tpu.memory_space<vmem>>, %arg4: memref<32x32xf32, #tpu.memory_space<vmem>>, %arg5: memref<1x32xf32, #tpu.memory_space<vmem>>, %arg6: memref<1x32xf32, #tpu.memory_space<vmem>>, %arg7: memref<32x32xf32, #tpu.memory_space<vmem>>) attributes {dimension_semantics = [#tpu.dimension_semantics<parallel>], iteration_bounds = array<i64: 1>, scalar_prefetch = 0 : i64, scratch_operands = 0 : i64, tpu.core_type = #tpu.core_type<tc>, window_params = [{transform_indices = @transform_0, window_bounds = array<i64: 32, 32>}, {pipeline_mode = #tpu.pipeline_mode<synchronous>, transform_indices = @transform_1, window_bounds = array<i64: 32, 32>}, {pipeline_mode = #tpu.pipeline_mode<synchronous>, transform_indices = @transform_2, window_bounds = array<i64: 1, 32>}, {transform_indices = @transform_3, window_bounds = array<i64: 32, 32>}, {pipeline_mode = #tpu.pipeline_mode<synchronous>, transform_indices = @transform_4, window_bounds = array<i64: 1, 32>}, {pipeline_mode = #tpu.pipeline_mode<synchronous>, transform_indices = @transform_5, window_bounds = array<i64: 1, 32>}, {transform_indices = @transform_6, window_bounds = array<i64: 32, 32>}]} {
    %c0 = arith.constant 0 : index
    %c0_0 = arith.constant 0 : index
    %0 = vector.load %arg1[%c0, %c0_0] : memref<32x32xf32, #tpu.memory_space<vmem>>, vector<32x32xf32>
    %1 = arith.truncf %0 : vector<32x32xf32> to vector<32x32xbf16>
    %c0_1 = arith.constant 0 : index
    %c0_2 = arith.constant 0 : index
    %2 = vector.load %arg4[%c0_1, %c0_2] : memref<32x32xf32, #tpu.memory_space<vmem>>, vector<32x32xf32>
    %c0_3 = arith.constant 0 : index
    %c0_4 = arith.constant 0 : index
    %3 = vector.load %arg2[%c0_3, %c0_4] : memref<32x32xbf16, #tpu.memory_space<vmem>>, vector<32x32xbf16>
    %cst = arith.constant dense<0.000000e+00> : vector<32x32xf32>
    %4 = tpu.matmul %1, %3, %cst {dimension_numbers = #tpu.dot_dimension_numbers<[1], [0], [0], [1], [0, 0, 1, 1], [], []>} : vector<32x32xbf16>, vector<32x32xbf16>, vector<32x32xf32> -> vector<32x32xf32>
    %5 = arith.addf %2, %4 : vector<32x32xf32>
    %c0_5 = arith.constant 0 : index
    %c0_6 = arith.constant 0 : index
    %6 = vector.load %arg3[%c0_5, %c0_6] : memref<1x32xf32, #tpu.memory_space<vmem>>, vector<1x32xf32>
    %7 = vector.broadcast %6 : vector<1x32xf32> to vector<32x32xf32>
    %8 = arith.addf %5, %7 : vector<32x32xf32>
    %c0_7 = arith.constant 0 : index
    %c0_8 = arith.constant 0 : index
    %9 = vector.load %arg5[%c0_7, %c0_8] : memref<1x32xf32, #tpu.memory_space<vmem>>, vector<1x32xf32>
    %c0_9 = arith.constant 0 : index
    %c0_10 = arith.constant 0 : index
    %10 = vector.load %arg6[%c0_9, %c0_10] : memref<1x32xf32, #tpu.memory_space<vmem>>, vector<1x32xf32>
    %cst_11 = arith.constant dense<0.000000e+00> : vector<32xf32>
    %11 = vector.multi_reduction <add>, %8, %cst_11 [1] : vector<32x32xf32> to vector<32xf32>
    %12 = vector.shape_cast %11 : vector<32xf32> to vector<32x1xf32>
    %cst_12 = arith.constant 3.200000e+01 : f32
    %13 = vector.broadcast %cst_12 : f32 to vector<32x1xf32>
    %14 = arith.divf %12, %13 : vector<32x1xf32>
    %15 = vector.broadcast %14 : vector<32x1xf32> to vector<32x32xf32>
    %16 = arith.subf %8, %15 : vector<32x32xf32>
    %17 = vector.broadcast %14 : vector<32x1xf32> to vector<32x32xf32>
    %18 = arith.subf %8, %17 : vector<32x32xf32>
    %19 = arith.mulf %16, %18 : vector<32x32xf32>
    %cst_13 = arith.constant dense<0.000000e+00> : vector<32xf32>
    %20 = vector.multi_reduction <add>, %19, %cst_13 [1] : vector<32x32xf32> to vector<32xf32>
    %21 = vector.shape_cast %20 : vector<32xf32> to vector<32x1xf32>
    %cst_14 = arith.constant 3.200000e+01 : f32
    %22 = vector.broadcast %cst_14 : f32 to vector<32x1xf32>
    %23 = arith.divf %21, %22 : vector<32x1xf32>
    %24 = vector.broadcast %14 : vector<32x1xf32> to vector<32x32xf32>
    %25 = arith.subf %8, %24 : vector<32x32xf32>
    %cst_15 = arith.constant 9.99999974E-6 : f32
    %26 = vector.broadcast %cst_15 : f32 to vector<32x1xf32>
    %27 = arith.addf %23, %26 : vector<32x1xf32>
    %28 = math.rsqrt %27 : vector<32x1xf32>
    %29 = vector.broadcast %28 : vector<32x1xf32> to vector<32x32xf32>
    %30 = arith.mulf %25, %29 : vector<32x32xf32>
    %31 = vector.broadcast %9 : vector<1x32xf32> to vector<32x32xf32>
    %32 = arith.mulf %30, %31 : vector<32x32xf32>
    %33 = vector.broadcast %10 : vector<1x32xf32> to vector<32x32xf32>
    %34 = arith.addf %32, %33 : vector<32x32xf32>
    %c0_16 = arith.constant 0 : index
    %c0_17 = arith.constant 0 : index
    %35 = vector.load %arg7[%c0_16, %c0_17] : memref<32x32xf32, #tpu.memory_space<vmem>>, vector<32x32xf32>
    tpu.vector_store %arg7[%c0_16, %c0_17], %34 {strides = array<i32>} : memref<32x32xf32, #tpu.memory_space<vmem>>, vector<32x32xf32>,
    return
  }
  func.func @transform_0(%arg0: i32) -> (i32, i32) {
    %c0_i32 = arith.constant 0 : i32
    %c0_i32_0 = arith.constant 0 : i32
    return %arg0, %c0_i32 : i32, i32
  }
  func.func @transform_1(%arg0: i32) -> (i32, i32) {
    %c0_i32 = arith.constant 0 : i32
    %c0_i32_0 = arith.constant 0 : i32
    %c0_i32_1 = arith.constant 0 : i32
    return %c0_i32, %c0_i32_0 : i32, i32
  }
  func.func @transform_2(%arg0: i32) -> (i32, i32) {
    %c0_i32 = arith.constant 0 : i32
    %c0_i32_0 = arith.constant 0 : i32
    %c0_i32_1 = arith.constant 0 : i32
    return %c0_i32, %c0_i32_0 : i32, i32
  }
  func.func @transform_3(%arg0: i32) -> (i32, i32) {
    %c0_i32 = arith.constant 0 : i32
    %c0_i32_0 = arith.constant 0 : i32
    return %arg0, %c0_i32 : i32, i32
  }
  func.func @transform_4(%arg0: i32) -> (i32, i32) {
    %c0_i32 = arith.constant 0 : i32
    %c0_i32_0 = arith.constant 0 : i32
    %c0_i32_1 = arith.constant 0 : i32
    return %c0_i32, %c0_i32_0 : i32, i32
  }
  func.func @transform_5(%arg0: i32) -> (i32, i32) {
    %c0_i32 = arith.constant 0 : i32
    %c0_i32_0 = arith.constant 0 : i32
    %c0_i32_1 = arith.constant 0 : i32
    return %c0_i32, %c0_i32_0 : i32, i32
  }
  func.func @transform_6(%arg0: i32) -> (i32, i32) {
    %c0_i32 = arith.constant 0 : i32
    %c0_i32_0 = arith.constant 0 : i32
    return %arg0, %c0_i32 : i32, i32
  }
}

module attributes {stable_mosaic.version = 11 : i64} {
  func.func @_ffn_kernel(%arg0: i32, %arg1: memref<32x32xf32, #tpu.memory_space<vmem>>, %arg2: memref<32x64xbf16, #tpu.memory_space<vmem>>, %arg3: memref<1x64xf32, #tpu.memory_space<vmem>>, %arg4: memref<64x32xbf16, #tpu.memory_space<vmem>>, %arg5: memref<1x32xf32, #tpu.memory_space<vmem>>, %arg6: memref<1x32xf32, #tpu.memory_space<vmem>>, %arg7: memref<1x32xf32, #tpu.memory_space<vmem>>, %arg8: memref<32x32xf32, #tpu.memory_space<vmem>>) attributes {dimension_semantics = [#tpu.dimension_semantics<parallel>], iteration_bounds = array<i64: 1>, scalar_prefetch = 0 : i64, scratch_operands = 0 : i64, tpu.core_type = #tpu.core_type<tc>, window_params = [{transform_indices = @transform_0, window_bounds = array<i64: 32, 32>}, {pipeline_mode = #tpu.pipeline_mode<synchronous>, transform_indices = @transform_1, window_bounds = array<i64: 32, 64>}, {pipeline_mode = #tpu.pipeline_mode<synchronous>, transform_indices = @transform_2, window_bounds = array<i64: 1, 64>}, {pipeline_mode = #tpu.pipeline_mode<synchronous>, transform_indices = @transform_3, window_bounds = array<i64: 64, 32>}, {pipeline_mode = #tpu.pipeline_mode<synchronous>, transform_indices = @transform_4, window_bounds = array<i64: 1, 32>}, {pipeline_mode = #tpu.pipeline_mode<synchronous>, transform_indices = @transform_5, window_bounds = array<i64: 1, 32>}, {pipeline_mode = #tpu.pipeline_mode<synchronous>, transform_indices = @transform_6, window_bounds = array<i64: 1, 32>}, {transform_indices = @transform_7, window_bounds = array<i64: 32, 32>}]} {
    %c0 = arith.constant 0 : index
    %c0_0 = arith.constant 0 : index
    %0 = vector.load %arg1[%c0, %c0_0] : memref<32x32xf32, #tpu.memory_space<vmem>>, vector<32x32xf32>
    %1 = arith.truncf %0 : vector<32x32xf32> to vector<32x32xbf16>
    %c0_1 = arith.constant 0 : index
    %c0_2 = arith.constant 0 : index
    %2 = vector.load %arg2[%c0_1, %c0_2] : memref<32x64xbf16, #tpu.memory_space<vmem>>, vector<32x64xbf16>
    %cst = arith.constant dense<0.000000e+00> : vector<32x64xf32>
    %3 = tpu.matmul %1, %2, %cst {dimension_numbers = #tpu.dot_dimension_numbers<[1], [0], [0], [1], [0, 0, 1, 1], [], []>} : vector<32x32xbf16>, vector<32x64xbf16>, vector<32x64xf32> -> vector<32x64xf32>
    %c0_3 = arith.constant 0 : index
    %c0_4 = arith.constant 0 : index
    %4 = vector.load %arg3[%c0_3, %c0_4] : memref<1x64xf32, #tpu.memory_space<vmem>>, vector<1x64xf32>
    %5 = vector.broadcast %4 : vector<1x64xf32> to vector<32x64xf32>
    %6 = arith.addf %3, %5 : vector<32x64xf32>
    %cst_5 = arith.constant 0.000000e+00 : f32
    %7 = vector.broadcast %cst_5 : f32 to vector<32x64xf32>
    %8 = arith.maximumf %6, %7 : vector<32x64xf32>
    %9 = arith.truncf %8 : vector<32x64xf32> to vector<32x64xbf16>
    %c0_6 = arith.constant 0 : index
    %c0_7 = arith.constant 0 : index
    %10 = vector.load %arg4[%c0_6, %c0_7] : memref<64x32xbf16, #tpu.memory_space<vmem>>, vector<64x32xbf16>
    %cst_8 = arith.constant dense<0.000000e+00> : vector<32x32xf32>
    %11 = tpu.matmul %9, %10, %cst_8 {dimension_numbers = #tpu.dot_dimension_numbers<[1], [0], [0], [1], [0, 0, 1, 1], [], []>} : vector<32x64xbf16>, vector<64x32xbf16>, vector<32x32xf32> -> vector<32x32xf32>
    %12 = arith.addf %0, %11 : vector<32x32xf32>
    %c0_9 = arith.constant 0 : index
    %c0_10 = arith.constant 0 : index
    %13 = vector.load %arg5[%c0_9, %c0_10] : memref<1x32xf32, #tpu.memory_space<vmem>>, vector<1x32xf32>
    %14 = vector.broadcast %13 : vector<1x32xf32> to vector<32x32xf32>
    %15 = arith.addf %12, %14 : vector<32x32xf32>
    %c0_11 = arith.constant 0 : index
    %c0_12 = arith.constant 0 : index
    %16 = vector.load %arg6[%c0_11, %c0_12] : memref<1x32xf32, #tpu.memory_space<vmem>>, vector<1x32xf32>
    %c0_13 = arith.constant 0 : index
    %c0_14 = arith.constant 0 : index
    %17 = vector.load %arg7[%c0_13, %c0_14] : memref<1x32xf32, #tpu.memory_space<vmem>>, vector<1x32xf32>
    %cst_15 = arith.constant dense<0.000000e+00> : vector<32xf32>
    %18 = vector.multi_reduction <add>, %15, %cst_15 [1] : vector<32x32xf32> to vector<32xf32>
    %19 = vector.shape_cast %18 : vector<32xf32> to vector<32x1xf32>
    %cst_16 = arith.constant 3.200000e+01 : f32
    %20 = vector.broadcast %cst_16 : f32 to vector<32x1xf32>
    %21 = arith.divf %19, %20 : vector<32x1xf32>
    %22 = vector.broadcast %21 : vector<32x1xf32> to vector<32x32xf32>
    %23 = arith.subf %15, %22 : vector<32x32xf32>
    %24 = vector.broadcast %21 : vector<32x1xf32> to vector<32x32xf32>
    %25 = arith.subf %15, %24 : vector<32x32xf32>
    %26 = arith.mulf %23, %25 : vector<32x32xf32>
    %cst_17 = arith.constant dense<0.000000e+00> : vector<32xf32>
    %27 = vector.multi_reduction <add>, %26, %cst_17 [1] : vector<32x32xf32> to vector<32xf32>
    %28 = vector.shape_cast %27 : vector<32xf32> to vector<32x1xf32>
    %cst_18 = arith.constant 3.200000e+01 : f32
    %29 = vector.broadcast %cst_18 : f32 to vector<32x1xf32>
    %30 = arith.divf %28, %29 : vector<32x1xf32>
    %31 = vector.broadcast %21 : vector<32x1xf32> to vector<32x32xf32>
    %32 = arith.subf %15, %31 : vector<32x32xf32>
    %cst_19 = arith.constant 9.99999974E-6 : f32
    %33 = vector.broadcast %cst_19 : f32 to vector<32x1xf32>
    %34 = arith.addf %30, %33 : vector<32x1xf32>
    %35 = math.rsqrt %34 : vector<32x1xf32>
    %36 = vector.broadcast %35 : vector<32x1xf32> to vector<32x32xf32>
    %37 = arith.mulf %32, %36 : vector<32x32xf32>
    %38 = vector.broadcast %16 : vector<1x32xf32> to vector<32x32xf32>
    %39 = arith.mulf %37, %38 : vector<32x32xf32>
    %40 = vector.broadcast %17 : vector<1x32xf32> to vector<32x32xf32>
    %41 = arith.addf %39, %40 : vector<32x32xf32>
    %c0_20 = arith.constant 0 : index
    %c0_21 = arith.constant 0 : index
    %42 = vector.load %arg8[%c0_20, %c0_21] : memref<32x32xf32, #tpu.memory_space<vmem>>, vector<32x32xf32>
    tpu.vector_store %arg8[%c0_20, %c0_21], %41 {strides = array<i32>} : memref<32x32xf32, #tpu.memory_space<vmem>>, vector<32x32xf32>,
    return
  }
  func.func @transform_0(%arg0: i32) -> (i32, i32) {
    %c0_i32 = arith.constant 0 : i32
    %c0_i32_0 = arith.constant 0 : i32
    return %arg0, %c0_i32 : i32, i32
  }
  func.func @transform_1(%arg0: i32) -> (i32, i32) {
    %c0_i32 = arith.constant 0 : i32
    %c0_i32_0 = arith.constant 0 : i32
    %c0_i32_1 = arith.constant 0 : i32
    return %c0_i32, %c0_i32_0 : i32, i32
  }
  func.func @transform_2(%arg0: i32) -> (i32, i32) {
    %c0_i32 = arith.constant 0 : i32
    %c0_i32_0 = arith.constant 0 : i32
    %c0_i32_1 = arith.constant 0 : i32
    return %c0_i32, %c0_i32_0 : i32, i32
  }
  func.func @transform_3(%arg0: i32) -> (i32, i32) {
    %c0_i32 = arith.constant 0 : i32
    %c0_i32_0 = arith.constant 0 : i32
    %c0_i32_1 = arith.constant 0 : i32
    return %c0_i32, %c0_i32_0 : i32, i32
  }
  func.func @transform_4(%arg0: i32) -> (i32, i32) {
    %c0_i32 = arith.constant 0 : i32
    %c0_i32_0 = arith.constant 0 : i32
    %c0_i32_1 = arith.constant 0 : i32
    return %c0_i32, %c0_i32_0 : i32, i32
  }
  func.func @transform_5(%arg0: i32) -> (i32, i32) {
    %c0_i32 = arith.constant 0 : i32
    %c0_i32_0 = arith.constant 0 : i32
    %c0_i32_1 = arith.constant 0 : i32
    return %c0_i32, %c0_i32_0 : i32, i32
  }
  func.func @transform_6(%arg0: i32) -> (i32, i32) {
    %c0_i32 = arith.constant 0 : i32
    %c0_i32_0 = arith.constant 0 : i32
    %c0_i32_1 = arith.constant 0 : i32
    return %c0_i32, %c0_i32_0 : i32, i32
  }
  func.func @transform_7(%arg0: i32) -> (i32, i32) {
    %c0_i32 = arith.constant 0 : i32
    %c0_i32_0 = arith.constant 0 : i32
    return %arg0, %c0_i32 : i32, i32
  }
}

module attributes {stable_mosaic.version = 11 : i64} {
  func.func @_kv_kernel(%arg0: i32, %arg1: memref<32x32xf32, #tpu.memory_space<vmem>>, %arg2: memref<32x32xf32, #tpu.memory_space<vmem>>, %arg3: memref<32x32xbf16, #tpu.memory_space<vmem>>, %arg4: memref<1x32xf32, #tpu.memory_space<vmem>>, %arg5: memref<32x32xbf16, #tpu.memory_space<vmem>>, %arg6: memref<1x32xf32, #tpu.memory_space<vmem>>, %arg7: memref<32x32xf32, #tpu.memory_space<vmem>>, %arg8: memref<32x32xf32, #tpu.memory_space<vmem>>) attributes {dimension_semantics = [#tpu.dimension_semantics<parallel>], iteration_bounds = array<i64: 1>, scalar_prefetch = 0 : i64, scratch_operands = 0 : i64, tpu.core_type = #tpu.core_type<tc>, window_params = [{transform_indices = @transform_0, window_bounds = array<i64: 32, 32>}, {transform_indices = @transform_1, window_bounds = array<i64: 32, 32>}, {pipeline_mode = #tpu.pipeline_mode<synchronous>, transform_indices = @transform_2, window_bounds = array<i64: 32, 32>}, {pipeline_mode = #tpu.pipeline_mode<synchronous>, transform_indices = @transform_3, window_bounds = array<i64: 1, 32>}, {pipeline_mode = #tpu.pipeline_mode<synchronous>, transform_indices = @transform_4, window_bounds = array<i64: 32, 32>}, {pipeline_mode = #tpu.pipeline_mode<synchronous>, transform_indices = @transform_5, window_bounds = array<i64: 1, 32>}, {transform_indices = @transform_6, window_bounds = array<i64: 32, 32>}, {transform_indices = @transform_7, window_bounds = array<i64: 32, 32>}]} {
    %c0 = arith.constant 0 : index
    %c0_0 = arith.constant 0 : index
    %0 = vector.load %arg1[%c0, %c0_0] : memref<32x32xf32, #tpu.memory_space<vmem>>, vector<32x32xf32>
    %c0_1 = arith.constant 0 : index
    %c0_2 = arith.constant 0 : index
    %1 = vector.load %arg2[%c0_1, %c0_2] : memref<32x32xf32, #tpu.memory_space<vmem>>, vector<32x32xf32>
    %2 = arith.addf %0, %1 : vector<32x32xf32>
    %3 = arith.truncf %2 : vector<32x32xf32> to vector<32x32xbf16>
    %c0_3 = arith.constant 0 : index
    %c0_4 = arith.constant 0 : index
    %4 = vector.load %arg3[%c0_3, %c0_4] : memref<32x32xbf16, #tpu.memory_space<vmem>>, vector<32x32xbf16>
    %cst = arith.constant dense<0.000000e+00> : vector<32x32xf32>
    %5 = tpu.matmul %3, %4, %cst {dimension_numbers = #tpu.dot_dimension_numbers<[1], [0], [0], [1], [0, 0, 1, 1], [], []>} : vector<32x32xbf16>, vector<32x32xbf16>, vector<32x32xf32> -> vector<32x32xf32>
    %c0_5 = arith.constant 0 : index
    %c0_6 = arith.constant 0 : index
    %6 = vector.load %arg4[%c0_5, %c0_6] : memref<1x32xf32, #tpu.memory_space<vmem>>, vector<1x32xf32>
    %7 = vector.broadcast %6 : vector<1x32xf32> to vector<32x32xf32>
    %8 = arith.addf %5, %7 : vector<32x32xf32>
    %c0_7 = arith.constant 0 : index
    %c0_8 = arith.constant 0 : index
    %9 = vector.load %arg7[%c0_7, %c0_8] : memref<32x32xf32, #tpu.memory_space<vmem>>, vector<32x32xf32>
    tpu.vector_store %arg7[%c0_7, %c0_8], %8 {strides = array<i32>} : memref<32x32xf32, #tpu.memory_space<vmem>>, vector<32x32xf32>,
    %10 = arith.truncf %0 : vector<32x32xf32> to vector<32x32xbf16>
    %c0_9 = arith.constant 0 : index
    %c0_10 = arith.constant 0 : index
    %11 = vector.load %arg5[%c0_9, %c0_10] : memref<32x32xbf16, #tpu.memory_space<vmem>>, vector<32x32xbf16>
    %cst_11 = arith.constant dense<0.000000e+00> : vector<32x32xf32>
    %12 = tpu.matmul %10, %11, %cst_11 {dimension_numbers = #tpu.dot_dimension_numbers<[1], [0], [0], [1], [0, 0, 1, 1], [], []>} : vector<32x32xbf16>, vector<32x32xbf16>, vector<32x32xf32> -> vector<32x32xf32>
    %c0_12 = arith.constant 0 : index
    %c0_13 = arith.constant 0 : index
    %13 = vector.load %arg6[%c0_12, %c0_13] : memref<1x32xf32, #tpu.memory_space<vmem>>, vector<1x32xf32>
    %14 = vector.broadcast %13 : vector<1x32xf32> to vector<32x32xf32>
    %15 = arith.addf %12, %14 : vector<32x32xf32>
    %c0_14 = arith.constant 0 : index
    %c0_15 = arith.constant 0 : index
    %16 = vector.load %arg8[%c0_14, %c0_15] : memref<32x32xf32, #tpu.memory_space<vmem>>, vector<32x32xf32>
    tpu.vector_store %arg8[%c0_14, %c0_15], %15 {strides = array<i32>} : memref<32x32xf32, #tpu.memory_space<vmem>>, vector<32x32xf32>,
    return
  }
  func.func @transform_0(%arg0: i32) -> (i32, i32) {
    %c0_i32 = arith.constant 0 : i32
    %c0_i32_0 = arith.constant 0 : i32
    return %arg0, %c0_i32 : i32, i32
  }
  func.func @transform_1(%arg0: i32) -> (i32, i32) {
    %c0_i32 = arith.constant 0 : i32
    %c0_i32_0 = arith.constant 0 : i32
    return %arg0, %c0_i32 : i32, i32
  }
  func.func @transform_2(%arg0: i32) -> (i32, i32) {
    %c0_i32 = arith.constant 0 : i32
    %c0_i32_0 = arith.constant 0 : i32
    %c0_i32_1 = arith.constant 0 : i32
    return %c0_i32, %c0_i32_0 : i32, i32
  }
  func.func @transform_3(%arg0: i32) -> (i32, i32) {
    %c0_i32 = arith.constant 0 : i32
    %c0_i32_0 = arith.constant 0 : i32
    %c0_i32_1 = arith.constant 0 : i32
    return %c0_i32, %c0_i32_0 : i32, i32
  }
  func.func @transform_4(%arg0: i32) -> (i32, i32) {
    %c0_i32 = arith.constant 0 : i32
    %c0_i32_0 = arith.constant 0 : i32
    %c0_i32_1 = arith.constant 0 : i32
    return %c0_i32, %c0_i32_0 : i32, i32
  }
  func.func @transform_5(%arg0: i32) -> (i32, i32) {
    %c0_i32 = arith.constant 0 : i32
    %c0_i32_0 = arith.constant 0 : i32
    %c0_i32_1 = arith.constant 0 : i32
    return %c0_i32, %c0_i32_0 : i32, i32
  }
  func.func @transform_6(%arg0: i32) -> (i32, i32) {
    %c0_i32 = arith.constant 0 : i32
    %c0_i32_0 = arith.constant 0 : i32
    return %arg0, %c0_i32 : i32, i32
  }
  func.func @transform_7(%arg0: i32) -> (i32, i32) {
    %c0_i32 = arith.constant 0 : i32
    %c0_i32_0 = arith.constant 0 : i32
    return %arg0, %c0_i32 : i32, i32
  }
}

module attributes {stable_mosaic.version = 11 : i64} {
  func.func @_self_qkv_kernel(%arg0: i32, %arg1: memref<16x32xf32, #tpu.memory_space<vmem>>, %arg2: memref<16x32xf32, #tpu.memory_space<vmem>>, %arg3: memref<32x64xbf16, #tpu.memory_space<vmem>>, %arg4: memref<1x64xf32, #tpu.memory_space<vmem>>, %arg5: memref<32x32xbf16, #tpu.memory_space<vmem>>, %arg6: memref<1x32xf32, #tpu.memory_space<vmem>>, %arg7: memref<16x32xf32, #tpu.memory_space<vmem>>, %arg8: memref<16x32xf32, #tpu.memory_space<vmem>>, %arg9: memref<16x32xf32, #tpu.memory_space<vmem>>) attributes {dimension_semantics = [#tpu.dimension_semantics<parallel>], iteration_bounds = array<i64: 1>, scalar_prefetch = 0 : i64, scratch_operands = 0 : i64, tpu.core_type = #tpu.core_type<tc>, window_params = [{transform_indices = @transform_0, window_bounds = array<i64: 16, 32>}, {transform_indices = @transform_1, window_bounds = array<i64: 16, 32>}, {pipeline_mode = #tpu.pipeline_mode<synchronous>, transform_indices = @transform_2, window_bounds = array<i64: 32, 64>}, {pipeline_mode = #tpu.pipeline_mode<synchronous>, transform_indices = @transform_3, window_bounds = array<i64: 1, 64>}, {pipeline_mode = #tpu.pipeline_mode<synchronous>, transform_indices = @transform_4, window_bounds = array<i64: 32, 32>}, {pipeline_mode = #tpu.pipeline_mode<synchronous>, transform_indices = @transform_5, window_bounds = array<i64: 1, 32>}, {transform_indices = @transform_6, window_bounds = array<i64: 16, 32>}, {transform_indices = @transform_7, window_bounds = array<i64: 16, 32>}, {transform_indices = @transform_8, window_bounds = array<i64: 16, 32>}]} {
    %c0 = arith.constant 0 : index
    %c0_0 = arith.constant 0 : index
    %0 = vector.load %arg1[%c0, %c0_0] : memref<16x32xf32, #tpu.memory_space<vmem>>, vector<16x32xf32>
    %c0_1 = arith.constant 0 : index
    %c0_2 = arith.constant 0 : index
    %1 = vector.load %arg2[%c0_1, %c0_2] : memref<16x32xf32, #tpu.memory_space<vmem>>, vector<16x32xf32>
    %2 = arith.addf %0, %1 : vector<16x32xf32>
    %3 = arith.truncf %2 : vector<16x32xf32> to vector<16x32xbf16>
    %c0_3 = arith.constant 0 : index
    %c0_4 = arith.constant 0 : index
    %4 = vector.load %arg3[%c0_3, %c0_4] : memref<32x64xbf16, #tpu.memory_space<vmem>>, vector<32x64xbf16>
    %cst = arith.constant dense<0.000000e+00> : vector<16x64xf32>
    %5 = tpu.matmul %3, %4, %cst {dimension_numbers = #tpu.dot_dimension_numbers<[1], [0], [0], [1], [0, 0, 1, 1], [], []>} : vector<16x32xbf16>, vector<32x64xbf16>, vector<16x64xf32> -> vector<16x64xf32>
    %c0_5 = arith.constant 0 : index
    %c0_6 = arith.constant 0 : index
    %6 = vector.load %arg4[%c0_5, %c0_6] : memref<1x64xf32, #tpu.memory_space<vmem>>, vector<1x64xf32>
    %7 = vector.broadcast %6 : vector<1x64xf32> to vector<16x64xf32>
    %8 = arith.addf %5, %7 : vector<16x64xf32>
    %9 = vector.extract_strided_slice %8 {offsets = [0, 0], sizes = [16, 32], strides = [1, 1]} : vector<16x64xf32> to vector<16x32xf32>
    %c0_7 = arith.constant 0 : index
    %c0_8 = arith.constant 0 : index
    %10 = vector.load %arg7[%c0_7, %c0_8] : memref<16x32xf32, #tpu.memory_space<vmem>>, vector<16x32xf32>
    tpu.vector_store %arg7[%c0_7, %c0_8], %9 {strides = array<i32>} : memref<16x32xf32, #tpu.memory_space<vmem>>, vector<16x32xf32>,
    %11 = vector.extract_strided_slice %8 {offsets = [0, 32], sizes = [16, 32], strides = [1, 1]} : vector<16x64xf32> to vector<16x32xf32>
    %c0_9 = arith.constant 0 : index
    %c0_10 = arith.constant 0 : index
    %12 = vector.load %arg8[%c0_9, %c0_10] : memref<16x32xf32, #tpu.memory_space<vmem>>, vector<16x32xf32>
    tpu.vector_store %arg8[%c0_9, %c0_10], %11 {strides = array<i32>} : memref<16x32xf32, #tpu.memory_space<vmem>>, vector<16x32xf32>,
    %13 = arith.truncf %0 : vector<16x32xf32> to vector<16x32xbf16>
    %c0_11 = arith.constant 0 : index
    %c0_12 = arith.constant 0 : index
    %14 = vector.load %arg5[%c0_11, %c0_12] : memref<32x32xbf16, #tpu.memory_space<vmem>>, vector<32x32xbf16>
    %cst_13 = arith.constant dense<0.000000e+00> : vector<16x32xf32>
    %15 = tpu.matmul %13, %14, %cst_13 {dimension_numbers = #tpu.dot_dimension_numbers<[1], [0], [0], [1], [0, 0, 1, 1], [], []>} : vector<16x32xbf16>, vector<32x32xbf16>, vector<16x32xf32> -> vector<16x32xf32>
    %c0_14 = arith.constant 0 : index
    %c0_15 = arith.constant 0 : index
    %16 = vector.load %arg6[%c0_14, %c0_15] : memref<1x32xf32, #tpu.memory_space<vmem>>, vector<1x32xf32>
    %17 = vector.broadcast %16 : vector<1x32xf32> to vector<16x32xf32>
    %18 = arith.addf %15, %17 : vector<16x32xf32>
    %c0_16 = arith.constant 0 : index
    %c0_17 = arith.constant 0 : index
    %19 = vector.load %arg9[%c0_16, %c0_17] : memref<16x32xf32, #tpu.memory_space<vmem>>, vector<16x32xf32>
    tpu.vector_store %arg9[%c0_16, %c0_17], %18 {strides = array<i32>} : memref<16x32xf32, #tpu.memory_space<vmem>>, vector<16x32xf32>,
    return
  }
  func.func @transform_0(%arg0: i32) -> (i32, i32) {
    %c0_i32 = arith.constant 0 : i32
    %c0_i32_0 = arith.constant 0 : i32
    return %arg0, %c0_i32 : i32, i32
  }
  func.func @transform_1(%arg0: i32) -> (i32, i32) {
    %c0_i32 = arith.constant 0 : i32
    %c0_i32_0 = arith.constant 0 : i32
    return %arg0, %c0_i32 : i32, i32
  }
  func.func @transform_2(%arg0: i32) -> (i32, i32) {
    %c0_i32 = arith.constant 0 : i32
    %c0_i32_0 = arith.constant 0 : i32
    %c0_i32_1 = arith.constant 0 : i32
    return %c0_i32, %c0_i32_0 : i32, i32
  }
  func.func @transform_3(%arg0: i32) -> (i32, i32) {
    %c0_i32 = arith.constant 0 : i32
    %c0_i32_0 = arith.constant 0 : i32
    %c0_i32_1 = arith.constant 0 : i32
    return %c0_i32, %c0_i32_0 : i32, i32
  }
  func.func @transform_4(%arg0: i32) -> (i32, i32) {
    %c0_i32 = arith.constant 0 : i32
    %c0_i32_0 = arith.constant 0 : i32
    %c0_i32_1 = arith.constant 0 : i32
    return %c0_i32, %c0_i32_0 : i32, i32
  }
  func.func @transform_5(%arg0: i32) -> (i32, i32) {
    %c0_i32 = arith.constant 0 : i32
    %c0_i32_0 = arith.constant 0 : i32
    %c0_i32_1 = arith.constant 0 : i32
    return %c0_i32, %c0_i32_0 : i32, i32
  }
  func.func @transform_6(%arg0: i32) -> (i32, i32) {
    %c0_i32 = arith.constant 0 : i32
    %c0_i32_0 = arith.constant 0 : i32
    return %arg0, %c0_i32 : i32, i32
  }
  func.func @transform_7(%arg0: i32) -> (i32, i32) {
    %c0_i32 = arith.constant 0 : i32
    %c0_i32_0 = arith.constant 0 : i32
    return %arg0, %c0_i32 : i32, i32
  }
  func.func @transform_8(%arg0: i32) -> (i32, i32) {
    %c0_i32 = arith.constant 0 : i32
    %c0_i32_0 = arith.constant 0 : i32
    return %arg0, %c0_i32 : i32, i32
  }
}

module attributes {stable_mosaic.version = 11 : i64} {
  func.func @_proj_res_norm_q_kernel(%arg0: i32, %arg1: memref<16x32xf32, #tpu.memory_space<vmem>>, %arg2: memref<32x32xbf16, #tpu.memory_space<vmem>>, %arg3: memref<1x32xf32, #tpu.memory_space<vmem>>, %arg4: memref<16x32xf32, #tpu.memory_space<vmem>>, %arg5: memref<1x32xf32, #tpu.memory_space<vmem>>, %arg6: memref<1x32xf32, #tpu.memory_space<vmem>>, %arg7: memref<16x32xf32, #tpu.memory_space<vmem>>, %arg8: memref<32x32xbf16, #tpu.memory_space<vmem>>, %arg9: memref<1x32xf32, #tpu.memory_space<vmem>>, %arg10: memref<16x32xf32, #tpu.memory_space<vmem>>, %arg11: memref<16x32xf32, #tpu.memory_space<vmem>>) attributes {dimension_semantics = [#tpu.dimension_semantics<parallel>], iteration_bounds = array<i64: 1>, scalar_prefetch = 0 : i64, scratch_operands = 0 : i64, tpu.core_type = #tpu.core_type<tc>, window_params = [{transform_indices = @transform_0, window_bounds = array<i64: 16, 32>}, {pipeline_mode = #tpu.pipeline_mode<synchronous>, transform_indices = @transform_1, window_bounds = array<i64: 32, 32>}, {pipeline_mode = #tpu.pipeline_mode<synchronous>, transform_indices = @transform_2, window_bounds = array<i64: 1, 32>}, {transform_indices = @transform_3, window_bounds = array<i64: 16, 32>}, {pipeline_mode = #tpu.pipeline_mode<synchronous>, transform_indices = @transform_4, window_bounds = array<i64: 1, 32>}, {pipeline_mode = #tpu.pipeline_mode<synchronous>, transform_indices = @transform_5, window_bounds = array<i64: 1, 32>}, {transform_indices = @transform_6, window_bounds = array<i64: 16, 32>}, {pipeline_mode = #tpu.pipeline_mode<synchronous>, transform_indices = @transform_7, window_bounds = array<i64: 32, 32>}, {pipeline_mode = #tpu.pipeline_mode<synchronous>, transform_indices = @transform_8, window_bounds = array<i64: 1, 32>}, {transform_indices = @transform_9, window_bounds = array<i64: 16, 32>}, {transform_indices = @transform_10, window_bounds = array<i64: 16, 32>}]} {
    %c0 = arith.constant 0 : index
    %c0_0 = arith.constant 0 : index
    %0 = vector.load %arg1[%c0, %c0_0] : memref<16x32xf32, #tpu.memory_space<vmem>>, vector<16x32xf32>
    %1 = arith.truncf %0 : vector<16x32xf32> to vector<16x32xbf16>
    %c0_1 = arith.constant 0 : index
    %c0_2 = arith.constant 0 : index
    %2 = vector.load %arg4[%c0_1, %c0_2] : memref<16x32xf32, #tpu.memory_space<vmem>>, vector<16x32xf32>
    %c0_3 = arith.constant 0 : index
    %c0_4 = arith.constant 0 : index
    %3 = vector.load %arg2[%c0_3, %c0_4] : memref<32x32xbf16, #tpu.memory_space<vmem>>, vector<32x32xbf16>
    %cst = arith.constant dense<0.000000e+00> : vector<16x32xf32>
    %4 = tpu.matmul %1, %3, %cst {dimension_numbers = #tpu.dot_dimension_numbers<[1], [0], [0], [1], [0, 0, 1, 1], [], []>} : vector<16x32xbf16>, vector<32x32xbf16>, vector<16x32xf32> -> vector<16x32xf32>
    %5 = arith.addf %2, %4 : vector<16x32xf32>
    %c0_5 = arith.constant 0 : index
    %c0_6 = arith.constant 0 : index
    %6 = vector.load %arg3[%c0_5, %c0_6] : memref<1x32xf32, #tpu.memory_space<vmem>>, vector<1x32xf32>
    %7 = vector.broadcast %6 : vector<1x32xf32> to vector<16x32xf32>
    %8 = arith.addf %5, %7 : vector<16x32xf32>
    %c0_7 = arith.constant 0 : index
    %c0_8 = arith.constant 0 : index
    %9 = vector.load %arg5[%c0_7, %c0_8] : memref<1x32xf32, #tpu.memory_space<vmem>>, vector<1x32xf32>
    %c0_9 = arith.constant 0 : index
    %c0_10 = arith.constant 0 : index
    %10 = vector.load %arg6[%c0_9, %c0_10] : memref<1x32xf32, #tpu.memory_space<vmem>>, vector<1x32xf32>
    %cst_11 = arith.constant dense<0.000000e+00> : vector<16xf32>
    %11 = vector.multi_reduction <add>, %8, %cst_11 [1] : vector<16x32xf32> to vector<16xf32>
    %12 = vector.shape_cast %11 : vector<16xf32> to vector<16x1xf32>
    %cst_12 = arith.constant 3.200000e+01 : f32
    %13 = vector.broadcast %cst_12 : f32 to vector<16x1xf32>
    %14 = arith.divf %12, %13 : vector<16x1xf32>
    %15 = vector.broadcast %14 : vector<16x1xf32> to vector<16x32xf32>
    %16 = arith.subf %8, %15 : vector<16x32xf32>
    %17 = vector.broadcast %14 : vector<16x1xf32> to vector<16x32xf32>
    %18 = arith.subf %8, %17 : vector<16x32xf32>
    %19 = arith.mulf %16, %18 : vector<16x32xf32>
    %cst_13 = arith.constant dense<0.000000e+00> : vector<16xf32>
    %20 = vector.multi_reduction <add>, %19, %cst_13 [1] : vector<16x32xf32> to vector<16xf32>
    %21 = vector.shape_cast %20 : vector<16xf32> to vector<16x1xf32>
    %cst_14 = arith.constant 3.200000e+01 : f32
    %22 = vector.broadcast %cst_14 : f32 to vector<16x1xf32>
    %23 = arith.divf %21, %22 : vector<16x1xf32>
    %24 = vector.broadcast %14 : vector<16x1xf32> to vector<16x32xf32>
    %25 = arith.subf %8, %24 : vector<16x32xf32>
    %cst_15 = arith.constant 9.99999974E-6 : f32
    %26 = vector.broadcast %cst_15 : f32 to vector<16x1xf32>
    %27 = arith.addf %23, %26 : vector<16x1xf32>
    %28 = math.rsqrt %27 : vector<16x1xf32>
    %29 = vector.broadcast %28 : vector<16x1xf32> to vector<16x32xf32>
    %30 = arith.mulf %25, %29 : vector<16x32xf32>
    %31 = vector.broadcast %9 : vector<1x32xf32> to vector<16x32xf32>
    %32 = arith.mulf %30, %31 : vector<16x32xf32>
    %33 = vector.broadcast %10 : vector<1x32xf32> to vector<16x32xf32>
    %34 = arith.addf %32, %33 : vector<16x32xf32>
    %c0_16 = arith.constant 0 : index
    %c0_17 = arith.constant 0 : index
    %35 = vector.load %arg10[%c0_16, %c0_17] : memref<16x32xf32, #tpu.memory_space<vmem>>, vector<16x32xf32>
    tpu.vector_store %arg10[%c0_16, %c0_17], %34 {strides = array<i32>} : memref<16x32xf32, #tpu.memory_space<vmem>>, vector<16x32xf32>,
    %c0_18 = arith.constant 0 : index
    %c0_19 = arith.constant 0 : index
    %36 = vector.load %arg7[%c0_18, %c0_19] : memref<16x32xf32, #tpu.memory_space<vmem>>, vector<16x32xf32>
    %37 = arith.addf %34, %36 : vector<16x32xf32>
    %38 = arith.truncf %37 : vector<16x32xf32> to vector<16x32xbf16>
    %c0_20 = arith.constant 0 : index
    %c0_21 = arith.constant 0 : index
    %39 = vector.load %arg8[%c0_20, %c0_21] : memref<32x32xbf16, #tpu.memory_space<vmem>>, vector<32x32xbf16>
    %cst_22 = arith.constant dense<0.000000e+00> : vector<16x32xf32>
    %40 = tpu.matmul %38, %39, %cst_22 {dimension_numbers = #tpu.dot_dimension_numbers<[1], [0], [0], [1], [0, 0, 1, 1], [], []>} : vector<16x32xbf16>, vector<32x32xbf16>, vector<16x32xf32> -> vector<16x32xf32>
    %c0_23 = arith.constant 0 : index
    %c0_24 = arith.constant 0 : index
    %41 = vector.load %arg9[%c0_23, %c0_24] : memref<1x32xf32, #tpu.memory_space<vmem>>, vector<1x32xf32>
    %42 = vector.broadcast %41 : vector<1x32xf32> to vector<16x32xf32>
    %43 = arith.addf %40, %42 : vector<16x32xf32>
    %c0_25 = arith.constant 0 : index
    %c0_26 = arith.constant 0 : index
    %44 = vector.load %arg11[%c0_25, %c0_26] : memref<16x32xf32, #tpu.memory_space<vmem>>, vector<16x32xf32>
    tpu.vector_store %arg11[%c0_25, %c0_26], %43 {strides = array<i32>} : memref<16x32xf32, #tpu.memory_space<vmem>>, vector<16x32xf32>,
    return
  }
  func.func @transform_0(%arg0: i32) -> (i32, i32) {
    %c0_i32 = arith.constant 0 : i32
    %c0_i32_0 = arith.constant 0 : i32
    return %arg0, %c0_i32 : i32, i32
  }
  func.func @transform_1(%arg0: i32) -> (i32, i32) {
    %c0_i32 = arith.constant 0 : i32
    %c0_i32_0 = arith.constant 0 : i32
    %c0_i32_1 = arith.constant 0 : i32
    return %c0_i32, %c0_i32_0 : i32, i32
  }
  func.func @transform_2(%arg0: i32) -> (i32, i32) {
    %c0_i32 = arith.constant 0 : i32
    %c0_i32_0 = arith.constant 0 : i32
    %c0_i32_1 = arith.constant 0 : i32
    return %c0_i32, %c0_i32_0 : i32, i32
  }
  func.func @transform_3(%arg0: i32) -> (i32, i32) {
    %c0_i32 = arith.constant 0 : i32
    %c0_i32_0 = arith.constant 0 : i32
    return %arg0, %c0_i32 : i32, i32
  }
  func.func @transform_4(%arg0: i32) -> (i32, i32) {
    %c0_i32 = arith.constant 0 : i32
    %c0_i32_0 = arith.constant 0 : i32
    %c0_i32_1 = arith.constant 0 : i32
    return %c0_i32, %c0_i32_0 : i32, i32
  }
  func.func @transform_5(%arg0: i32) -> (i32, i32) {
    %c0_i32 = arith.constant 0 : i32
    %c0_i32_0 = arith.constant 0 : i32
    %c0_i32_1 = arith.constant 0 : i32
    return %c0_i32, %c0_i32_0 : i32, i32
  }
  func.func @transform_6(%arg0: i32) -> (i32, i32) {
    %c0_i32 = arith.constant 0 : i32
    %c0_i32_0 = arith.constant 0 : i32
    return %arg0, %c0_i32 : i32, i32
  }
  func.func @transform_7(%arg0: i32) -> (i32, i32) {
    %c0_i32 = arith.constant 0 : i32
    %c0_i32_0 = arith.constant 0 : i32
    %c0_i32_1 = arith.constant 0 : i32
    return %c0_i32, %c0_i32_0 : i32, i32
  }
  func.func @transform_8(%arg0: i32) -> (i32, i32) {
    %c0_i32 = arith.constant 0 : i32
    %c0_i32_0 = arith.constant 0 : i32
    %c0_i32_1 = arith.constant 0 : i32
    return %c0_i32, %c0_i32_0 : i32, i32
  }
  func.func @transform_9(%arg0: i32) -> (i32, i32) {
    %c0_i32 = arith.constant 0 : i32
    %c0_i32_0 = arith.constant 0 : i32
    return %arg0, %c0_i32 : i32, i32
  }
  func.func @transform_10(%arg0: i32) -> (i32, i32) {
    %c0_i32 = arith.constant 0 : i32
    %c0_i32_0 = arith.constant 0 : i32
    return %arg0, %c0_i32 : i32, i32
  }
}

module attributes {stable_mosaic.version = 11 : i64} {
  func.func @_attn_kernel(%arg0: i32, %arg1: memref<1x8x32xf32, #tpu.memory_space<vmem>>, %arg2: memref<1x8x32xf32, #tpu.memory_space<vmem>>, %arg3: memref<1x8x32xf32, #tpu.memory_space<vmem>>, %arg4: memref<1x1x8xf32, #tpu.memory_space<vmem>>, %arg5: memref<1x8x32xf32, #tpu.memory_space<vmem>>) attributes {dimension_semantics = [#tpu.dimension_semantics<parallel>], iteration_bounds = array<i64: 2>, scalar_prefetch = 0 : i64, scratch_operands = 0 : i64, tpu.core_type = #tpu.core_type<tc>, window_params = [{transform_indices = @transform_0, window_bounds = array<i64: 1, 8, 32>}, {transform_indices = @transform_1, window_bounds = array<i64: 1, 8, 32>}, {transform_indices = @transform_2, window_bounds = array<i64: 1, 8, 32>}, {transform_indices = @transform_3, window_bounds = array<i64: 1, 1, 8>}, {transform_indices = @transform_4, window_bounds = array<i64: 1, 8, 32>}]} {
    %c0 = arith.constant 0 : index
    %c0_0 = arith.constant 0 : index
    %c0_1 = arith.constant 0 : index
    %0 = vector.load %arg1[%c0, %c0_0, %c0_1] : memref<1x8x32xf32, #tpu.memory_space<vmem>>, vector<1x8x32xf32>
    %1 = vector.shape_cast %0 : vector<1x8x32xf32> to vector<8x32xf32>
    %2 = arith.truncf %1 : vector<8x32xf32> to vector<8x32xbf16>
    %c0_2 = arith.constant 0 : index
    %c0_3 = arith.constant 0 : index
    %c0_4 = arith.constant 0 : index
    %3 = vector.load %arg2[%c0_2, %c0_3, %c0_4] : memref<1x8x32xf32, #tpu.memory_space<vmem>>, vector<1x8x32xf32>
    %4 = vector.shape_cast %3 : vector<1x8x32xf32> to vector<8x32xf32>
    %5 = arith.truncf %4 : vector<8x32xf32> to vector<8x32xbf16>
    %c0_5 = arith.constant 0 : index
    %c0_6 = arith.constant 0 : index
    %c0_7 = arith.constant 0 : index
    %6 = vector.load %arg3[%c0_5, %c0_6, %c0_7] : memref<1x8x32xf32, #tpu.memory_space<vmem>>, vector<1x8x32xf32>
    %7 = vector.shape_cast %6 : vector<1x8x32xf32> to vector<8x32xf32>
    %8 = arith.truncf %7 : vector<8x32xf32> to vector<8x32xbf16>
    %c0_8 = arith.constant 0 : index
    %c0_9 = arith.constant 0 : index
    %c0_10 = arith.constant 0 : index
    %9 = vector.load %arg4[%c0_8, %c0_9, %c0_10] : memref<1x1x8xf32, #tpu.memory_space<vmem>>, vector<1x1x8xf32>
    %10 = vector.shape_cast %9 : vector<1x1x8xf32> to vector<1x8xf32>
    %11 = vector.extract_strided_slice %2 {offsets = [0, 0], sizes = [8, 8], strides = [1, 1]} : vector<8x32xbf16> to vector<8x8xbf16>
    %12 = vector.extract_strided_slice %5 {offsets = [0, 0], sizes = [8, 8], strides = [1, 1]} : vector<8x32xbf16> to vector<8x8xbf16>
    %13 = vector.extract_strided_slice %8 {offsets = [0, 0], sizes = [8, 8], strides = [1, 1]} : vector<8x32xbf16> to vector<8x8xbf16>
    %cst = arith.constant dense<0.000000e+00> : vector<8x8xf32>
    %14 = tpu.matmul %11, %12, %cst {dimension_numbers = #tpu.dot_dimension_numbers<[1], [1], [0], [0], [0, 0, 1, 0], [], []>} : vector<8x8xbf16>, vector<8x8xbf16>, vector<8x8xf32> -> vector<8x8xf32>
    %15 = vector.broadcast %10 : vector<1x8xf32> to vector<8x8xf32>
    %16 = arith.addf %14, %15 : vector<8x8xf32>
    %cst_11 = arith.constant dense<0xFF800000> : vector<8xf32>
    %17 = vector.multi_reduction <maximumf>, %16, %cst_11 [1] : vector<8x8xf32> to vector<8xf32>
    %18 = vector.shape_cast %17 : vector<8xf32> to vector<8x1xf32>
    %19 = vector.broadcast %18 : vector<8x1xf32> to vector<8x8xf32>
    %20 = arith.subf %16, %19 : vector<8x8xf32>
    %21 = math.exp %20 : vector<8x8xf32>
    %cst_12 = arith.constant dense<0.000000e+00> : vector<8xf32>
    %22 = vector.multi_reduction <add>, %21, %cst_12 [1] : vector<8x8xf32> to vector<8xf32>
    %23 = vector.shape_cast %22 : vector<8xf32> to vector<8x1xf32>
    %24 = tpu.reciprocal %23 {approx = true} : vector<8x1xf32> -> vector<8x1xf32>
    %25 = vector.broadcast %24 : vector<8x1xf32> to vector<8x8xf32>
    %26 = arith.mulf %21, %25 : vector<8x8xf32>
    %27 = arith.truncf %26 : vector<8x8xf32> to vector<8x8xbf16>
    %cst_13 = arith.constant dense<0.000000e+00> : vector<8x8xf32>
    %28 = tpu.matmul %27, %13, %cst_13 {dimension_numbers = #tpu.dot_dimension_numbers<[1], [0], [0], [1], [0, 0, 1, 1], [], []>} : vector<8x8xbf16>, vector<8x8xbf16>, vector<8x8xf32> -> vector<8x8xf32>
    %29 = vector.extract_strided_slice %2 {offsets = [0, 8], sizes = [8, 8], strides = [1, 1]} : vector<8x32xbf16> to vector<8x8xbf16>
    %30 = vector.extract_strided_slice %5 {offsets = [0, 8], sizes = [8, 8], strides = [1, 1]} : vector<8x32xbf16> to vector<8x8xbf16>
    %31 = vector.extract_strided_slice %8 {offsets = [0, 8], sizes = [8, 8], strides = [1, 1]} : vector<8x32xbf16> to vector<8x8xbf16>
    %cst_14 = arith.constant dense<0.000000e+00> : vector<8x8xf32>
    %32 = tpu.matmul %29, %30, %cst_14 {dimension_numbers = #tpu.dot_dimension_numbers<[1], [1], [0], [0], [0, 0, 1, 0], [], []>} : vector<8x8xbf16>, vector<8x8xbf16>, vector<8x8xf32> -> vector<8x8xf32>
    %33 = vector.broadcast %10 : vector<1x8xf32> to vector<8x8xf32>
    %34 = arith.addf %32, %33 : vector<8x8xf32>
    %cst_15 = arith.constant dense<0xFF800000> : vector<8xf32>
    %35 = vector.multi_reduction <maximumf>, %34, %cst_15 [1] : vector<8x8xf32> to vector<8xf32>
    %36 = vector.shape_cast %35 : vector<8xf32> to vector<8x1xf32>
    %37 = vector.broadcast %36 : vector<8x1xf32> to vector<8x8xf32>
    %38 = arith.subf %34, %37 : vector<8x8xf32>
    %39 = math.exp %38 : vector<8x8xf32>
    %cst_16 = arith.constant dense<0.000000e+00> : vector<8xf32>
    %40 = vector.multi_reduction <add>, %39, %cst_16 [1] : vector<8x8xf32> to vector<8xf32>
    %41 = vector.shape_cast %40 : vector<8xf32> to vector<8x1xf32>
    %42 = tpu.reciprocal %41 {approx = true} : vector<8x1xf32> -> vector<8x1xf32>
    %43 = vector.broadcast %42 : vector<8x1xf32> to vector<8x8xf32>
    %44 = arith.mulf %39, %43 : vector<8x8xf32>
    %45 = arith.truncf %44 : vector<8x8xf32> to vector<8x8xbf16>
    %cst_17 = arith.constant dense<0.000000e+00> : vector<8x8xf32>
    %46 = tpu.matmul %45, %31, %cst_17 {dimension_numbers = #tpu.dot_dimension_numbers<[1], [0], [0], [1], [0, 0, 1, 1], [], []>} : vector<8x8xbf16>, vector<8x8xbf16>, vector<8x8xf32> -> vector<8x8xf32>
    %47 = vector.extract_strided_slice %2 {offsets = [0, 16], sizes = [8, 8], strides = [1, 1]} : vector<8x32xbf16> to vector<8x8xbf16>
    %48 = vector.extract_strided_slice %5 {offsets = [0, 16], sizes = [8, 8], strides = [1, 1]} : vector<8x32xbf16> to vector<8x8xbf16>
    %49 = vector.extract_strided_slice %8 {offsets = [0, 16], sizes = [8, 8], strides = [1, 1]} : vector<8x32xbf16> to vector<8x8xbf16>
    %cst_18 = arith.constant dense<0.000000e+00> : vector<8x8xf32>
    %50 = tpu.matmul %47, %48, %cst_18 {dimension_numbers = #tpu.dot_dimension_numbers<[1], [1], [0], [0], [0, 0, 1, 0], [], []>} : vector<8x8xbf16>, vector<8x8xbf16>, vector<8x8xf32> -> vector<8x8xf32>
    %51 = vector.broadcast %10 : vector<1x8xf32> to vector<8x8xf32>
    %52 = arith.addf %50, %51 : vector<8x8xf32>
    %cst_19 = arith.constant dense<0xFF800000> : vector<8xf32>
    %53 = vector.multi_reduction <maximumf>, %52, %cst_19 [1] : vector<8x8xf32> to vector<8xf32>
    %54 = vector.shape_cast %53 : vector<8xf32> to vector<8x1xf32>
    %55 = vector.broadcast %54 : vector<8x1xf32> to vector<8x8xf32>
    %56 = arith.subf %52, %55 : vector<8x8xf32>
    %57 = math.exp %56 : vector<8x8xf32>
    %cst_20 = arith.constant dense<0.000000e+00> : vector<8xf32>
    %58 = vector.multi_reduction <add>, %57, %cst_20 [1] : vector<8x8xf32> to vector<8xf32>
    %59 = vector.shape_cast %58 : vector<8xf32> to vector<8x1xf32>
    %60 = tpu.reciprocal %59 {approx = true} : vector<8x1xf32> -> vector<8x1xf32>
    %61 = vector.broadcast %60 : vector<8x1xf32> to vector<8x8xf32>
    %62 = arith.mulf %57, %61 : vector<8x8xf32>
    %63 = arith.truncf %62 : vector<8x8xf32> to vector<8x8xbf16>
    %cst_21 = arith.constant dense<0.000000e+00> : vector<8x8xf32>
    %64 = tpu.matmul %63, %49, %cst_21 {dimension_numbers = #tpu.dot_dimension_numbers<[1], [0], [0], [1], [0, 0, 1, 1], [], []>} : vector<8x8xbf16>, vector<8x8xbf16>, vector<8x8xf32> -> vector<8x8xf32>
    %65 = vector.extract_strided_slice %2 {offsets = [0, 24], sizes = [8, 8], strides = [1, 1]} : vector<8x32xbf16> to vector<8x8xbf16>
    %66 = vector.extract_strided_slice %5 {offsets = [0, 24], sizes = [8, 8], strides = [1, 1]} : vector<8x32xbf16> to vector<8x8xbf16>
    %67 = vector.extract_strided_slice %8 {offsets = [0, 24], sizes = [8, 8], strides = [1, 1]} : vector<8x32xbf16> to vector<8x8xbf16>
    %cst_22 = arith.constant dense<0.000000e+00> : vector<8x8xf32>
    %68 = tpu.matmul %65, %66, %cst_22 {dimension_numbers = #tpu.dot_dimension_numbers<[1], [1], [0], [0], [0, 0, 1, 0], [], []>} : vector<8x8xbf16>, vector<8x8xbf16>, vector<8x8xf32> -> vector<8x8xf32>
    %69 = vector.broadcast %10 : vector<1x8xf32> to vector<8x8xf32>
    %70 = arith.addf %68, %69 : vector<8x8xf32>
    %cst_23 = arith.constant dense<0xFF800000> : vector<8xf32>
    %71 = vector.multi_reduction <maximumf>, %70, %cst_23 [1] : vector<8x8xf32> to vector<8xf32>
    %72 = vector.shape_cast %71 : vector<8xf32> to vector<8x1xf32>
    %73 = vector.broadcast %72 : vector<8x1xf32> to vector<8x8xf32>
    %74 = arith.subf %70, %73 : vector<8x8xf32>
    %75 = math.exp %74 : vector<8x8xf32>
    %cst_24 = arith.constant dense<0.000000e+00> : vector<8xf32>
    %76 = vector.multi_reduction <add>, %75, %cst_24 [1] : vector<8x8xf32> to vector<8xf32>
    %77 = vector.shape_cast %76 : vector<8xf32> to vector<8x1xf32>
    %78 = tpu.reciprocal %77 {approx = true} : vector<8x1xf32> -> vector<8x1xf32>
    %79 = vector.broadcast %78 : vector<8x1xf32> to vector<8x8xf32>
    %80 = arith.mulf %75, %79 : vector<8x8xf32>
    %81 = arith.truncf %80 : vector<8x8xf32> to vector<8x8xbf16>
    %cst_25 = arith.constant dense<0.000000e+00> : vector<8x8xf32>
    %82 = tpu.matmul %81, %67, %cst_25 {dimension_numbers = #tpu.dot_dimension_numbers<[1], [0], [0], [1], [0, 0, 1, 1], [], []>} : vector<8x8xbf16>, vector<8x8xbf16>, vector<8x8xf32> -> vector<8x8xf32>
    %83 = tpu.concatenate %28, %46, %64, %82 in 1 : vector<8x8xf32>, vector<8x8xf32>, vector<8x8xf32>, vector<8x8xf32> -> vector<8x32xf32>
    %c0_26 = arith.constant 0 : index
    %c0_27 = arith.constant 0 : index
    %c0_28 = arith.constant 0 : index
    %84 = vector.load %arg5[%c0_26, %c0_27, %c0_28] : memref<1x8x32xf32, #tpu.memory_space<vmem>>, vector<1x8x32xf32>
    %85 = vector.shape_cast %84 : vector<1x8x32xf32> to vector<8x32xf32>
    %86 = vector.shape_cast %83 : vector<8x32xf32> to vector<1x8x32xf32>
    tpu.vector_store %arg5[%c0_26, %c0_27, %c0_28], %86 {strides = array<i32>} : memref<1x8x32xf32, #tpu.memory_space<vmem>>, vector<1x8x32xf32>,
    return
  }
  func.func @transform_0(%arg0: i32) -> (i32, i32, i32) {
    %c0_i32 = arith.constant 0 : i32
    %c0_i32_0 = arith.constant 0 : i32
    %c0_i32_1 = arith.constant 0 : i32
    return %arg0, %c0_i32, %c0_i32_0 : i32, i32, i32
  }
  func.func @transform_1(%arg0: i32) -> (i32, i32, i32) {
    %c0_i32 = arith.constant 0 : i32
    %c0_i32_0 = arith.constant 0 : i32
    %c0_i32_1 = arith.constant 0 : i32
    return %arg0, %c0_i32, %c0_i32_0 : i32, i32, i32
  }
  func.func @transform_2(%arg0: i32) -> (i32, i32, i32) {
    %c0_i32 = arith.constant 0 : i32
    %c0_i32_0 = arith.constant 0 : i32
    %c0_i32_1 = arith.constant 0 : i32
    return %arg0, %c0_i32, %c0_i32_0 : i32, i32, i32
  }
  func.func @transform_3(%arg0: i32) -> (i32, i32, i32) {
    %c0_i32 = arith.constant 0 : i32
    %c0_i32_0 = arith.constant 0 : i32
    %c0_i32_1 = arith.constant 0 : i32
    return %arg0, %c0_i32, %c0_i32_0 : i32, i32, i32
  }
  func.func @transform_4(%arg0: i32) -> (i32, i32, i32) {
    %c0_i32 = arith.constant 0 : i32
    %c0_i32_0 = arith.constant 0 : i32
    %c0_i32_1 = arith.constant 0 : i32
    return %arg0, %c0_i32, %c0_i32_0 : i32, i32, i32
  }
}

module attributes {stable_mosaic.version = 11 : i64} {
  func.func @_attn_kernel(%arg0: i32, %arg1: memref<1x8x32xf32, #tpu.memory_space<vmem>>, %arg2: memref<1x16x32xf32, #tpu.memory_space<vmem>>, %arg3: memref<1x16x32xf32, #tpu.memory_space<vmem>>, %arg4: memref<1x1x16xf32, #tpu.memory_space<vmem>>, %arg5: memref<1x8x32xf32, #tpu.memory_space<vmem>>) attributes {dimension_semantics = [#tpu.dimension_semantics<parallel>], iteration_bounds = array<i64: 2>, scalar_prefetch = 0 : i64, scratch_operands = 0 : i64, tpu.core_type = #tpu.core_type<tc>, window_params = [{transform_indices = @transform_0, window_bounds = array<i64: 1, 8, 32>}, {transform_indices = @transform_1, window_bounds = array<i64: 1, 16, 32>}, {transform_indices = @transform_2, window_bounds = array<i64: 1, 16, 32>}, {transform_indices = @transform_3, window_bounds = array<i64: 1, 1, 16>}, {transform_indices = @transform_4, window_bounds = array<i64: 1, 8, 32>}]} {
    %c0 = arith.constant 0 : index
    %c0_0 = arith.constant 0 : index
    %c0_1 = arith.constant 0 : index
    %0 = vector.load %arg1[%c0, %c0_0, %c0_1] : memref<1x8x32xf32, #tpu.memory_space<vmem>>, vector<1x8x32xf32>
    %1 = vector.shape_cast %0 : vector<1x8x32xf32> to vector<8x32xf32>
    %2 = arith.truncf %1 : vector<8x32xf32> to vector<8x32xbf16>
    %c0_2 = arith.constant 0 : index
    %c0_3 = arith.constant 0 : index
    %c0_4 = arith.constant 0 : index
    %3 = vector.load %arg2[%c0_2, %c0_3, %c0_4] : memref<1x16x32xf32, #tpu.memory_space<vmem>>, vector<1x16x32xf32>
    %4 = vector.shape_cast %3 : vector<1x16x32xf32> to vector<16x32xf32>
    %5 = arith.truncf %4 : vector<16x32xf32> to vector<16x32xbf16>
    %c0_5 = arith.constant 0 : index
    %c0_6 = arith.constant 0 : index
    %c0_7 = arith.constant 0 : index
    %6 = vector.load %arg3[%c0_5, %c0_6, %c0_7] : memref<1x16x32xf32, #tpu.memory_space<vmem>>, vector<1x16x32xf32>
    %7 = vector.shape_cast %6 : vector<1x16x32xf32> to vector<16x32xf32>
    %8 = arith.truncf %7 : vector<16x32xf32> to vector<16x32xbf16>
    %c0_8 = arith.constant 0 : index
    %c0_9 = arith.constant 0 : index
    %c0_10 = arith.constant 0 : index
    %9 = vector.load %arg4[%c0_8, %c0_9, %c0_10] : memref<1x1x16xf32, #tpu.memory_space<vmem>>, vector<1x1x16xf32>
    %10 = vector.shape_cast %9 : vector<1x1x16xf32> to vector<1x16xf32>
    %11 = vector.extract_strided_slice %2 {offsets = [0, 0], sizes = [8, 8], strides = [1, 1]} : vector<8x32xbf16> to vector<8x8xbf16>
    %12 = vector.extract_strided_slice %5 {offsets = [0, 0], sizes = [16, 8], strides = [1, 1]} : vector<16x32xbf16> to vector<16x8xbf16>
    %13 = vector.extract_strided_slice %8 {offsets = [0, 0], sizes = [16, 8], strides = [1, 1]} : vector<16x32xbf16> to vector<16x8xbf16>
    %cst = arith.constant dense<0.000000e+00> : vector<8x16xf32>
    %14 = tpu.matmul %11, %12, %cst {dimension_numbers = #tpu.dot_dimension_numbers<[1], [1], [0], [0], [0, 0, 1, 0], [], []>} : vector<8x8xbf16>, vector<16x8xbf16>, vector<8x16xf32> -> vector<8x16xf32>
    %15 = vector.broadcast %10 : vector<1x16xf32> to vector<8x16xf32>
    %16 = arith.addf %14, %15 : vector<8x16xf32>
    %cst_11 = arith.constant dense<0xFF800000> : vector<8xf32>
    %17 = vector.multi_reduction <maximumf>, %16, %cst_11 [1] : vector<8x16xf32> to vector<8xf32>
    %18 = vector.shape_cast %17 : vector<8xf32> to vector<8x1xf32>
    %19 = vector.broadcast %18 : vector<8x1xf32> to vector<8x16xf32>
    %20 = arith.subf %16, %19 : vector<8x16xf32>
    %21 = math.exp %20 : vector<8x16xf32>
    %cst_12 = arith.constant dense<0.000000e+00> : vector<8xf32>
    %22 = vector.multi_reduction <add>, %21, %cst_12 [1] : vector<8x16xf32> to vector<8xf32>
    %23 = vector.shape_cast %22 : vector<8xf32> to vector<8x1xf32>
    %24 = tpu.reciprocal %23 {approx = true} : vector<8x1xf32> -> vector<8x1xf32>
    %25 = vector.broadcast %24 : vector<8x1xf32> to vector<8x16xf32>
    %26 = arith.mulf %21, %25 : vector<8x16xf32>
    %27 = arith.truncf %26 : vector<8x16xf32> to vector<8x16xbf16>
    %cst_13 = arith.constant dense<0.000000e+00> : vector<8x8xf32>
    %28 = tpu.matmul %27, %13, %cst_13 {dimension_numbers = #tpu.dot_dimension_numbers<[1], [0], [0], [1], [0, 0, 1, 1], [], []>} : vector<8x16xbf16>, vector<16x8xbf16>, vector<8x8xf32> -> vector<8x8xf32>
    %29 = vector.extract_strided_slice %2 {offsets = [0, 8], sizes = [8, 8], strides = [1, 1]} : vector<8x32xbf16> to vector<8x8xbf16>
    %30 = vector.extract_strided_slice %5 {offsets = [0, 8], sizes = [16, 8], strides = [1, 1]} : vector<16x32xbf16> to vector<16x8xbf16>
    %31 = vector.extract_strided_slice %8 {offsets = [0, 8], sizes = [16, 8], strides = [1, 1]} : vector<16x32xbf16> to vector<16x8xbf16>
    %cst_14 = arith.constant dense<0.000000e+00> : vector<8x16xf32>
    %32 = tpu.matmul %29, %30, %cst_14 {dimension_numbers = #tpu.dot_dimension_numbers<[1], [1], [0], [0], [0, 0, 1, 0], [], []>} : vector<8x8xbf16>, vector<16x8xbf16>, vector<8x16xf32> -> vector<8x16xf32>
    %33 = vector.broadcast %10 : vector<1x16xf32> to vector<8x16xf32>
    %34 = arith.addf %32, %33 : vector<8x16xf32>
    %cst_15 = arith.constant dense<0xFF800000> : vector<8xf32>
    %35 = vector.multi_reduction <maximumf>, %34, %cst_15 [1] : vector<8x16xf32> to vector<8xf32>
    %36 = vector.shape_cast %35 : vector<8xf32> to vector<8x1xf32>
    %37 = vector.broadcast %36 : vector<8x1xf32> to vector<8x16xf32>
    %38 = arith.subf %34, %37 : vector<8x16xf32>
    %39 = math.exp %38 : vector<8x16xf32>
    %cst_16 = arith.constant dense<0.000000e+00> : vector<8xf32>
    %40 = vector.multi_reduction <add>, %39, %cst_16 [1] : vector<8x16xf32> to vector<8xf32>
    %41 = vector.shape_cast %40 : vector<8xf32> to vector<8x1xf32>
    %42 = tpu.reciprocal %41 {approx = true} : vector<8x1xf32> -> vector<8x1xf32>
    %43 = vector.broadcast %42 : vector<8x1xf32> to vector<8x16xf32>
    %44 = arith.mulf %39, %43 : vector<8x16xf32>
    %45 = arith.truncf %44 : vector<8x16xf32> to vector<8x16xbf16>
    %cst_17 = arith.constant dense<0.000000e+00> : vector<8x8xf32>
    %46 = tpu.matmul %45, %31, %cst_17 {dimension_numbers = #tpu.dot_dimension_numbers<[1], [0], [0], [1], [0, 0, 1, 1], [], []>} : vector<8x16xbf16>, vector<16x8xbf16>, vector<8x8xf32> -> vector<8x8xf32>
    %47 = vector.extract_strided_slice %2 {offsets = [0, 16], sizes = [8, 8], strides = [1, 1]} : vector<8x32xbf16> to vector<8x8xbf16>
    %48 = vector.extract_strided_slice %5 {offsets = [0, 16], sizes = [16, 8], strides = [1, 1]} : vector<16x32xbf16> to vector<16x8xbf16>
    %49 = vector.extract_strided_slice %8 {offsets = [0, 16], sizes = [16, 8], strides = [1, 1]} : vector<16x32xbf16> to vector<16x8xbf16>
    %cst_18 = arith.constant dense<0.000000e+00> : vector<8x16xf32>
    %50 = tpu.matmul %47, %48, %cst_18 {dimension_numbers = #tpu.dot_dimension_numbers<[1], [1], [0], [0], [0, 0, 1, 0], [], []>} : vector<8x8xbf16>, vector<16x8xbf16>, vector<8x16xf32> -> vector<8x16xf32>
    %51 = vector.broadcast %10 : vector<1x16xf32> to vector<8x16xf32>
    %52 = arith.addf %50, %51 : vector<8x16xf32>
    %cst_19 = arith.constant dense<0xFF800000> : vector<8xf32>
    %53 = vector.multi_reduction <maximumf>, %52, %cst_19 [1] : vector<8x16xf32> to vector<8xf32>
    %54 = vector.shape_cast %53 : vector<8xf32> to vector<8x1xf32>
    %55 = vector.broadcast %54 : vector<8x1xf32> to vector<8x16xf32>
    %56 = arith.subf %52, %55 : vector<8x16xf32>
    %57 = math.exp %56 : vector<8x16xf32>
    %cst_20 = arith.constant dense<0.000000e+00> : vector<8xf32>
    %58 = vector.multi_reduction <add>, %57, %cst_20 [1] : vector<8x16xf32> to vector<8xf32>
    %59 = vector.shape_cast %58 : vector<8xf32> to vector<8x1xf32>
    %60 = tpu.reciprocal %59 {approx = true} : vector<8x1xf32> -> vector<8x1xf32>
    %61 = vector.broadcast %60 : vector<8x1xf32> to vector<8x16xf32>
    %62 = arith.mulf %57, %61 : vector<8x16xf32>
    %63 = arith.truncf %62 : vector<8x16xf32> to vector<8x16xbf16>
    %cst_21 = arith.constant dense<0.000000e+00> : vector<8x8xf32>
    %64 = tpu.matmul %63, %49, %cst_21 {dimension_numbers = #tpu.dot_dimension_numbers<[1], [0], [0], [1], [0, 0, 1, 1], [], []>} : vector<8x16xbf16>, vector<16x8xbf16>, vector<8x8xf32> -> vector<8x8xf32>
    %65 = vector.extract_strided_slice %2 {offsets = [0, 24], sizes = [8, 8], strides = [1, 1]} : vector<8x32xbf16> to vector<8x8xbf16>
    %66 = vector.extract_strided_slice %5 {offsets = [0, 24], sizes = [16, 8], strides = [1, 1]} : vector<16x32xbf16> to vector<16x8xbf16>
    %67 = vector.extract_strided_slice %8 {offsets = [0, 24], sizes = [16, 8], strides = [1, 1]} : vector<16x32xbf16> to vector<16x8xbf16>
    %cst_22 = arith.constant dense<0.000000e+00> : vector<8x16xf32>
    %68 = tpu.matmul %65, %66, %cst_22 {dimension_numbers = #tpu.dot_dimension_numbers<[1], [1], [0], [0], [0, 0, 1, 0], [], []>} : vector<8x8xbf16>, vector<16x8xbf16>, vector<8x16xf32> -> vector<8x16xf32>
    %69 = vector.broadcast %10 : vector<1x16xf32> to vector<8x16xf32>
    %70 = arith.addf %68, %69 : vector<8x16xf32>
    %cst_23 = arith.constant dense<0xFF800000> : vector<8xf32>
    %71 = vector.multi_reduction <maximumf>, %70, %cst_23 [1] : vector<8x16xf32> to vector<8xf32>
    %72 = vector.shape_cast %71 : vector<8xf32> to vector<8x1xf32>
    %73 = vector.broadcast %72 : vector<8x1xf32> to vector<8x16xf32>
    %74 = arith.subf %70, %73 : vector<8x16xf32>
    %75 = math.exp %74 : vector<8x16xf32>
    %cst_24 = arith.constant dense<0.000000e+00> : vector<8xf32>
    %76 = vector.multi_reduction <add>, %75, %cst_24 [1] : vector<8x16xf32> to vector<8xf32>
    %77 = vector.shape_cast %76 : vector<8xf32> to vector<8x1xf32>
    %78 = tpu.reciprocal %77 {approx = true} : vector<8x1xf32> -> vector<8x1xf32>
    %79 = vector.broadcast %78 : vector<8x1xf32> to vector<8x16xf32>
    %80 = arith.mulf %75, %79 : vector<8x16xf32>
    %81 = arith.truncf %80 : vector<8x16xf32> to vector<8x16xbf16>
    %cst_25 = arith.constant dense<0.000000e+00> : vector<8x8xf32>
    %82 = tpu.matmul %81, %67, %cst_25 {dimension_numbers = #tpu.dot_dimension_numbers<[1], [0], [0], [1], [0, 0, 1, 1], [], []>} : vector<8x16xbf16>, vector<16x8xbf16>, vector<8x8xf32> -> vector<8x8xf32>
    %83 = tpu.concatenate %28, %46, %64, %82 in 1 : vector<8x8xf32>, vector<8x8xf32>, vector<8x8xf32>, vector<8x8xf32> -> vector<8x32xf32>
    %c0_26 = arith.constant 0 : index
    %c0_27 = arith.constant 0 : index
    %c0_28 = arith.constant 0 : index
    %84 = vector.load %arg5[%c0_26, %c0_27, %c0_28] : memref<1x8x32xf32, #tpu.memory_space<vmem>>, vector<1x8x32xf32>
    %85 = vector.shape_cast %84 : vector<1x8x32xf32> to vector<8x32xf32>
    %86 = vector.shape_cast %83 : vector<8x32xf32> to vector<1x8x32xf32>
    tpu.vector_store %arg5[%c0_26, %c0_27, %c0_28], %86 {strides = array<i32>} : memref<1x8x32xf32, #tpu.memory_space<vmem>>, vector<1x8x32xf32>,
    return
  }
  func.func @transform_0(%arg0: i32) -> (i32, i32, i32) {
    %c0_i32 = arith.constant 0 : i32
    %c0_i32_0 = arith.constant 0 : i32
    %c0_i32_1 = arith.constant 0 : i32
    return %arg0, %c0_i32, %c0_i32_0 : i32, i32, i32
  }
  func.func @transform_1(%arg0: i32) -> (i32, i32, i32) {
    %c0_i32 = arith.constant 0 : i32
    %c0_i32_0 = arith.constant 0 : i32
    %c0_i32_1 = arith.constant 0 : i32
    return %arg0, %c0_i32, %c0_i32_0 : i32, i32, i32
  }
  func.func @transform_2(%arg0: i32) -> (i32, i32, i32) {
    %c0_i32 = arith.constant 0 : i32
    %c0_i32_0 = arith.constant 0 : i32
    %c0_i32_1 = arith.constant 0 : i32
    return %arg0, %c0_i32, %c0_i32_0 : i32, i32, i32
  }
  func.func @transform_3(%arg0: i32) -> (i32, i32, i32) {
    %c0_i32 = arith.constant 0 : i32
    %c0_i32_0 = arith.constant 0 : i32
    %c0_i32_1 = arith.constant 0 : i32
    return %arg0, %c0_i32, %c0_i32_0 : i32, i32, i32
  }
  func.func @transform_4(%arg0: i32) -> (i32, i32, i32) {
    %c0_i32 = arith.constant 0 : i32
    %c0_i32_0 = arith.constant 0 : i32
    %c0_i32_1 = arith.constant 0 : i32
    return %arg0, %c0_i32, %c0_i32_0 : i32, i32, i32
  }
}

module attributes {stable_mosaic.version = 11 : i64} {
  func.func @_proj_res_norm_kernel(%arg0: i32, %arg1: memref<16x32xf32, #tpu.memory_space<vmem>>, %arg2: memref<32x32xbf16, #tpu.memory_space<vmem>>, %arg3: memref<1x32xf32, #tpu.memory_space<vmem>>, %arg4: memref<16x32xf32, #tpu.memory_space<vmem>>, %arg5: memref<1x32xf32, #tpu.memory_space<vmem>>, %arg6: memref<1x32xf32, #tpu.memory_space<vmem>>, %arg7: memref<16x32xf32, #tpu.memory_space<vmem>>) attributes {dimension_semantics = [#tpu.dimension_semantics<parallel>], iteration_bounds = array<i64: 1>, scalar_prefetch = 0 : i64, scratch_operands = 0 : i64, tpu.core_type = #tpu.core_type<tc>, window_params = [{transform_indices = @transform_0, window_bounds = array<i64: 16, 32>}, {pipeline_mode = #tpu.pipeline_mode<synchronous>, transform_indices = @transform_1, window_bounds = array<i64: 32, 32>}, {pipeline_mode = #tpu.pipeline_mode<synchronous>, transform_indices = @transform_2, window_bounds = array<i64: 1, 32>}, {transform_indices = @transform_3, window_bounds = array<i64: 16, 32>}, {pipeline_mode = #tpu.pipeline_mode<synchronous>, transform_indices = @transform_4, window_bounds = array<i64: 1, 32>}, {pipeline_mode = #tpu.pipeline_mode<synchronous>, transform_indices = @transform_5, window_bounds = array<i64: 1, 32>}, {transform_indices = @transform_6, window_bounds = array<i64: 16, 32>}]} {
    %c0 = arith.constant 0 : index
    %c0_0 = arith.constant 0 : index
    %0 = vector.load %arg1[%c0, %c0_0] : memref<16x32xf32, #tpu.memory_space<vmem>>, vector<16x32xf32>
    %1 = arith.truncf %0 : vector<16x32xf32> to vector<16x32xbf16>
    %c0_1 = arith.constant 0 : index
    %c0_2 = arith.constant 0 : index
    %2 = vector.load %arg4[%c0_1, %c0_2] : memref<16x32xf32, #tpu.memory_space<vmem>>, vector<16x32xf32>
    %c0_3 = arith.constant 0 : index
    %c0_4 = arith.constant 0 : index
    %3 = vector.load %arg2[%c0_3, %c0_4] : memref<32x32xbf16, #tpu.memory_space<vmem>>, vector<32x32xbf16>
    %cst = arith.constant dense<0.000000e+00> : vector<16x32xf32>
    %4 = tpu.matmul %1, %3, %cst {dimension_numbers = #tpu.dot_dimension_numbers<[1], [0], [0], [1], [0, 0, 1, 1], [], []>} : vector<16x32xbf16>, vector<32x32xbf16>, vector<16x32xf32> -> vector<16x32xf32>
    %5 = arith.addf %2, %4 : vector<16x32xf32>
    %c0_5 = arith.constant 0 : index
    %c0_6 = arith.constant 0 : index
    %6 = vector.load %arg3[%c0_5, %c0_6] : memref<1x32xf32, #tpu.memory_space<vmem>>, vector<1x32xf32>
    %7 = vector.broadcast %6 : vector<1x32xf32> to vector<16x32xf32>
    %8 = arith.addf %5, %7 : vector<16x32xf32>
    %c0_7 = arith.constant 0 : index
    %c0_8 = arith.constant 0 : index
    %9 = vector.load %arg5[%c0_7, %c0_8] : memref<1x32xf32, #tpu.memory_space<vmem>>, vector<1x32xf32>
    %c0_9 = arith.constant 0 : index
    %c0_10 = arith.constant 0 : index
    %10 = vector.load %arg6[%c0_9, %c0_10] : memref<1x32xf32, #tpu.memory_space<vmem>>, vector<1x32xf32>
    %cst_11 = arith.constant dense<0.000000e+00> : vector<16xf32>
    %11 = vector.multi_reduction <add>, %8, %cst_11 [1] : vector<16x32xf32> to vector<16xf32>
    %12 = vector.shape_cast %11 : vector<16xf32> to vector<16x1xf32>
    %cst_12 = arith.constant 3.200000e+01 : f32
    %13 = vector.broadcast %cst_12 : f32 to vector<16x1xf32>
    %14 = arith.divf %12, %13 : vector<16x1xf32>
    %15 = vector.broadcast %14 : vector<16x1xf32> to vector<16x32xf32>
    %16 = arith.subf %8, %15 : vector<16x32xf32>
    %17 = vector.broadcast %14 : vector<16x1xf32> to vector<16x32xf32>
    %18 = arith.subf %8, %17 : vector<16x32xf32>
    %19 = arith.mulf %16, %18 : vector<16x32xf32>
    %cst_13 = arith.constant dense<0.000000e+00> : vector<16xf32>
    %20 = vector.multi_reduction <add>, %19, %cst_13 [1] : vector<16x32xf32> to vector<16xf32>
    %21 = vector.shape_cast %20 : vector<16xf32> to vector<16x1xf32>
    %cst_14 = arith.constant 3.200000e+01 : f32
    %22 = vector.broadcast %cst_14 : f32 to vector<16x1xf32>
    %23 = arith.divf %21, %22 : vector<16x1xf32>
    %24 = vector.broadcast %14 : vector<16x1xf32> to vector<16x32xf32>
    %25 = arith.subf %8, %24 : vector<16x32xf32>
    %cst_15 = arith.constant 9.99999974E-6 : f32
    %26 = vector.broadcast %cst_15 : f32 to vector<16x1xf32>
    %27 = arith.addf %23, %26 : vector<16x1xf32>
    %28 = math.rsqrt %27 : vector<16x1xf32>
    %29 = vector.broadcast %28 : vector<16x1xf32> to vector<16x32xf32>
    %30 = arith.mulf %25, %29 : vector<16x32xf32>
    %31 = vector.broadcast %9 : vector<1x32xf32> to vector<16x32xf32>
    %32 = arith.mulf %30, %31 : vector<16x32xf32>
    %33 = vector.broadcast %10 : vector<1x32xf32> to vector<16x32xf32>
    %34 = arith.addf %32, %33 : vector<16x32xf32>
    %c0_16 = arith.constant 0 : index
    %c0_17 = arith.constant 0 : index
    %35 = vector.load %arg7[%c0_16, %c0_17] : memref<16x32xf32, #tpu.memory_space<vmem>>, vector<16x32xf32>
    tpu.vector_store %arg7[%c0_16, %c0_17], %34 {strides = array<i32>} : memref<16x32xf32, #tpu.memory_space<vmem>>, vector<16x32xf32>,
    return
  }
  func.func @transform_0(%arg0: i32) -> (i32, i32) {
    %c0_i32 = arith.constant 0 : i32
    %c0_i32_0 = arith.constant 0 : i32
    return %arg0, %c0_i32 : i32, i32
  }
  func.func @transform_1(%arg0: i32) -> (i32, i32) {
    %c0_i32 = arith.constant 0 : i32
    %c0_i32_0 = arith.constant 0 : i32
    %c0_i32_1 = arith.constant 0 : i32
    return %c0_i32, %c0_i32_0 : i32, i32
  }
  func.func @transform_2(%arg0: i32) -> (i32, i32) {
    %c0_i32 = arith.constant 0 : i32
    %c0_i32_0 = arith.constant 0 : i32
    %c0_i32_1 = arith.constant 0 : i32
    return %c0_i32, %c0_i32_0 : i32, i32
  }
  func.func @transform_3(%arg0: i32) -> (i32, i32) {
    %c0_i32 = arith.constant 0 : i32
    %c0_i32_0 = arith.constant 0 : i32
    return %arg0, %c0_i32 : i32, i32
  }
  func.func @transform_4(%arg0: i32) -> (i32, i32) {
    %c0_i32 = arith.constant 0 : i32
    %c0_i32_0 = arith.constant 0 : i32
    %c0_i32_1 = arith.constant 0 : i32
    return %c0_i32, %c0_i32_0 : i32, i32
  }
  func.func @transform_5(%arg0: i32) -> (i32, i32) {
    %c0_i32 = arith.constant 0 : i32
    %c0_i32_0 = arith.constant 0 : i32
    %c0_i32_1 = arith.constant 0 : i32
    return %c0_i32, %c0_i32_0 : i32, i32
  }
  func.func @transform_6(%arg0: i32) -> (i32, i32) {
    %c0_i32 = arith.constant 0 : i32
    %c0_i32_0 = arith.constant 0 : i32
    return %arg0, %c0_i32 : i32, i32
  }
}

module attributes {stable_mosaic.version = 11 : i64} {
  func.func @_ffn_kernel(%arg0: i32, %arg1: memref<16x32xf32, #tpu.memory_space<vmem>>, %arg2: memref<32x64xbf16, #tpu.memory_space<vmem>>, %arg3: memref<1x64xf32, #tpu.memory_space<vmem>>, %arg4: memref<64x32xbf16, #tpu.memory_space<vmem>>, %arg5: memref<1x32xf32, #tpu.memory_space<vmem>>, %arg6: memref<1x32xf32, #tpu.memory_space<vmem>>, %arg7: memref<1x32xf32, #tpu.memory_space<vmem>>, %arg8: memref<16x32xf32, #tpu.memory_space<vmem>>) attributes {dimension_semantics = [#tpu.dimension_semantics<parallel>], iteration_bounds = array<i64: 1>, scalar_prefetch = 0 : i64, scratch_operands = 0 : i64, tpu.core_type = #tpu.core_type<tc>, window_params = [{transform_indices = @transform_0, window_bounds = array<i64: 16, 32>}, {pipeline_mode = #tpu.pipeline_mode<synchronous>, transform_indices = @transform_1, window_bounds = array<i64: 32, 64>}, {pipeline_mode = #tpu.pipeline_mode<synchronous>, transform_indices = @transform_2, window_bounds = array<i64: 1, 64>}, {pipeline_mode = #tpu.pipeline_mode<synchronous>, transform_indices = @transform_3, window_bounds = array<i64: 64, 32>}, {pipeline_mode = #tpu.pipeline_mode<synchronous>, transform_indices = @transform_4, window_bounds = array<i64: 1, 32>}, {pipeline_mode = #tpu.pipeline_mode<synchronous>, transform_indices = @transform_5, window_bounds = array<i64: 1, 32>}, {pipeline_mode = #tpu.pipeline_mode<synchronous>, transform_indices = @transform_6, window_bounds = array<i64: 1, 32>}, {transform_indices = @transform_7, window_bounds = array<i64: 16, 32>}]} {
    %c0 = arith.constant 0 : index
    %c0_0 = arith.constant 0 : index
    %0 = vector.load %arg1[%c0, %c0_0] : memref<16x32xf32, #tpu.memory_space<vmem>>, vector<16x32xf32>
    %1 = arith.truncf %0 : vector<16x32xf32> to vector<16x32xbf16>
    %c0_1 = arith.constant 0 : index
    %c0_2 = arith.constant 0 : index
    %2 = vector.load %arg2[%c0_1, %c0_2] : memref<32x64xbf16, #tpu.memory_space<vmem>>, vector<32x64xbf16>
    %cst = arith.constant dense<0.000000e+00> : vector<16x64xf32>
    %3 = tpu.matmul %1, %2, %cst {dimension_numbers = #tpu.dot_dimension_numbers<[1], [0], [0], [1], [0, 0, 1, 1], [], []>} : vector<16x32xbf16>, vector<32x64xbf16>, vector<16x64xf32> -> vector<16x64xf32>
    %c0_3 = arith.constant 0 : index
    %c0_4 = arith.constant 0 : index
    %4 = vector.load %arg3[%c0_3, %c0_4] : memref<1x64xf32, #tpu.memory_space<vmem>>, vector<1x64xf32>
    %5 = vector.broadcast %4 : vector<1x64xf32> to vector<16x64xf32>
    %6 = arith.addf %3, %5 : vector<16x64xf32>
    %cst_5 = arith.constant 0.000000e+00 : f32
    %7 = vector.broadcast %cst_5 : f32 to vector<16x64xf32>
    %8 = arith.maximumf %6, %7 : vector<16x64xf32>
    %9 = arith.truncf %8 : vector<16x64xf32> to vector<16x64xbf16>
    %c0_6 = arith.constant 0 : index
    %c0_7 = arith.constant 0 : index
    %10 = vector.load %arg4[%c0_6, %c0_7] : memref<64x32xbf16, #tpu.memory_space<vmem>>, vector<64x32xbf16>
    %cst_8 = arith.constant dense<0.000000e+00> : vector<16x32xf32>
    %11 = tpu.matmul %9, %10, %cst_8 {dimension_numbers = #tpu.dot_dimension_numbers<[1], [0], [0], [1], [0, 0, 1, 1], [], []>} : vector<16x64xbf16>, vector<64x32xbf16>, vector<16x32xf32> -> vector<16x32xf32>
    %12 = arith.addf %0, %11 : vector<16x32xf32>
    %c0_9 = arith.constant 0 : index
    %c0_10 = arith.constant 0 : index
    %13 = vector.load %arg5[%c0_9, %c0_10] : memref<1x32xf32, #tpu.memory_space<vmem>>, vector<1x32xf32>
    %14 = vector.broadcast %13 : vector<1x32xf32> to vector<16x32xf32>
    %15 = arith.addf %12, %14 : vector<16x32xf32>
    %c0_11 = arith.constant 0 : index
    %c0_12 = arith.constant 0 : index
    %16 = vector.load %arg6[%c0_11, %c0_12] : memref<1x32xf32, #tpu.memory_space<vmem>>, vector<1x32xf32>
    %c0_13 = arith.constant 0 : index
    %c0_14 = arith.constant 0 : index
    %17 = vector.load %arg7[%c0_13, %c0_14] : memref<1x32xf32, #tpu.memory_space<vmem>>, vector<1x32xf32>
    %cst_15 = arith.constant dense<0.000000e+00> : vector<16xf32>
    %18 = vector.multi_reduction <add>, %15, %cst_15 [1] : vector<16x32xf32> to vector<16xf32>
    %19 = vector.shape_cast %18 : vector<16xf32> to vector<16x1xf32>
    %cst_16 = arith.constant 3.200000e+01 : f32
    %20 = vector.broadcast %cst_16 : f32 to vector<16x1xf32>
    %21 = arith.divf %19, %20 : vector<16x1xf32>
    %22 = vector.broadcast %21 : vector<16x1xf32> to vector<16x32xf32>
    %23 = arith.subf %15, %22 : vector<16x32xf32>
    %24 = vector.broadcast %21 : vector<16x1xf32> to vector<16x32xf32>
    %25 = arith.subf %15, %24 : vector<16x32xf32>
    %26 = arith.mulf %23, %25 : vector<16x32xf32>
    %cst_17 = arith.constant dense<0.000000e+00> : vector<16xf32>
    %27 = vector.multi_reduction <add>, %26, %cst_17 [1] : vector<16x32xf32> to vector<16xf32>
    %28 = vector.shape_cast %27 : vector<16xf32> to vector<16x1xf32>
    %cst_18 = arith.constant 3.200000e+01 : f32
    %29 = vector.broadcast %cst_18 : f32 to vector<16x1xf32>
    %30 = arith.divf %28, %29 : vector<16x1xf32>
    %31 = vector.broadcast %21 : vector<16x1xf32> to vector<16x32xf32>
    %32 = arith.subf %15, %31 : vector<16x32xf32>
    %cst_19 = arith.constant 9.99999974E-6 : f32
    %33 = vector.broadcast %cst_19 : f32 to vector<16x1xf32>
    %34 = arith.addf %30, %33 : vector<16x1xf32>
    %35 = math.rsqrt %34 : vector<16x1xf32>
    %36 = vector.broadcast %35 : vector<16x1xf32> to vector<16x32xf32>
    %37 = arith.mulf %32, %36 : vector<16x32xf32>
    %38 = vector.broadcast %16 : vector<1x32xf32> to vector<16x32xf32>
    %39 = arith.mulf %37, %38 : vector<16x32xf32>
    %40 = vector.broadcast %17 : vector<1x32xf32> to vector<16x32xf32>
    %41 = arith.addf %39, %40 : vector<16x32xf32>
    %c0_20 = arith.constant 0 : index
    %c0_21 = arith.constant 0 : index
    %42 = vector.load %arg8[%c0_20, %c0_21] : memref<16x32xf32, #tpu.memory_space<vmem>>, vector<16x32xf32>
    tpu.vector_store %arg8[%c0_20, %c0_21], %41 {strides = array<i32>} : memref<16x32xf32, #tpu.memory_space<vmem>>, vector<16x32xf32>,
    return
  }
  func.func @transform_0(%arg0: i32) -> (i32, i32) {
    %c0_i32 = arith.constant 0 : i32
    %c0_i32_0 = arith.constant 0 : i32
    return %arg0, %c0_i32 : i32, i32
  }
  func.func @transform_1(%arg0: i32) -> (i32, i32) {
    %c0_i32 = arith.constant 0 : i32
    %c0_i32_0 = arith.constant 0 : i32
    %c0_i32_1 = arith.constant 0 : i32
    return %c0_i32, %c0_i32_0 : i32, i32
  }
  func.func @transform_2(%arg0: i32) -> (i32, i32) {
    %c0_i32 = arith.constant 0 : i32
    %c0_i32_0 = arith.constant 0 : i32
    %c0_i32_1 = arith.constant 0 : i32
    return %c0_i32, %c0_i32_0 : i32, i32
  }
  func.func @transform_3(%arg0: i32) -> (i32, i32) {
    %c0_i32 = arith.constant 0 : i32
    %c0_i32_0 = arith.constant 0 : i32
    %c0_i32_1 = arith.constant 0 : i32
    return %c0_i32, %c0_i32_0 : i32, i32
  }
  func.func @transform_4(%arg0: i32) -> (i32, i32) {
    %c0_i32 = arith.constant 0 : i32
    %c0_i32_0 = arith.constant 0 : i32
    %c0_i32_1 = arith.constant 0 : i32
    return %c0_i32, %c0_i32_0 : i32, i32
  }
  func.func @transform_5(%arg0: i32) -> (i32, i32) {
    %c0_i32 = arith.constant 0 : i32
    %c0_i32_0 = arith.constant 0 : i32
    %c0_i32_1 = arith.constant 0 : i32
    return %c0_i32, %c0_i32_0 : i32, i32
  }
  func.func @transform_6(%arg0: i32) -> (i32, i32) {
    %c0_i32 = arith.constant 0 : i32
    %c0_i32_0 = arith.constant 0 : i32
    %c0_i32_1 = arith.constant 0 : i32
    return %c0_i32, %c0_i32_0 : i32, i32
  }
  func.func @transform_7(%arg0: i32) -> (i32, i32) {
    %c0_i32 = arith.constant 0 : i32
    %c0_i32_0 = arith.constant 0 : i32
    return %arg0, %c0_i32 : i32, i32
  }
}

module attributes {stable_mosaic.version = 11 : i64} {
  func.func @_layernorm_kernel(%arg0: i32, %arg1: memref<16x32xf32, #tpu.memory_space<vmem>>, %arg2: memref<1x32xf32, #tpu.memory_space<vmem>>, %arg3: memref<1x32xf32, #tpu.memory_space<vmem>>, %arg4: memref<16x32xf32, #tpu.memory_space<vmem>>) attributes {dimension_semantics = [#tpu.dimension_semantics<parallel>], iteration_bounds = array<i64: 1>, scalar_prefetch = 0 : i64, scratch_operands = 0 : i64, tpu.core_type = #tpu.core_type<tc>, window_params = [{transform_indices = @transform_0, window_bounds = array<i64: 16, 32>}, {pipeline_mode = #tpu.pipeline_mode<synchronous>, transform_indices = @transform_1, window_bounds = array<i64: 1, 32>}, {pipeline_mode = #tpu.pipeline_mode<synchronous>, transform_indices = @transform_2, window_bounds = array<i64: 1, 32>}, {transform_indices = @transform_3, window_bounds = array<i64: 16, 32>}]} {
    %c0 = arith.constant 0 : index
    %c0_0 = arith.constant 0 : index
    %0 = vector.load %arg1[%c0, %c0_0] : memref<16x32xf32, #tpu.memory_space<vmem>>, vector<16x32xf32>
    %c0_1 = arith.constant 0 : index
    %c0_2 = arith.constant 0 : index
    %1 = vector.load %arg2[%c0_1, %c0_2] : memref<1x32xf32, #tpu.memory_space<vmem>>, vector<1x32xf32>
    %c0_3 = arith.constant 0 : index
    %c0_4 = arith.constant 0 : index
    %2 = vector.load %arg3[%c0_3, %c0_4] : memref<1x32xf32, #tpu.memory_space<vmem>>, vector<1x32xf32>
    %cst = arith.constant dense<0.000000e+00> : vector<16xf32>
    %3 = vector.multi_reduction <add>, %0, %cst [1] : vector<16x32xf32> to vector<16xf32>
    %4 = vector.shape_cast %3 : vector<16xf32> to vector<16x1xf32>
    %cst_5 = arith.constant 3.200000e+01 : f32
    %5 = vector.broadcast %cst_5 : f32 to vector<16x1xf32>
    %6 = arith.divf %4, %5 : vector<16x1xf32>
    %7 = vector.broadcast %6 : vector<16x1xf32> to vector<16x32xf32>
    %8 = arith.subf %0, %7 : vector<16x32xf32>
    %9 = vector.broadcast %6 : vector<16x1xf32> to vector<16x32xf32>
    %10 = arith.subf %0, %9 : vector<16x32xf32>
    %11 = arith.mulf %8, %10 : vector<16x32xf32>
    %cst_6 = arith.constant dense<0.000000e+00> : vector<16xf32>
    %12 = vector.multi_reduction <add>, %11, %cst_6 [1] : vector<16x32xf32> to vector<16xf32>
    %13 = vector.shape_cast %12 : vector<16xf32> to vector<16x1xf32>
    %cst_7 = arith.constant 3.200000e+01 : f32
    %14 = vector.broadcast %cst_7 : f32 to vector<16x1xf32>
    %15 = arith.divf %13, %14 : vector<16x1xf32>
    %16 = vector.broadcast %6 : vector<16x1xf32> to vector<16x32xf32>
    %17 = arith.subf %0, %16 : vector<16x32xf32>
    %cst_8 = arith.constant 9.99999974E-6 : f32
    %18 = vector.broadcast %cst_8 : f32 to vector<16x1xf32>
    %19 = arith.addf %15, %18 : vector<16x1xf32>
    %20 = math.rsqrt %19 : vector<16x1xf32>
    %21 = vector.broadcast %20 : vector<16x1xf32> to vector<16x32xf32>
    %22 = arith.mulf %17, %21 : vector<16x32xf32>
    %23 = vector.broadcast %1 : vector<1x32xf32> to vector<16x32xf32>
    %24 = arith.mulf %22, %23 : vector<16x32xf32>
    %25 = vector.broadcast %2 : vector<1x32xf32> to vector<16x32xf32>
    %26 = arith.addf %24, %25 : vector<16x32xf32>
    %c0_9 = arith.constant 0 : index
    %c0_10 = arith.constant 0 : index
    %27 = vector.load %arg4[%c0_9, %c0_10] : memref<16x32xf32, #tpu.memory_space<vmem>>, vector<16x32xf32>
    tpu.vector_store %arg4[%c0_9, %c0_10], %26 {strides = array<i32>} : memref<16x32xf32, #tpu.memory_space<vmem>>, vector<16x32xf32>,
    return
  }
  func.func @transform_0(%arg0: i32) -> (i32, i32) {
    %c0_i32 = arith.constant 0 : i32
    %c0_i32_0 = arith.constant 0 : i32
    return %arg0, %c0_i32 : i32, i32
  }
  func.func @transform_1(%arg0: i32) -> (i32, i32) {
    %c0_i32 = arith.constant 0 : i32
    %c0_i32_0 = arith.constant 0 : i32
    %c0_i32_1 = arith.constant 0 : i32
    return %c0_i32, %c0_i32_0 : i32, i32
  }
  func.func @transform_2(%arg0: i32) -> (i32, i32) {
    %c0_i32 = arith.constant 0 : i32
    %c0_i32_0 = arith.constant 0 : i32
    %c0_i32_1 = arith.constant 0 : i32
    return %c0_i32, %c0_i32_0 : i32, i32
  }
  func.func @transform_3(%arg0: i32) -> (i32, i32) {
    %c0_i32 = arith.constant 0 : i32
    %c0_i32_0 = arith.constant 0 : i32
    return %arg0, %c0_i32 : i32, i32
  }
}

</mosaic_0001>

<bundles_post_ra>
// kernel: transformer_forward.23
= control target key start
LH: loop header
LB: loop body
LE: loop exit
PB: predicated region body
PF: predicated region fallthrough
CT: control target
= control target key end

     0   :  { %vm64_vm0 = vcmask 261120   ;;  %s279_s29 = smov 96   ;;  %s419_s2 = inlined_call_operand.vmem [shape: bf16[32,64], index: 2, kind: input, shape index: {}]   ;;  %s420_s0 = inlined_call_operand.vmem [shape: f32[32,32], index: 0, kind: input, shape index: {}]   ;;  %s421_s1 = inlined_call_operand.vmem [shape: f32[32,32], index: 1, kind: input, shape index: {}]   ;;  %s422_s4 = inlined_call_operand.vmem [shape: bf16[32,32], index: 4, kind: input, shape index: {}]   ;;  %s423_s3 = inlined_call_operand.vmem [shape: f32[1,64], index: 3, kind: input, shape index: {}]   ;;  %s424_s6 = inlined_call_operand.vmem [shape: f32[32,32], index: 6, kind: output, shape index: {0}]   ;;  %s425_s5 = inlined_call_operand.vmem [shape: f32[1,32], index: 5, kind: input, shape index: {}]   ;;  %s426_s8 = inlined_call_operand.vmem [shape: f32[32,32], index: 8, kind: output, shape index: {2}]   ;;  %s427_s7 = inlined_call_operand.vmem [shape: f32[32,32], index: 7, kind: output, shape index: {1}]  }
   0x1   :  { %v275_v0 = vld [vmem:[%s419_s2] sm:$0xff]   ;;  %v276_v1 = vld [vmem:[%s419_s2 + $0x8] sm:$0xff]   ;;  %v29_v7 = vld [vmem:[%s420_s0 + $0x10] sm:$0xff] }
   0x2   :  { %258 = vmatprep.subr.bf16.mxu0 %v275_v0  ;;  %v27_v2 = vld [vmem:[%s420_s0] sm:$0xff]  ;;  %v28_v3 = vld [vmem:[%s420_s0 + $0x8] sm:$0xff]  ;;  %v30_v8 = vld [vmem:[%s420_s0 + $0x18] sm:$0xff] }
   0x3   :  { %v31_v4 = vld [vmem:[%s421_s1] sm:$0xff]  ;;  %259 = vmatpush3.bf16.msra.mxu0 %v275_v0  ;;  %v32_v5 = vld [vmem:[%s421_s1 + $0x8] sm:$0xff]  ;;  %v144_v9 = vpack.c.bf16 %v28_v3, %v27_v2  ;;  %v33_v11 = vld [vmem:[%s421_s1 + $0x10] sm:$0xff]  ;;  %v145_v19 = vpack.c.bf16 %v30_v8, %v29_v7 }
   0x4   :  { %v35_v6 = vadd.f32 %v31_v4, %v27_v2  ;;  %260 = vmatprep.subr.bf16.mxu0 %v276_v1  ;;  %v36_v10 = vadd.f32 %v32_v5, %v28_v3  ;;  %v34_v12 = vld [vmem:[%s421_s1 + $0x18] sm:$0xff]  ;;  %v37_v13 = vadd.f32 %v33_v11, %v29_v7  ;;  %v277_v15 = vld [vmem:[%s422_s4] sm:$0xff]   ;;  %v278_v17 = vld [vmem:[%s422_s4 + $0x8] sm:$0xff]  }
   0x5   :  { %v38_v14 = vadd.f32 %v34_v12, %v30_v8  ;;  %270 = vmatprep.mubr.msk.bf16.mxu1 %vm64_vm0, %v144_v9  ;;  %266 = vmatprep.subr.bf16.mxu1 %v277_v15  ;;  %v240_v20 = vld [vmem:[%s423_s3] ss:$0 sm:$0xff] }
   0x6   :  { %v39_v16 = vpack.c.bf16 %v36_v10, %v35_v6  ;;  %267 = vmatpush3.bf16.msra.mxu1 %v277_v15  ;;  %v245_v28 = vld [vmem:[%s425_s5] ss:$0 sm:$0xff] }
   0x7   :  { %261 = vmatpush3.bf16.msra.mxu0 %v276_v1  ;;  %v40_v18 = vpack.c.bf16 %v38_v14, %v37_v13  ;;  %268 = vmatprep.subr.bf16.mxu1 %v278_v17 }
   0x8   :  { %262 = vmatprep.mubr.msk.bf16.mxu0 %vm64_vm0, %v39_v16 }
   0xa   :  { %263 = vmatmul.mubr.msk.bf16.vlgmr.msra.gmra.mrb[0].mxu0 %vm64_vm0, %v40_v18  ;;  %269 = vmatpush3.bf16.msra.mxu1 %v278_v17 }
   0xd   :  { %271 = vmatmul.mubr.msk.bf16.vlgmr.msra.gmra.mrb[0].mxu1 %vm64_vm0, %v145_v19 }
  0xdd   :  { %v264_v21 = vpop.f32.mrb[0].mxu0 }
  0xde   :  { %v114_v22 = vadd.f32 %v264_v21, %v240_v20  ;;  %v105_v23 = vpop.f32.mrb[1].mxu0 }
  0xdf   :  { %v106_v24 = vadd.f32 %v240_v20, %v105_v23  ;;  %v265_v25 = vpop.f32.mrb[2].mxu0 }
  0xe0   :  { %122 = vst.msk [vmem:[%s424_s6 + $0x10] sm:$0xff] %vm64_vm0, %v114_v22  ;;  %v117_v26 = vadd.f32 %v265_v25, %v240_v20  ;;  %132 = vrot.lane.b32.xlu1 %v114_v22, %s279_s29  ;;  %v108_v27 = vpop.f32.mrb[3].mxu0  ;;  %v272_v30 = vpop.f32.mrb[0].mxu1 }
  0xe1   :  { %120 = vst.msk [vmem:[%s424_s6] sm:$0xff] %vm64_vm0, %v106_v24  ;;  %v109_v29 = vadd.f32 %v240_v20, %v108_v27  ;;  %128 = vrot.lane.b32.xlu0 %v106_v24, %s279_s29  ;;  %v218_v31 = vadd.f32 %v272_v30, %v245_v28  ;;  %v209_v32 = vpop.f32.mrb[1].mxu1 }
  0xe2   :  { %123 = vst.msk [vmem:[%s424_s6 + $0x18] sm:$0xff] %vm64_vm0, %v117_v26  ;;  %v210_v33 = vadd.f32 %v245_v28, %v209_v32  ;;  %v273_v34 = vpop.f32.mrb[2].mxu1 }
  0xe3   :  { %121 = vst.msk [vmem:[%s424_s6 + $0x8] sm:$0xff] %vm64_vm0, %v109_v29  ;;  %226 = vst.msk [vmem:[%s426_s8 + $0x10] sm:$0xff] %vm64_vm0, %v218_v31  ;;  %v221_v35 = vadd.f32 %v273_v34, %v245_v28  ;;  %v212_v36 = vpop.f32.mrb[3].mxu1 }
  0xe4   :  { %134 = vrot.lane.b32.xlu1 %v117_v26, %s279_s29  ;;  %224 = vst.msk [vmem:[%s426_s8] sm:$0xff] %vm64_vm0, %v210_v33  ;;  %v213_v37 = vadd.f32 %v245_v28, %v212_v36 }
  0xe5   :  { %130 = vrot.lane.b32.xlu0 %v109_v29, %s279_s29  ;;  %227 = vst.msk [vmem:[%s426_s8 + $0x18] sm:$0xff] %vm64_vm0, %v221_v35 }
  0xe6   :  { %225 = vst.msk [vmem:[%s426_s8 + $0x8] sm:$0xff] %vm64_vm0, %v213_v37 }
 0x152   :  { %v133_v38 = vpop.permute.xlu1 %132 }
 0x153   :  { %142 = vst.msk [vmem:[%s427_s7 + $0x10] sm:$0xff] %vm64_vm0, %v133_v38  ;;  %v129_v39 = vpop.permute.xlu0 %128 }
 0x154   :  { %140 = vst.msk [vmem:[%s427_s7] sm:$0xff] %vm64_vm0, %v129_v39 }
 0x156   :  { %v135_v40 = vpop.permute.xlu1 %134 }
 0x157   :  { %143 = vst.msk [vmem:[%s427_s7 + $0x18] sm:$0xff] %vm64_vm0, %v135_v40  ;;  %v131_v41 = vpop.permute.xlu0 %130 }
 0x158   :  { %141 = vst.msk [vmem:[%s427_s7 + $0x8] sm:$0xff] %vm64_vm0, %v131_v41 }

// kernel: transformer_forward.25
= control target key start
LH: loop header
LB: loop body
LE: loop exit
PB: predicated region body
PF: predicated region fallthrough
CT: control target
= control target key end

     0   :  { %vm50_vm0 = vcmask 261120   ;;  %s333_s1 = inlined_call_operand.vmem [shape: bf16[32,32], index: 1, kind: input, shape index: {}]   ;;  %s334_s0 = inlined_call_operand.vmem [shape: f32[32,32], index: 0, kind: input, shape index: {}]   ;;  %s335_s3 = inlined_call_operand.vmem [shape: f32[32,32], index: 3, kind: input, shape index: {}]   ;;  %s336_s2 = inlined_call_operand.vmem [shape: f32[1,32], index: 2, kind: input, shape index: {}]   ;;  %s337_s4 = inlined_call_operand.vmem [shape: f32[1,32], index: 4, kind: input, shape index: {}]   ;;  %s338_s5 = inlined_call_operand.vmem [shape: f32[1,32], index: 5, kind: input, shape index: {}]   ;;  %s339_s6 = inlined_call_operand.vmem [shape: f32[32,32], index: 6, kind: output, shape index: {}]  }
   0x1   :  { %v223_v0 = vld [vmem:[%s333_s1] sm:$0xff]   ;;  %v224_v1 = vld [vmem:[%s333_s1 + $0x8] sm:$0xff]   ;;  %v26_v5 = vld [vmem:[%s334_s0 + $0x10] sm:$0xff] }
   0x2   :  { %215 = vmatprep.subr.bf16.mxu0 %v223_v0  ;;  %v24_v2 = vld [vmem:[%s334_s0] sm:$0xff]  ;;  %v25_v3 = vld [vmem:[%s334_s0 + $0x8] sm:$0xff]  ;;  %v27_v6 = vld [vmem:[%s334_s0 + $0x18] sm:$0xff] }
   0x3   :  { %216 = vmatpush3.bf16.msra.mxu0 %v223_v0  ;;  %v28_v4 = vpack.c.bf16 %v25_v3, %v24_v2  ;;  %v29_v7 = vpack.c.bf16 %v27_v6, %v26_v5  ;;  %v32_v8 = vld [vmem:[%s335_s3 + $0x10] sm:$0xff]  ;;  %v30_v9 = vld [vmem:[%s335_s3] sm:$0xff]  ;;  %v33_v11 = vld [vmem:[%s335_s3 + $0x18] sm:$0xff] }
   0x4   :  { %217 = vmatprep.subr.bf16.mxu0 %v224_v1  ;;  %v208_v12 = vld [vmem:[%s336_s2] ss:$0 sm:$0xff]  ;;  %v31_v15 = vld [vmem:[%s335_s3 + $0x8] sm:$0xff] }
   0x5   :  { %219 = vmatprep.mubr.msk.bf16.mxu0 %vm50_vm0, %v28_v4  ;;  %v209_v62 = vld [vmem:[%s337_s4] ss:$0 sm:$0xff] }
   0x6   :  { %v210_v0 = vld [vmem:[%s338_s5] ss:$0 sm:$0xff] }
   0x7   :  { %218 = vmatpush3.bf16.msra.mxu0 %v224_v1 }
   0xa   :  { %220 = vmatmul.mubr.msk.bf16.vlgmr.msra.gmra.mrb[0].mxu0 %vm50_vm0, %v29_v7 }
  0xdd   :  { %v221_v10 = vpop.f32.mrb[0].mxu0 }
  0xde   :  { %v108_v13 = vadd.f32 %v221_v10, %v32_v8  ;;  %v91_v14 = vpop.f32.mrb[1].mxu0 }
  0xdf   :  { %v106_v16 = vadd.f32 %v91_v14, %v30_v9  ;;  %v222_v17 = vpop.f32.mrb[2].mxu0 }
  0xe0   :  { %v109_v18 = vadd.f32 %v222_v17, %v33_v11  ;;  %v94_v19 = vpop.f32.mrb[3].mxu0  ;;  %v119_v20 = vadd.f32 %v208_v12, %v108_v13 }
  0xe1   :  { %v107_v21 = vadd.f32 %v94_v19, %v31_v15  ;;  %v117_v22 = vadd.f32 %v208_v12, %v106_v16 }
  0xe2   :  { %v129_v23 = vsel %vm50_vm0, %v119_v20, 0.0  ;;  %v120_v24 = vadd.f32 %v208_v12, %v109_v18 }
  0xe3   :  { %130 = vadd.xlane.f32.xlu1 %v129_v23  ;;  %v123_v25 = vsel %vm50_vm0, %v117_v22, 0.0  ;;  %v118_v26 = vadd.f32 %v208_v12, %v107_v21 }
  0xe4   :  { %124 = vadd.xlane.f32.xlu0 %v123_v25  ;;  %v132_v27 = vsel %vm50_vm0, %v120_v24, 0.0 }
  0xe5   :  { %v126_v28 = vsel %vm50_vm0, %v118_v26, 0.0 }
  0xe7   :  { %133 = vadd.xlane.f32.xlu1 %v132_v27 }
  0xe8   :  { %127 = vadd.xlane.f32.xlu0 %v126_v28 }
 0x170   :  { %v131_v29 = vpop.xlane.xlu1 %130 }
 0x171   :  { %v138_v30 = vmul.f32 0.03125, %v131_v29  ;;  %v125_v31 = vpop.xlane.xlu0 %124 }
 0x172   :  { %v136_v32 = vmul.f32 0.03125, %v125_v31 }
 0x173   :  { %v142_v33 = vsub.f32 %v119_v20, %v138_v30 }
 0x174   :  { %v140_v34 = vsub.f32 %v117_v22, %v136_v32  ;;  %v134_v35 = vpop.xlane.xlu1 %133 }
 0x175   :  { %v139_v36 = vmul.f32 0.03125, %v134_v35  ;;  %v128_v37 = vpop.xlane.xlu0 %127  ;;  %v146_v43 = vmul.f32 %v142_v33, %v142_v33 }
 0x176   :  { %v137_v38 = vmul.f32 0.03125, %v128_v37  ;;  %v144_v39 = vmul.f32 %v140_v34, %v140_v34 }
 0x177   :  { %v143_v40 = vsub.f32 %v120_v24, %v139_v36  ;;  %v154_v45 = vsel %vm50_vm0, %v146_v43, 0.0 }
 0x178   :  { %v141_v41 = vsub.f32 %v118_v26, %v137_v38  ;;  %v148_v42 = vsel %vm50_vm0, %v144_v39, 0.0 }
 0x179   :  { %149 = vadd.xlane.f32.xlu0 %v148_v42  ;;  %v147_v47 = vmul.f32 %v143_v40, %v143_v40 }
 0x17a   :  { %v145_v44 = vmul.f32 %v141_v41, %v141_v41 }
 0x17b   :  { %v157_v48 = vsel %vm50_vm0, %v147_v47, 0.0 }
 0x17c   :  { %v151_v46 = vsel %vm50_vm0, %v145_v44, 0.0 }
 0x17d   :  { %155 = vadd.xlane.f32.xlu0 %v154_v45  ;;  %152 = vadd.xlane.f32.xlu1 %v151_v46 }
 0x181   :  { %158 = vadd.xlane.f32.xlu1 %v157_v48 }
 0x206   :  { %v150_v49 = vpop.xlane.xlu0 %149 }
 0x207   :  { %v160_v50 = vmul.f32 0.03125, %v150_v49 }
 0x209   :  { %v164_v51 = vadd.f32 1e-05, %v160_v50 }
 0x20a   :  { %v153_v52 = vpop.xlane.xlu1 %152  ;;  %v156_v53 = vpop.xlane.xlu0 %155 }
 0x20b   :  { %225 = vrsqrt.f32 %v164_v51  ;;  %v161_v54 = vmul.f32 0.03125, %v153_v52  ;;  %v162_v55 = vmul.f32 0.03125, %v156_v53 }
 0x20d   :  { %v165_v56 = vadd.f32 1e-05, %v161_v54  ;;  %v166_v57 = vadd.f32 1e-05, %v162_v55 }
 0x20e   :  { %v159_v58 = vpop.xlane.xlu1 %158 }
 0x20f   :  { %227 = vrsqrt.f32 %v165_v56  ;;  %v163_v59 = vmul.f32 0.03125, %v159_v58 }
 0x210   :  { %229 = vrsqrt.f32 %v166_v57 }
 0x211   :  { %v167_v60 = vadd.f32 1e-05, %v163_v59 }
 0x213   :  { %231 = vrsqrt.f32 %v167_v60 }
 0x215   :  { %v226_v61 = vpop.eup %225 }
 0x216   :  { %v172_v63 = vmul.f32 %v226_v61, %v140_v34 }
 0x218   :  { %v182_v1 = vmul.f32 %v209_v62, %v172_v63 }
 0x219   :  { %v228_v2 = vpop.eup %227 }
 0x21a   :  { %v230_v3 = vpop.eup %229  ;;  %v192_v4 = vadd.f32 %v210_v0, %v182_v1  ;;  %v173_v5 = vmul.f32 %v228_v2, %v141_v41 }
 0x21b   :  { %v174_v6 = vmul.f32 %v230_v3, %v142_v33 }
 0x21c   :  { %196 = vst.msk [vmem:[%s339_s6] sm:$0xff] %vm50_vm0, %v192_v4  ;;  %v183_v7 = vmul.f32 %v209_v62, %v173_v5 }
 0x21d   :  { %v232_v8 = vpop.eup %231  ;;  %v184_v9 = vmul.f32 %v209_v62, %v174_v6 }
 0x21e   :  { %v193_v10 = vadd.f32 %v210_v0, %v183_v7  ;;  %v175_v11 = vmul.f32 %v232_v8, %v143_v40 }
 0x21f   :  { %v194_v12 = vadd.f32 %v210_v0, %v184_v9 }
 0x220   :  { %197 = vst.msk [vmem:[%s339_s6 + $0x8] sm:$0xff] %vm50_vm0, %v193_v10  ;;  %v185_v13 = vmul.f32 %v209_v62, %v175_v11 }
 0x221   :  { %198 = vst.msk [vmem:[%s339_s6 + $0x10] sm:$0xff] %vm50_vm0, %v194_v12 }
 0x222   :  { %v195_v14 = vadd.f32 %v210_v0, %v185_v13 }
 0x224   :  { %199 = vst.msk [vmem:[%s339_s6 + $0x18] sm:$0xff] %vm50_vm0, %v195_v14 }

// kernel: transformer_forward.24
= control target key start
LH: loop header
LB: loop body
LE: loop exit
PB: predicated region body
PF: predicated region fallthrough
CT: control target
= control target key end

     0   :  { %s1054_s15 = smov 0   ;;  %s1173_s0 = inlined_call_operand.vmem [shape: f32[2,16,32], index: 0, kind: input, shape index: {}]   ;;  %s1174_s1 = inlined_call_operand.vmem [shape: f32[2,16,32], index: 1, kind: input, shape index: {}]   ;;  %s1175_s2 = inlined_call_operand.vmem [shape: f32[2,16,32], index: 2, kind: input, shape index: {}]   ;;  %s1176_s3 = inlined_call_operand.vmem [shape: f32[2,1,16], index: 3, kind: input, shape index: {}]   ;;  %s1177_s4 = inlined_call_operand.vmem [shape: f32[2,16,32], index: 4, kind: output, shape index: {}]  }
   0x1 LB: > { %s873_s16 = sadd.s32 4294967295, %s1019_s15   ;;  %p877_p0 = scmp.ge.s32.totalorder %s1019_s15, 1  ;;  %s1019_s15 = sphi %s1054_s15, %s14_s15  }
   0x2   : > { %p190_p1 = scmp.lt.s32.totalorder %s1019_s15, 3 }
   0x4   : > { %p191_p2 = pnand %p877_p0, %p190_p1 }
   0x5   : > { %p229_p3 = scmp.lt.s32.totalorder (!%p191_p2), %s873_s16, 1  ;;  %v1021_v0 = vmov (!%p191_p2), 0.0   ;;  %vm1022_vm0 = vmmov (!%p191_p2), 0   ;;  %vm269_vm1 = vcmask (!%p191_p2), 64512   ;;  %vm317_vm2 = vcmask (!%p191_p2), 130048   ;;  %s1023_s27 = smov (!%p191_p2), 120  }
   0x6   : > { %194 = sbr.rel (%p191_p2) target bundleno = 1495 (0x5d7), region = 36  ;;  %917 = vmatprep.subr.bf16.mxu0 (!%p191_p2), %v1021_v0  ;;  %919 = vmatprep.mubr.msk.bf16.mxu0 (!%p191_p2), %vm1022_vm0, %v1021_v0  ;;  %s1024_s28 = smov (!%p191_p2), 104   ;;  %vm779_vm3 = vcmask (!%p191_p2), 195584   ;;  %vm782_vm4 = vcmask (!%p191_p2), 261120  }
   0x7   : > { %923 = vmatprep.subr.bf16.mxu1 (!%p191_p2), %v1021_v0  ;;  %925 = vmatprep.mubr.msk.bf16.mxu1 (!%p191_p2), %vm1022_vm0, %v1021_v0  ;;  %s1025_s6 = smov (!%p191_p2), 112   ;;  %s1026_s7 = smov (!%p191_p2), 8  }
   0x8   : > { %s1027_s8 = smov (!%p191_p2), 16   ;;  %s1028_s9 = smov (!%p191_p2), 24  }
   0xd   : > { %s1179_s16 = smov (!%p229_p3, %s873_s16), 1 }
   0xe   : > { %s1068_s17 = sshll.u32 %s1179_s16, 4  ;;  %s246_s26 = scalar_lea.vmem %s1176_s3, %s1179_s16 }
   0xf   : > { %s238_s20 = scalar_lea.vmem %s1174_s1, %s1068_s17  ;;  %s233_s23 = scalar_lea.vmem %s1173_s0, %s1068_s17  ;;  %v1086_v8 = vld [vmem:[%s246_s26] ss:$0 sm:$0xff] }
  0x10   : > { %v256_v1 = vld [vmem:[%s238_s20] sm:$0xff]  ;;  %v257_v2 = vld [vmem:[%s238_s20 + $0x8] sm:$0xff]  ;;  %s243_s5 = scalar_lea.vmem %s1175_s2, %s1068_s17  ;;  %s251_s12 = scalar_lea.vmem %s1177_s4, %s1068_s17 }
  0x11   : > { %v258_v3 = vpack.c.bf16 %v257_v2, %v256_v1  ;;  %v253_v5 = vld [vmem:[%s233_s23] sm:$0xff]  ;;  %v254_v6 = vld [vmem:[%s233_s23 + $0x8] sm:$0xff] }
  0x12   : > { %v255_v7 = vpack.c.bf16 %v254_v6, %v253_v5  ;;  %v259_v27 = vld [vmem:[%s243_s5] sm:$0xff]  ;;  %v260_v28 = vld [vmem:[%s243_s5 + $0x8] sm:$0xff] }
  0x13   : > { %v274_v4 = vsel %vm269_vm1, %v258_v3, 0  ;;  %v1100_v29 = vpack.c.bf16 %v260_v28, %v259_v27 }
  0x14   : > { %918 = vmatpush3.bf16.xpose.msra.mxu0 %v274_v4 }
  0x15   : > { %935 = vmatprep.subr.bf16.mxu0 %v1021_v0  ;;  %924 = vmatpush3.bf16.msra.mxu1 %v1100_v29 }
  0x16   : > { %929 = vmatprep.subr.bf16.mxu1 %v1021_v0 }
  0x1b   : > { %920 = vmatmul.mubr.msk.bf16.vlgmr.msra.gmra.mrb[0].mxu0 %vm269_vm1, %v255_v7 }
  0x1c   : > { %937 = vmatprep.mubr.msk.bf16.mxu0 %vm1022_vm0, %v1021_v0 }
  0xee   : > { %v310_v9 = vpop.f32.mrb[0].mxu0 }
  0xef   : > { %v311_v10 = vadd.f32 %v1086_v8, %v310_v9  ;;  %v921_v11 = vpop.f32.mrb[1].mxu0 }
  0xf0   : > { %v313_v12 = vpop.f32.mrb[2].mxu0 }
  0xf1   : > { %v314_v13 = vadd.f32 %v1086_v8, %v313_v12  ;;  %v922_v14 = vpop.f32.mrb[3].mxu0  ;;  %v318_v15 = vsel %vm317_vm2, %v311_v10, -inf }
  0xf2   : > { %319 = vmax.xlane.f32.xlu0 %v318_v15 }
  0xf3   : > { %v321_v16 = vsel %vm317_vm2, %v314_v13, -inf }
  0xf6   : > { %322 = vmax.xlane.f32.xlu0 %v321_v16 }
 0x10c   : > { %389 = vrot.lane.b32.xlu0 %v258_v3, %s1023_s27 }
 0x110   : > { %632 = vrot.lane.b32.xlu0 %v258_v3, %s1024_s28 }
 0x17f   : > { %v320_v17 = vpop.xlane.xlu0 %319 }
 0x180   : > { %v324_v18 = vsub.f32 %v311_v10, %v320_v17 }
 0x182   : > { %v326_v19 = vmul.f32 1.442695, %v324_v18 }
 0x183   : > { %v323_v20 = vpop.xlane.xlu0 %322 }
 0x184   : > { %981 = vpow2.f32 %v326_v19  ;;  %v325_v21 = vsub.f32 %v314_v13, %v323_v20 }
 0x186   : > { %v328_v22 = vmul.f32 1.442695, %v325_v21 }
 0x187   : > { %v390_v34 = vpop.permute.xlu0 %389 }
 0x188   : > { %983 = vpow2.f32 %v328_v22  ;;  %v395_v38 = vsel %vm269_vm1, %v390_v34, 0 }
 0x18b   : > { %v633_v42 = vpop.permute.xlu0 %632 }
 0x18c   : > { %v638_v44 = vsel %vm269_vm1, %v633_v42, 0 }
 0x18e   : > { %v982_v23 = vpop.eup %981 }
 0x18f   : > { %v330_v24 = vsel %vm317_vm2, %v982_v23, 0.0 }
 0x190   : > { %331 = vadd.xlane.f32.xlu1 %v330_v24 }
 0x192   : > { %v984_v25 = vpop.eup %983 }
 0x193   : > { %v333_v26 = vsel %vm317_vm2, %v984_v25, 0.0 }
 0x194   : > { %334 = vadd.xlane.f32.xlu1 %v333_v26 }
 0x1a5   : > { %386 = vrot.lane.b32.xlu1 %v255_v7, %s1023_s27 }
 0x1a9   : > { %511 = vrot.lane.b32.xlu1 %v258_v3, %s1025_s6 }
 0x1ad   : > { %509 = vrot.lane.b32.xlu1 %v255_v7, %s1025_s6 }
 0x1b1   : > { %630 = vrot.lane.b32.xlu1 %v255_v7, %s1024_s28 }
 0x21d   : > { %v332_v30 = vpop.xlane.xlu1 %331 }
 0x21e   : > { %985 = vrcp.f32 %v332_v30 }
 0x221   : > { %v335_v31 = vpop.xlane.xlu1 %334 }
 0x222   : > { %987 = vrcp.f32 %v335_v31 }
 0x225   : > { %v387_v37 = vpop.permute.xlu1 %386 }
 0x228   : > { %v986_v32 = vpop.eup %985 }
 0x229   : > { %v338_v35 = vmul.f32 %v986_v32, %v982_v23  ;;  %v512_v40 = vpop.permute.xlu1 %511 }
 0x22a   : > { %v517_v41 = vsel %vm269_vm1, %v512_v40, 0 }
 0x22c   : > { %v988_v33 = vpop.eup %987 }
 0x22d   : > { %v339_v36 = vmul.f32 %v988_v33, %v984_v25  ;;  %v510_v43 = vpop.permute.xlu1 %509 }
 0x22f   : > { %v340_v39 = vpack.c.bf16 %v339_v36, %v338_v35 }
 0x231   : > { %926 = vmatmul.mubr.msk.bf16.vlgmr.msra.gmra.mrb[0].mxu1 %vm317_vm2, %v340_v39  ;;  %v631_v45 = vpop.permute.xlu1 %630 }
 0x232   : > { %930 = vmatpush3.bf16.xpose.msra.mxu1 %v395_v38  ;;  %931 = vmatprep.mubr.msk.bf16.mxu1 %vm1022_vm0, %v1021_v0 }
 0x233   : > { %941 = vmatprep.subr.bf16.mxu1 %v1021_v0 }
 0x239   : > { %932 = vmatmul.mubr.msk.bf16.vlgmr.msra.gmra.mrb[4].mxu1 %vm269_vm1, %v387_v37 }
 0x23a   : > { %942 = vmatpush3.bf16.xpose.msra.mxu1 %v517_v41  ;;  %943 = vmatprep.mubr.msk.bf16.mxu1 %vm1022_vm0, %v1021_v0 }
 0x23b   : > { %953 = vmatprep.subr.bf16.mxu1 %v1021_v0 }
 0x241   : > { %944 = vmatmul.mubr.msk.bf16.vlgmr.msra.gmra.mrb[8].mxu1 %vm269_vm1, %v510_v43 }
 0x242   : > { %954 = vmatpush3.bf16.xpose.msra.mxu1 %v638_v44  ;;  %955 = vmatprep.mubr.msk.bf16.mxu1 %vm1022_vm0, %v1021_v0 }
 0x249   : > { %956 = vmatmul.mubr.msk.bf16.vlgmr.msra.gmra.mrb[12].mxu1 %vm269_vm1, %v631_v45 }
 0x304   : > { %v1123_v46 = vpop.f32.mrb[0].mxu1 }
 0x305   : > { %v927_v47 = vpop.f32.mrb[1].mxu1 }
 0x306   : > { %v1125_v48 = vpop.f32.mrb[2].mxu1 }
 0x307   : > { %v928_v49 = vpop.f32.mrb[3].mxu1 }
 0x30c   : > { %v431_v50 = vpop.f32.mrb[4].mxu1 }
 0x30d   : > { %v432_v51 = vadd.f32 %v1086_v8, %v431_v50  ;;  %v933_v52 = vpop.f32.mrb[5].mxu1 }
 0x30e   : > { %v434_v53 = vpop.f32.mrb[6].mxu1 }
 0x30f   : > { %v435_v54 = vadd.f32 %v1086_v8, %v434_v53  ;;  %v934_v55 = vpop.f32.mrb[7].mxu1  ;;  %v438_v56 = vsel %vm317_vm2, %v432_v51, -inf }
 0x310   : > { %439 = vmax.xlane.f32.xlu0 %v438_v56 }
 0x311   : > { %v441_v57 = vsel %vm317_vm2, %v435_v54, -inf }
 0x312   : > { %442 = vmax.xlane.f32.xlu1 %v441_v57 }
 0x314   : > { %v553_v58 = vpop.f32.mrb[8].mxu1 }
 0x315   : > { %v554_v59 = vadd.f32 %v1086_v8, %v553_v58  ;;  %v945_v60 = vpop.f32.mrb[9].mxu1 }
 0x316   : > { %v556_v61 = vpop.f32.mrb[10].mxu1 }
 0x317   : > { %v557_v62 = vadd.f32 %v1086_v8, %v556_v61  ;;  %v946_v63 = vpop.f32.mrb[11].mxu1  ;;  %v560_v1 = vsel %vm317_vm2, %v554_v59, -inf }
 0x318   : > { %561 = vmax.xlane.f32.xlu0 %v560_v1 }
 0x319   : > { %v563_v2 = vsel %vm317_vm2, %v557_v62, -inf }
 0x31c   : > { %564 = vmax.xlane.f32.xlu0 %v563_v2  ;;  %v674_v3 = vpop.f32.mrb[12].mxu1 }
 0x31d   : > { %v675_v4 = vadd.f32 %v1086_v8, %v674_v3  ;;  %v957_v5 = vpop.f32.mrb[13].mxu1 }
 0x31e   : > { %v677_v6 = vpop.f32.mrb[14].mxu1 }
 0x31f   : > { %v678_v7 = vadd.f32 %v1086_v8, %v677_v6  ;;  %v681_v9 = vsel %vm317_vm2, %v675_v4, -inf  ;;  %v958_v10 = vpop.f32.mrb[15].mxu1 }
 0x320   : > { %682 = vmax.xlane.f32.xlu0 %v681_v9 }
 0x321   : > { %v684_v11 = vsel %vm317_vm2, %v678_v7, -inf }
 0x322   : > { %685 = vmax.xlane.f32.xlu1 %v684_v11 }
 0x39d   : > { %v440_v12 = vpop.xlane.xlu0 %439 }
 0x39e   : > { %v444_v13 = vsub.f32 %v432_v51, %v440_v12 }
 0x39f   : > { %v443_v14 = vpop.xlane.xlu1 %442 }
 0x3a0   : > { %v446_v15 = vmul.f32 1.442695, %v444_v13  ;;  %v445_v16 = vsub.f32 %v435_v54, %v443_v14 }
 0x3a2   : > { %989 = vpow2.f32 %v446_v15  ;;  %v448_v17 = vmul.f32 1.442695, %v445_v16 }
 0x3a4   : > { %991 = vpow2.f32 %v448_v17 }
 0x3a5   : > { %v562_v18 = vpop.xlane.xlu0 %561 }
 0x3a6   : > { %v566_v19 = vsub.f32 %v554_v59, %v562_v18 }
 0x3a8   : > { %v568_v20 = vmul.f32 1.442695, %v566_v19 }
 0x3a9   : > { %v565_v21 = vpop.xlane.xlu0 %564 }
 0x3aa   : > { %993 = vpow2.f32 %v568_v20  ;;  %v567_v8 = vsub.f32 %v557_v62, %v565_v21 }
 0x3ac   : > { %v990_v22 = vpop.eup %989  ;;  %v570_v23 = vmul.f32 1.442695, %v567_v8 }
 0x3ad   : > { %v683_v24 = vpop.xlane.xlu0 %682  ;;  %v450_v25 = vsel %vm317_vm2, %v990_v22, 0.0 }
 0x3ae   : > { %v992_v26 = vpop.eup %991  ;;  %995 = vpow2.f32 %v570_v23  ;;  %v687_v27 = vsub.f32 %v675_v4, %v683_v24  ;;  %451 = vadd.xlane.f32.xlu0 %v450_v25 }
 0x3af   : > { %v453_v28 = vsel %vm317_vm2, %v992_v26, 0.0  ;;  %v686_v37 = vpop.xlane.xlu1 %685 }
 0x3b0   : > { %v689_v30 = vmul.f32 1.442695, %v687_v27  ;;  %454 = vadd.xlane.f32.xlu1 %v453_v28  ;;  %v688_v38 = vsub.f32 %v678_v7, %v686_v37 }
 0x3b2   : > { %997 = vpow2.f32 %v689_v30  ;;  %v691_v39 = vmul.f32 1.442695, %v688_v38 }
 0x3b4   : > { %v994_v31 = vpop.eup %993  ;;  %999 = vpow2.f32 %v691_v39 }
 0x3b5   : > { %v572_v32 = vsel %vm317_vm2, %v994_v31, 0.0 }
 0x3b6   : > { %573 = vadd.xlane.f32.xlu0 %v572_v32 }
 0x3b8   : > { %v996_v33 = vpop.eup %995 }
 0x3b9   : > { %v575_v34 = vsel %vm317_vm2, %v996_v33, 0.0 }
 0x3ba   : > { %576 = vadd.xlane.f32.xlu1 %v575_v34 }
 0x3bc   : > { %v998_v35 = vpop.eup %997 }
 0x3bd   : > { %v693_v36 = vsel %vm317_vm2, %v998_v35, 0.0 }
 0x3be   : > { %694 = vadd.xlane.f32.xlu0 %v693_v36  ;;  %v1000_v40 = vpop.eup %999 }
 0x3bf   : > { %v696_v41 = vsel %vm317_vm2, %v1000_v40, 0.0 }
 0x3cb   : > { %583 = vrot.lane.b32.xlu1 %v1100_v29, %s1025_s6 }
 0x3d4   : > { %462 = vrot.lane.b32.xlu0 %v1100_v29, %s1023_s27 }
 0x3ef   : > { %697 = vadd.xlane.f32.xlu1 %v696_v41 }
 0x400   : > { %704 = vrot.lane.b32.xlu1 %v1100_v29, %s1024_s28 }
 0x43b   : > { %v452_v43 = vpop.xlane.xlu0 %451 }
 0x43d   : > { %v455_v42 = vpop.xlane.xlu1 %454 }
 0x43e   : > { %1001 = vrcp.f32 %v455_v42 }
 0x43f   : > { %1003 = vrcp.f32 %v452_v43 }
 0x443   : > { %v574_v44 = vpop.xlane.xlu0 %573 }
 0x447   : > { %v577_v45 = vpop.xlane.xlu1 %576 }
 0x448   : > { %1005 = vrcp.f32 %v577_v45  ;;  %v1002_v47 = vpop.eup %1001 }
 0x449   : > { %1007 = vrcp.f32 %v574_v44  ;;  %v1004_v50 = vpop.eup %1003  ;;  %v459_v51 = vmul.f32 %v1002_v47, %v992_v26 }
 0x44a   : > { %v458_v52 = vmul.f32 %v1004_v50, %v990_v22 }
 0x44b   : > { %v695_v49 = vpop.xlane.xlu0 %694  ;;  %v584_v29 = vpop.permute.xlu1 %583 }
 0x44c   : > { %v460_v54 = vpack.c.bf16 %v459_v51, %v458_v52  ;;  %1009 = vrcp.f32 %v695_v49 }
 0x44f   : > { %v463_v53 = vpop.permute.xlu0 %462 }
 0x450   : > { %936 = vmatpush3.bf16.msra.mxu0 %v463_v53 }
 0x451   : > { %947 = vmatprep.subr.bf16.mxu0 %v1021_v0 }
 0x452   : > { %v1006_v55 = vpop.eup %1005 }
 0x453   : > { %938 = vmatmul.mubr.msk.bf16.vlgmr.msra.gmra.mrb[4].mxu0 %vm317_vm2, %v460_v54  ;;  %v1008_v56 = vpop.eup %1007  ;;  %v581_v57 = vmul.f32 %v1006_v55, %v996_v33 }
 0x454   : > { %948 = vmatpush3.bf16.msra.mxu0 %v584_v29  ;;  %949 = vmatprep.mubr.msk.bf16.mxu0 %vm1022_vm0, %v1021_v0  ;;  %v580_v58 = vmul.f32 %v1008_v56, %v994_v31 }
 0x455   : > { %959 = vmatprep.subr.bf16.mxu0 %v1021_v0 }
 0x456   : > { %v582_v59 = vpack.c.bf16 %v581_v57, %v580_v58  ;;  %v1010_v62 = vpop.eup %1009 }
 0x457   : > { %v701_v1 = vmul.f32 %v1010_v62, %v998_v35 }
 0x45b   : > { %950 = vmatmul.mubr.msk.bf16.vlgmr.msra.gmra.mrb[8].mxu0 %vm317_vm2, %v582_v59 }
 0x45c   : > { %961 = vmatprep.mubr.msk.bf16.mxu0 %vm1022_vm0, %v1021_v0 }
 0x47c   : > { %v698_v60 = vpop.xlane.xlu1 %697 }
 0x47d   : > { %1011 = vrcp.f32 %v698_v60 }
 0x480   : > { %v705_v61 = vpop.permute.xlu1 %704 }
 0x481   : > { %960 = vmatpush3.bf16.msra.mxu0 %v705_v61 }
 0x487   : > { %v1012_v63 = vpop.eup %1011 }
 0x488   : > { %v702_v2 = vmul.f32 %v1012_v63, %v1000_v40 }
 0x48a   : > { %v703_v3 = vpack.c.bf16 %v702_v2, %v701_v1 }
 0x48c   : > { %962 = vmatmul.mubr.msk.bf16.vlgmr.msra.gmra.mrb[12].mxu0 %vm317_vm2, %v703_v3 }
 0x526   : > { %v502_v4 = vpop.f32.mrb[4].mxu0 }
 0x527   : > { %753 = vrot.lane.b32.xlu1 %v502_v4, %s1026_s7  ;;  %v939_v5 = vpop.f32.mrb[5].mxu0 }
 0x528   : > { %v505_v6 = vpop.f32.mrb[6].mxu0 }
 0x529   : > { %755 = vrot.lane.b32.xlu0 %v505_v6, %s1026_s7  ;;  %v940_v7 = vpop.f32.mrb[7].mxu0 }
 0x52e   : > { %v623_v0 = vpop.f32.mrb[8].mxu0 }
 0x52f   : > { %761 = vrot.lane.b32.xlu1 %v623_v0, %s1027_s8  ;;  %v951_v9 = vpop.f32.mrb[9].mxu0 }
 0x530   : > { %v626_v10 = vpop.f32.mrb[10].mxu0 }
 0x531   : > { %763 = vrot.lane.b32.xlu0 %v626_v10, %s1027_s8  ;;  %v952_v11 = vpop.f32.mrb[11].mxu0 }
 0x55f   : > { %v744_v12 = vpop.f32.mrb[12].mxu0 }
 0x560   : > { %769 = vrot.lane.b32.xlu1 %v744_v12, %s1028_s9  ;;  %v963_v13 = vpop.f32.mrb[13].mxu0 }
 0x561   : > { %v747_v14 = vpop.f32.mrb[14].mxu0 }
 0x562   : > { %771 = vrot.lane.b32.xlu0 %v747_v14, %s1028_s9  ;;  %v964_v15 = vpop.f32.mrb[15].mxu0 }
 0x599   : > { %v754_v16 = vpop.permute.xlu1 %753 }
 0x59a   : > { %v775_v20 = vsel %vm269_vm1, %v1123_v46, %v754_v16 }
 0x59b   : > { %v756_v17 = vpop.permute.xlu0 %755 }
 0x59c   : > { %v776_v22 = vsel %vm269_vm1, %v1125_v48, %v756_v17 }
 0x5a1   : > { %v762_v18 = vpop.permute.xlu1 %761 }
 0x5a2   : > { %v777_v21 = vsel %vm317_vm2, %v775_v20, %v762_v18 }
 0x5a3   : > { %v764_v19 = vpop.permute.xlu0 %763 }
 0x5a4   : > { %v778_v24 = vsel %vm317_vm2, %v776_v22, %v764_v19 }
 0x5d2   : > { %v770_v8 = vpop.permute.xlu1 %769 }
 0x5d3   : > { %v780_v23 = vsel %vm779_vm3, %v777_v21, %v770_v8 }
 0x5d4   : > { %783 = vst.msk [vmem:[%s251_s12] sm:$0xff] %vm782_vm4, %v780_v23  ;;  %v772_v25 = vpop.permute.xlu0 %771 }
 0x5d5   : > { %v781_v26 = vsel %vm779_vm3, %v778_v24, %v772_v25 }
 0x5d6   : > { %784 = vst.msk [vmem:[%s251_s12 + $0x8] sm:$0xff] %vm782_vm4, %v781_v26 }
 0x5d7 PF: > { %s14_s15 = sadd.s32 1, %s1019_s15  }
 0x5d8   : > { %p11_p4 = scmp.ge.s32.totalorder %s14_s15, 4  }
 0x5da   :  { %13 = sbr.rel (!%p11_p4) target bundleno = 1 (0x1), region = 75 }

// kernel: transformer_forward.26
= control target key start
LH: loop header
LB: loop body
LE: loop exit
PB: predicated region body
PF: predicated region fallthrough
CT: control target
= control target key end

     0   :  { %vm56_vm0 = vcmask 261120   ;;  %vm150_vm1 = vcmask 523264   ;;  %s470_s1 = inlined_call_operand.vmem [shape: bf16[32,64], index: 1, kind: input, shape index: {}]   ;;  %s471_s0 = inlined_call_operand.vmem [shape: f32[32,32], index: 0, kind: input, shape index: {}]   ;;  %s472_s3 = inlined_call_operand.vmem [shape: bf16[64,32], index: 3, kind: input, shape index: {}]   ;;  %s473_s2 = inlined_call_operand.vmem [shape: f32[1,64], index: 2, kind: input, shape index: {}]   ;;  %s474_s4 = inlined_call_operand.vmem [shape: f32[1,32], index: 4, kind: input, shape index: {}]   ;;  %s475_s5 = inlined_call_operand.vmem [shape: f32[1,32], index: 5, kind: input, shape index: {}]   ;;  %s476_s6 = inlined_call_operand.vmem [shape: f32[1,32], index: 6, kind: input, shape index: {}]   ;;  %s477_s7 = inlined_call_operand.vmem [shape: f32[32,32], index: 7, kind: output, shape index: {}]  }
   0x1   :  { %v348_v0 = vld [vmem:[%s470_s1] sm:$0xff]   ;;  %v349_v1 = vld [vmem:[%s470_s1 + $0x8] sm:$0xff]   ;;  %v29_v4 = vld [vmem:[%s471_s0 + $0x10] sm:$0xff] }
   0x2   :  { %328 = vmatprep.subr.bf16.mxu0 %v348_v0  ;;  %v27_v2 = vld [vmem:[%s471_s0] sm:$0xff]  ;;  %v28_v3 = vld [vmem:[%s471_s0 + $0x8] sm:$0xff]  ;;  %v30_v6 = vld [vmem:[%s471_s0 + $0x18] sm:$0xff] }
   0x3   :  { %329 = vmatpush3.bf16.msra.mxu0 %v348_v0  ;;  %v31_v5 = vpack.c.bf16 %v28_v3, %v27_v2  ;;  %v350_v7 = vld [vmem:[%s472_s3] sm:$0xff]   ;;  %v351_v8 = vld [vmem:[%s472_s3 + $0x8] sm:$0xff]   ;;  %v32_v9 = vpack.c.bf16 %v30_v6, %v29_v4  ;;  %v352_v10 = vld [vmem:[%s472_s3 + $0x10] sm:$0xff]  }
   0x4   :  { %330 = vmatprep.subr.bf16.mxu0 %v349_v1  ;;  %336 = vmatprep.subr.bf16.mxu1 %v350_v7  ;;  %v353_v11 = vld [vmem:[%s472_s3 + $0x18] sm:$0xff]   ;;  %v304_v12 = vld [vmem:[%s473_s2] ss:$0 sm:$0xff] }
   0x5   :  { %332 = vmatprep.mubr.msk.bf16.mxu0 %vm56_vm0, %v31_v5  ;;  %337 = vmatpush3.bf16.msra.mxu1 %v350_v7  ;;  %v315_v28 = vld [vmem:[%s474_s4] ss:$0 sm:$0xff] }
   0x6   :  { %338 = vmatprep.subr.bf16.mxu1 %v351_v8 }
   0x7   :  { %331 = vmatpush3.bf16.msra.mxu0 %v349_v1 }
   0x9   :  { %339 = vmatpush3.bf16.msra.mxu1 %v351_v8 }
   0xa   :  { %333 = vmatmul.mubr.msk.bf16.vlgmr.msra.gmra.mrb[0].mxu0 %vm56_vm0, %v32_v9  ;;  %340 = vmatprep.subr.bf16.mxu1 %v352_v10 }
   0xd   :  { %341 = vmatpush3.bf16.msra.mxu1 %v352_v10 }
   0xe   :  { %342 = vmatprep.subr.bf16.mxu1 %v353_v11 }
  0x11   :  { %343 = vmatpush3.bf16.msra.mxu1 %v353_v11 }
  0xdd   :  { %v334_v13 = vpop.f32.mrb[0].mxu0 }
  0xde   :  { %v106_v14 = vadd.f32 %v334_v13, %v304_v12  ;;  %v97_v15 = vpop.f32.mrb[1].mxu0  ;;  %v316_v13 = vld [vmem:[%s475_s5] ss:$0 sm:$0xff] }
  0xdf   :  { %v98_v16 = vadd.f32 %v304_v12, %v97_v15  ;;  %v335_v17 = vpop.f32.mrb[2].mxu0  ;;  %v317_v15 = vld [vmem:[%s476_s6] ss:$0 sm:$0xff] }
  0xe0   :  { %v109_v18 = vadd.f32 %v335_v17, %v304_v12  ;;  %v100_v19 = vpop.f32.mrb[3].mxu0  ;;  %v114_v21 = vmax.f32 %v106_v14, 0.0 }
  0xe1   :  { %v101_v20 = vadd.f32 %v304_v12, %v100_v19  ;;  %v112_v23 = vmax.f32 %v98_v16, 0.0 }
  0xe2   :  { %v115_v22 = vmax.f32 %v109_v18, 0.0 }
  0xe3   :  { %v113_v24 = vmax.f32 %v101_v20, 0.0 }
  0xe4   :  { %v117_v25 = vpack.c.bf16 %v115_v22, %v114_v21 }
  0xe5   :  { %v116_v26 = vpack.c.bf16 %v113_v24, %v112_v23 }
  0xe7   :  { %344 = vmatprep.mubr.msk.bf16.mxu1 %vm150_vm1, %v116_v26 }
  0xe8   :  { %345 = vmatmul.mubr.msk.bf16.vlgmr.msra.gmra.mrb[0].mxu1 %vm150_vm1, %v117_v25 }
 0x1bb   :  { %v346_v27 = vpop.f32.mrb[0].mxu1 }
 0x1bc   :  { %v208_v29 = vadd.f32 %v346_v27, %v29_v4  ;;  %v191_v30 = vpop.f32.mrb[1].mxu1 }
 0x1bd   :  { %v206_v31 = vadd.f32 %v191_v30, %v27_v2  ;;  %v347_v32 = vpop.f32.mrb[2].mxu1 }
 0x1be   :  { %v209_v33 = vadd.f32 %v347_v32, %v30_v6  ;;  %v194_v34 = vpop.f32.mrb[3].mxu1  ;;  %v219_v35 = vadd.f32 %v315_v28, %v208_v29 }
 0x1bf   :  { %v207_v36 = vadd.f32 %v194_v34, %v28_v3  ;;  %v217_v37 = vadd.f32 %v315_v28, %v206_v31 }
 0x1c0   :  { %v229_v38 = vsel %vm56_vm0, %v219_v35, 0.0  ;;  %v220_v39 = vadd.f32 %v315_v28, %v209_v33 }
 0x1c1   :  { %230 = vadd.xlane.f32.xlu1 %v229_v38  ;;  %v223_v40 = vsel %vm56_vm0, %v217_v37, 0.0  ;;  %v218_v41 = vadd.f32 %v315_v28, %v207_v36 }
 0x1c2   :  { %224 = vadd.xlane.f32.xlu0 %v223_v40  ;;  %v232_v42 = vsel %vm56_vm0, %v220_v39, 0.0 }
 0x1c3   :  { %v226_v43 = vsel %vm56_vm0, %v218_v41, 0.0 }
 0x1c5   :  { %233 = vadd.xlane.f32.xlu1 %v232_v42 }
 0x1c6   :  { %227 = vadd.xlane.f32.xlu0 %v226_v43 }
 0x24e   :  { %v231_v44 = vpop.xlane.xlu1 %230 }
 0x24f   :  { %v238_v45 = vmul.f32 0.03125, %v231_v44  ;;  %v225_v46 = vpop.xlane.xlu0 %224 }
 0x250   :  { %v236_v47 = vmul.f32 0.03125, %v225_v46 }
 0x251   :  { %v242_v48 = vsub.f32 %v219_v35, %v238_v45 }
 0x252   :  { %v240_v49 = vsub.f32 %v217_v37, %v236_v47  ;;  %v234_v50 = vpop.xlane.xlu1 %233 }
 0x253   :  { %v239_v51 = vmul.f32 0.03125, %v234_v50  ;;  %v228_v52 = vpop.xlane.xlu0 %227  ;;  %v246_v58 = vmul.f32 %v242_v48, %v242_v48 }
 0x254   :  { %v237_v53 = vmul.f32 0.03125, %v228_v52  ;;  %v244_v54 = vmul.f32 %v240_v49, %v240_v49 }
 0x255   :  { %v243_v55 = vsub.f32 %v220_v39, %v239_v51  ;;  %v254_v60 = vsel %vm56_vm0, %v246_v58, 0.0 }
 0x256   :  { %v241_v56 = vsub.f32 %v218_v41, %v237_v53  ;;  %v248_v57 = vsel %vm56_vm0, %v244_v54, 0.0 }
 0x257   :  { %249 = vadd.xlane.f32.xlu0 %v248_v57  ;;  %v247_v62 = vmul.f32 %v243_v55, %v243_v55 }
 0x258   :  { %v245_v59 = vmul.f32 %v241_v56, %v241_v56 }
 0x259   :  { %v257_v63 = vsel %vm56_vm0, %v247_v62, 0.0 }
 0x25a   :  { %v251_v61 = vsel %vm56_vm0, %v245_v59, 0.0 }
 0x25b   :  { %255 = vadd.xlane.f32.xlu0 %v254_v60  ;;  %252 = vadd.xlane.f32.xlu1 %v251_v61 }
 0x25f   :  { %258 = vadd.xlane.f32.xlu1 %v257_v63 }
 0x2e4   :  { %v250_v0 = vpop.xlane.xlu0 %249 }
 0x2e5   :  { %v260_v1 = vmul.f32 0.03125, %v250_v0 }
 0x2e7   :  { %v264_v2 = vadd.f32 1e-05, %v260_v1 }
 0x2e8   :  { %v253_v3 = vpop.xlane.xlu1 %252  ;;  %v256_v4 = vpop.xlane.xlu0 %255 }
 0x2e9   :  { %354 = vrsqrt.f32 %v264_v2  ;;  %v261_v5 = vmul.f32 0.03125, %v253_v3  ;;  %v262_v6 = vmul.f32 0.03125, %v256_v4 }
 0x2eb   :  { %v265_v7 = vadd.f32 1e-05, %v261_v5  ;;  %v266_v8 = vadd.f32 1e-05, %v262_v6 }
 0x2ec   :  { %v259_v9 = vpop.xlane.xlu1 %258 }
 0x2ed   :  { %356 = vrsqrt.f32 %v265_v7  ;;  %v263_v10 = vmul.f32 0.03125, %v259_v9 }
 0x2ee   :  { %358 = vrsqrt.f32 %v266_v8 }
 0x2ef   :  { %v267_v11 = vadd.f32 1e-05, %v263_v10 }
 0x2f1   :  { %360 = vrsqrt.f32 %v267_v11 }
 0x2f3   :  { %v355_v12 = vpop.eup %354 }
 0x2f4   :  { %v272_v14 = vmul.f32 %v355_v12, %v240_v49 }
 0x2f6   :  { %v282_v16 = vmul.f32 %v316_v13, %v272_v14 }
 0x2f7   :  { %v357_v17 = vpop.eup %356 }
 0x2f8   :  { %v359_v18 = vpop.eup %358  ;;  %v292_v19 = vadd.f32 %v317_v15, %v282_v16  ;;  %v273_v20 = vmul.f32 %v357_v17, %v241_v56 }
 0x2f9   :  { %v274_v21 = vmul.f32 %v359_v18, %v242_v48 }
 0x2fa   :  { %296 = vst.msk [vmem:[%s477_s7] sm:$0xff] %vm56_vm0, %v292_v19  ;;  %v283_v22 = vmul.f32 %v316_v13, %v273_v20 }
 0x2fb   :  { %v361_v23 = vpop.eup %360  ;;  %v284_v24 = vmul.f32 %v316_v13, %v274_v21 }
 0x2fc   :  { %v293_v25 = vadd.f32 %v317_v15, %v283_v22  ;;  %v275_v26 = vmul.f32 %v361_v23, %v243_v55 }
 0x2fd   :  { %v294_v27 = vadd.f32 %v317_v15, %v284_v24 }
 0x2fe   :  { %297 = vst.msk [vmem:[%s477_s7 + $0x8] sm:$0xff] %vm56_vm0, %v293_v25  ;;  %v285_v28 = vmul.f32 %v316_v13, %v275_v26 }
 0x2ff   :  { %298 = vst.msk [vmem:[%s477_s7 + $0x10] sm:$0xff] %vm56_vm0, %v294_v27 }
 0x300   :  { %v295_v29 = vadd.f32 %v317_v15, %v285_v28 }
 0x302   :  { %299 = vst.msk [vmem:[%s477_s7 + $0x18] sm:$0xff] %vm56_vm0, %v295_v29 }

// kernel: transformer_forward.34
= control target key start
LH: loop header
LB: loop body
LE: loop exit
PB: predicated region body
PF: predicated region fallthrough
CT: control target
= control target key end

     0   :  { %vm63_vm0 = vcmask 261120   ;;  %s371_s2 = inlined_call_operand.vmem [shape: bf16[32,32], index: 2, kind: input, shape index: {}]   ;;  %s372_s4 = inlined_call_operand.vmem [shape: bf16[32,32], index: 4, kind: input, shape index: {}]   ;;  %s373_s0 = inlined_call_operand.vmem [shape: f32[32,32], index: 0, kind: input, shape index: {}]   ;;  %s374_s1 = inlined_call_operand.vmem [shape: f32[32,32], index: 1, kind: input, shape index: {}]   ;;  %s375_s3 = inlined_call_operand.vmem [shape: f32[1,32], index: 3, kind: input, shape index: {}]   ;;  %s376_s5 = inlined_call_operand.vmem [shape: f32[1,32], index: 5, kind: input, shape index: {}]   ;;  %s377_s6 = inlined_call_operand.vmem [shape: f32[32,32], index: 6, kind: output, shape index: {0}]   ;;  %s378_s7 = inlined_call_operand.vmem [shape: f32[32,32], index: 7, kind: output, shape index: {1}]  }
   0x1   :  { %v249_v0 = vld [vmem:[%s371_s2] sm:$0xff]   ;;  %v251_v2 = vld [vmem:[%s371_s2 + $0x8] sm:$0xff]   ;;  %v28_v10 = vld [vmem:[%s373_s0 + $0x10] sm:$0xff] }
   0x2   :  { %v250_v1 = vld [vmem:[%s372_s4] sm:$0xff]   ;;  %233 = vmatprep.subr.bf16.mxu0 %v249_v0  ;;  %v252_v3 = vld [vmem:[%s372_s4 + $0x8] sm:$0xff]   ;;  %v29_v11 = vld [vmem:[%s373_s0 + $0x18] sm:$0xff] }
   0x3   :  { %241 = vmatprep.subr.bf16.mxu1 %v250_v1  ;;  %234 = vmatpush3.bf16.msra.mxu0 %v249_v0  ;;  %v26_v4 = vld [vmem:[%s373_s0] sm:$0xff]  ;;  %v27_v5 = vld [vmem:[%s373_s0 + $0x8] sm:$0xff]  ;;  %v32_v13 = vld [vmem:[%s374_s1 + $0x10] sm:$0xff]  ;;  %v124_v17 = vpack.c.bf16 %v29_v11, %v28_v10 }
   0x4   :  { %242 = vmatpush3.bf16.msra.mxu1 %v250_v1  ;;  %235 = vmatprep.subr.bf16.mxu0 %v251_v2  ;;  %v30_v6 = vld [vmem:[%s374_s1] sm:$0xff]  ;;  %v31_v7 = vld [vmem:[%s374_s1 + $0x8] sm:$0xff]  ;;  %v123_v9 = vpack.c.bf16 %v27_v5, %v26_v4  ;;  %v33_v14 = vld [vmem:[%s374_s1 + $0x18] sm:$0xff]  ;;  %v36_v15 = vadd.f32 %v32_v13, %v28_v10 }
   0x5   :  { %243 = vmatprep.subr.bf16.mxu1 %v252_v3  ;;  %v34_v8 = vadd.f32 %v30_v6, %v26_v4  ;;  %v35_v12 = vadd.f32 %v31_v7, %v27_v5  ;;  %v37_v16 = vadd.f32 %v33_v14, %v29_v11  ;;  %v215_v20 = vld [vmem:[%s375_s3] ss:$0 sm:$0xff] }
   0x6   :  { %245 = vmatprep.mubr.msk.bf16.mxu1 %vm63_vm0, %v123_v9  ;;  %v220_v21 = vld [vmem:[%s376_s5] ss:$0 sm:$0xff] }
   0x7   :  { %236 = vmatpush3.bf16.msra.mxu0 %v251_v2  ;;  %v38_v18 = vpack.c.bf16 %v35_v12, %v34_v8  ;;  %v39_v19 = vpack.c.bf16 %v37_v16, %v36_v15 }
   0x8   :  { %244 = vmatpush3.bf16.msra.mxu1 %v252_v3 }
   0x9   :  { %237 = vmatprep.mubr.msk.bf16.mxu0 %vm63_vm0, %v38_v18 }
   0xa   :  { %238 = vmatmul.mubr.msk.bf16.vlgmr.msra.gmra.mrb[0].mxu0 %vm63_vm0, %v39_v19 }
   0xb   :  { %246 = vmatmul.mubr.msk.bf16.vlgmr.msra.gmra.mrb[0].mxu1 %vm63_vm0, %v124_v17 }
  0xdd   :  { %v239_v22 = vpop.f32.mrb[0].mxu0 }
  0xde   :  { %v247_v23 = vpop.f32.mrb[0].mxu1  ;;  %v113_v24 = vadd.f32 %v239_v22, %v215_v20  ;;  %v104_v26 = vpop.f32.mrb[1].mxu0 }
  0xdf   :  { %v197_v25 = vadd.f32 %v247_v23, %v220_v21  ;;  %v188_v27 = vpop.f32.mrb[1].mxu1  ;;  %v105_v28 = vadd.f32 %v215_v20, %v104_v26  ;;  %v240_v30 = vpop.f32.mrb[2].mxu0 }
  0xe0   :  { %v189_v29 = vadd.f32 %v220_v21, %v188_v27  ;;  %v248_v31 = vpop.f32.mrb[2].mxu1  ;;  %121 = vst.msk [vmem:[%s377_s6 + $0x10] sm:$0xff] %vm63_vm0, %v113_v24  ;;  %v116_v32 = vadd.f32 %v240_v30, %v215_v20  ;;  %v107_v34 = vpop.f32.mrb[3].mxu0 }
  0xe1   :  { %205 = vst.msk [vmem:[%s378_s7 + $0x10] sm:$0xff] %vm63_vm0, %v197_v25  ;;  %v200_v33 = vadd.f32 %v248_v31, %v220_v21  ;;  %v191_v35 = vpop.f32.mrb[3].mxu1  ;;  %119 = vst.msk [vmem:[%s377_s6] sm:$0xff] %vm63_vm0, %v105_v28  ;;  %v108_v36 = vadd.f32 %v215_v20, %v107_v34 }
  0xe2   :  { %203 = vst.msk [vmem:[%s378_s7] sm:$0xff] %vm63_vm0, %v189_v29  ;;  %v192_v37 = vadd.f32 %v220_v21, %v191_v35  ;;  %122 = vst.msk [vmem:[%s377_s6 + $0x18] sm:$0xff] %vm63_vm0, %v116_v32 }
  0xe3   :  { %206 = vst.msk [vmem:[%s378_s7 + $0x18] sm:$0xff] %vm63_vm0, %v200_v33  ;;  %120 = vst.msk [vmem:[%s377_s6 + $0x8] sm:$0xff] %vm63_vm0, %v108_v36 }
  0xe4   :  { %204 = vst.msk [vmem:[%s378_s7 + $0x8] sm:$0xff] %vm63_vm0, %v192_v37 }

// kernel: transformer_forward.31
= control target key start
LH: loop header
LB: loop body
LE: loop exit
PB: predicated region body
PF: predicated region fallthrough
CT: control target
= control target key end

     0   :  { %v233_v0 = vmov 0.0   ;;  %vm234_vm0 = vmmov 0   ;;  %vm57_vm1 = vcmask 261120   ;;  %s235_s23 = smov 96   ;;  %s337_s2 = inlined_call_operand.vmem [shape: bf16[32,64], index: 2, kind: input, shape index: {}]   ;;  %s338_s0 = inlined_call_operand.vmem [shape: f32[16,32], index: 0, kind: input, shape index: {}]   ;;  %s339_s1 = inlined_call_operand.vmem [shape: f32[16,32], index: 1, kind: input, shape index: {}]   ;;  %s340_s4 = inlined_call_operand.vmem [shape: bf16[32,32], index: 4, kind: input, shape index: {}]   ;;  %s341_s3 = inlined_call_operand.vmem [shape: f32[1,64], index: 3, kind: input, shape index: {}]   ;;  %s342_s5 = inlined_call_operand.vmem [shape: f32[1,32], index: 5, kind: input, shape index: {}]   ;;  %s343_s6 = inlined_call_operand.vmem [shape: f32[16,32], index: 6, kind: output, shape index: {0}]   ;;  %s344_s8 = inlined_call_operand.vmem [shape: f32[16,32], index: 8, kind: output, shape index: {2}]   ;;  %s345_s7 = inlined_call_operand.vmem [shape: f32[16,32], index: 7, kind: output, shape index: {1}]  }
   0x1   :  { %210 = vmatprep.subr.bf16.mxu0 %v233_v0  ;;  %v229_v1 = vld [vmem:[%s337_s2] sm:$0xff]   ;;  %214 = vmatprep.mubr.msk.bf16.mxu0 %vm234_vm0, %v233_v0  ;;  %v230_v2 = vld [vmem:[%s337_s2 + $0x8] sm:$0xff]  }
   0x2   :  { %218 = vmatprep.subr.bf16.mxu1 %v233_v0  ;;  %222 = vmatprep.mubr.msk.bf16.mxu1 %vm234_vm0, %v233_v0  ;;  %v27_v3 = vld [vmem:[%s338_s0] sm:$0xff]  ;;  %v28_v4 = vld [vmem:[%s338_s0 + $0x8] sm:$0xff] }
   0x3   :  { %211 = vmatpush3.bf16.msra.mxu0 %v229_v1  ;;  %v29_v5 = vld [vmem:[%s339_s1] sm:$0xff]  ;;  %v30_v6 = vld [vmem:[%s339_s1 + $0x8] sm:$0xff]  ;;  %v114_v12 = vpack.c.bf16 %v28_v4, %v27_v3 }
   0x4   :  { %212 = vmatprep.subr.bf16.mxu0 %v233_v0  ;;  %v31_v7 = vadd.f32 %v29_v5, %v27_v3  ;;  %v32_v8 = vadd.f32 %v30_v6, %v28_v4  ;;  %v231_v9 = vld [vmem:[%s340_s4] sm:$0xff]   ;;  %v232_v11 = vld [vmem:[%s340_s4 + $0x8] sm:$0xff]  }
   0x5   :  { %219 = vmatpush3.bf16.msra.mxu1 %v231_v9  ;;  %v196_v13 = vld [vmem:[%s341_s3] ss:$0 sm:$0xff] }
   0x6   :  { %v33_v10 = vpack.c.bf16 %v32_v8, %v31_v7  ;;  %220 = vmatprep.subr.bf16.mxu1 %v233_v0  ;;  %v200_v18 = vld [vmem:[%s342_s5] ss:$0 sm:$0xff] }
   0x7   :  { %213 = vmatpush3.bf16.msra.mxu0 %v230_v2 }
   0x9   :  { %221 = vmatpush3.bf16.msra.mxu1 %v232_v11 }
   0xa   :  { %215 = vmatmul.mubr.msk.bf16.vlgmr.msra.gmra.mrb[0].mxu0 %vm57_vm1, %v33_v10 }
   0xc   :  { %223 = vmatmul.mubr.msk.bf16.vlgmr.msra.gmra.mrb[0].mxu1 %vm57_vm1, %v114_v12 }
  0xdd   :  { %v95_v14 = vpop.f32.mrb[0].mxu0 }
  0xde   :  { %v96_v15 = vadd.f32 %v196_v13, %v95_v14  ;;  %v216_v16 = vpop.f32.mrb[1].mxu0 }
  0xdf   :  { %v98_v17 = vpop.f32.mrb[2].mxu0  ;;  %v175_v21 = vpop.f32.mrb[0].mxu1 }
  0xe0   :  { %102 = vst.msk [vmem:[%s343_s6] sm:$0xff] %vm57_vm1, %v96_v15  ;;  %v99_v19 = vadd.f32 %v196_v13, %v98_v17  ;;  %106 = vrot.lane.b32.xlu0 %v96_v15, %s235_s23  ;;  %v217_v20 = vpop.f32.mrb[3].mxu0  ;;  %v176_v22 = vadd.f32 %v200_v18, %v175_v21  ;;  %v224_v23 = vpop.f32.mrb[1].mxu1 }
  0xe1   :  { %v178_v24 = vpop.f32.mrb[2].mxu1 }
  0xe2   :  { %103 = vst.msk [vmem:[%s343_s6 + $0x8] sm:$0xff] %vm57_vm1, %v99_v19  ;;  %182 = vst.msk [vmem:[%s344_s8] sm:$0xff] %vm57_vm1, %v176_v22  ;;  %v179_v25 = vadd.f32 %v200_v18, %v178_v24  ;;  %v225_v26 = vpop.f32.mrb[3].mxu1 }
  0xe4   :  { %108 = vrot.lane.b32.xlu0 %v99_v19, %s235_s23  ;;  %183 = vst.msk [vmem:[%s344_s8 + $0x8] sm:$0xff] %vm57_vm1, %v179_v25 }
 0x152   :  { %v107_v27 = vpop.permute.xlu0 %106 }
 0x153   :  { %112 = vst.msk [vmem:[%s345_s7] sm:$0xff] %vm57_vm1, %v107_v27 }
 0x156   :  { %v109_v28 = vpop.permute.xlu0 %108 }
 0x157   :  { %113 = vst.msk [vmem:[%s345_s7 + $0x8] sm:$0xff] %vm57_vm1, %v109_v28 }

// kernel: transformer_forward.33
= control target key start
LH: loop header
LB: loop body
LE: loop exit
PB: predicated region body
PF: predicated region fallthrough
CT: control target
= control target key end

     0   :  { %v283_v0 = vmov 0.0   ;;  %vm284_vm0 = vmmov 0   ;;  %vm56_vm1 = vcmask 261120   ;;  %s404_s1 = inlined_call_operand.vmem [shape: bf16[32,32], index: 1, kind: input, shape index: {}]   ;;  %s405_s0 = inlined_call_operand.vmem [shape: f32[16,32], index: 0, kind: input, shape index: {}]   ;;  %s406_s3 = inlined_call_operand.vmem [shape: f32[16,32], index: 3, kind: input, shape index: {}]   ;;  %s407_s2 = inlined_call_operand.vmem [shape: f32[1,32], index: 2, kind: input, shape index: {}]   ;;  %s408_s7 = inlined_call_operand.vmem [shape: bf16[32,32], index: 7, kind: input, shape index: {}]   ;;  %s409_s4 = inlined_call_operand.vmem [shape: f32[1,32], index: 4, kind: input, shape index: {}]   ;;  %s410_s5 = inlined_call_operand.vmem [shape: f32[1,32], index: 5, kind: input, shape index: {}]   ;;  %s411_s9 = inlined_call_operand.vmem [shape: f32[16,32], index: 9, kind: output, shape index: {0}]   ;;  %s412_s6 = inlined_call_operand.vmem [shape: f32[16,32], index: 6, kind: input, shape index: {}]   ;;  %s413_s8 = inlined_call_operand.vmem [shape: f32[1,32], index: 8, kind: input, shape index: {}]   ;;  %s414_s10 = inlined_call_operand.vmem [shape: f32[16,32], index: 10, kind: output, shape index: {1}]  }
   0x1   :  { %257 = vmatprep.subr.bf16.mxu0 %v283_v0  ;;  %v275_v1 = vld [vmem:[%s404_s1] sm:$0xff]   ;;  %261 = vmatprep.mubr.msk.bf16.mxu0 %vm284_vm0, %v283_v0  ;;  %v276_v2 = vld [vmem:[%s404_s1 + $0x8] sm:$0xff]  }
   0x2   :  { %265 = vmatprep.subr.bf16.mxu1 %v283_v0  ;;  %269 = vmatprep.mubr.msk.bf16.mxu1 %vm284_vm0, %v283_v0  ;;  %v35_v3 = vld [vmem:[%s405_s0] sm:$0xff]  ;;  %v36_v4 = vld [vmem:[%s405_s0 + $0x8] sm:$0xff] }
   0x3   :  { %258 = vmatpush3.bf16.msra.mxu0 %v275_v1  ;;  %v37_v5 = vpack.c.bf16 %v36_v4, %v35_v3  ;;  %v38_v6 = vld [vmem:[%s406_s3] sm:$0xff]  ;;  %v39_v8 = vld [vmem:[%s406_s3 + $0x8] sm:$0xff] }
   0x4   :  { %259 = vmatprep.subr.bf16.mxu0 %v283_v0  ;;  %v244_v9 = vld [vmem:[%s407_s2] ss:$0 sm:$0xff]  ;;  %v278_v30 = vld [vmem:[%s408_s7 + $0x8] sm:$0xff]  }
   0x5   :  { %v277_v29 = vld [vmem:[%s408_s7] sm:$0xff]   ;;  %v160_v47 = vld [vmem:[%s412_s6 + $0x8] sm:$0xff] }
   0x6   :  { %266 = vmatpush3.bf16.msra.mxu1 %v277_v29  ;;  %v245_v38 = vld [vmem:[%s409_s4] ss:$0 sm:$0xff] }
   0x7   :  { %260 = vmatpush3.bf16.msra.mxu0 %v276_v2  ;;  %267 = vmatprep.subr.bf16.mxu1 %v283_v0  ;;  %v246_v40 = vld [vmem:[%s410_s5] ss:$0 sm:$0xff] }
   0x8   :  { %v159_v46 = vld [vmem:[%s412_s6] sm:$0xff] }
   0x9   :  { %v247_v52 = vld [vmem:[%s413_s8] ss:$0 sm:$0xff] }
   0xa   :  { %262 = vmatmul.mubr.msk.bf16.vlgmr.msra.gmra.mrb[0].mxu0 %vm56_vm1, %v37_v5  ;;  %268 = vmatpush3.bf16.msra.mxu1 %v278_v30 }
  0xdd   :  { %v94_v7 = vpop.f32.mrb[0].mxu0 }
  0xde   :  { %v101_v10 = vadd.f32 %v94_v7, %v38_v6  ;;  %v263_v11 = vpop.f32.mrb[1].mxu0 }
  0xdf   :  { %v97_v12 = vpop.f32.mrb[2].mxu0 }
  0xe0   :  { %v102_v13 = vadd.f32 %v97_v12, %v39_v8  ;;  %v264_v14 = vpop.f32.mrb[3].mxu0  ;;  %v110_v15 = vadd.f32 %v244_v9, %v101_v10 }
  0xe2   :  { %v114_v16 = vsel %vm56_vm1, %v110_v15, 0.0  ;;  %v111_v17 = vadd.f32 %v244_v9, %v102_v13 }
  0xe3   :  { %115 = vadd.xlane.f32.xlu0 %v114_v16 }
  0xe4   :  { %v117_v18 = vsel %vm56_vm1, %v111_v17, 0.0 }
  0xe7   :  { %118 = vadd.xlane.f32.xlu0 %v117_v18 }
 0x170   :  { %v116_v19 = vpop.xlane.xlu0 %115 }
 0x171   :  { %v121_v20 = vmul.f32 0.03125, %v116_v19 }
 0x173   :  { %v123_v21 = vsub.f32 %v110_v15, %v121_v20 }
 0x174   :  { %v119_v22 = vpop.xlane.xlu0 %118 }
 0x175   :  { %v122_v23 = vmul.f32 0.03125, %v119_v22  ;;  %v125_v24 = vmul.f32 %v123_v21, %v123_v21 }
 0x177   :  { %v124_v25 = vsub.f32 %v111_v17, %v122_v23  ;;  %v127_v26 = vsel %vm56_vm1, %v125_v24, 0.0 }
 0x178   :  { %128 = vadd.xlane.f32.xlu1 %v127_v26 }
 0x179   :  { %v126_v27 = vmul.f32 %v124_v25, %v124_v25 }
 0x17b   :  { %v130_v28 = vsel %vm56_vm1, %v126_v27, 0.0 }
 0x17c   :  { %131 = vadd.xlane.f32.xlu1 %v130_v28 }
 0x205   :  { %v129_v31 = vpop.xlane.xlu1 %128 }
 0x206   :  { %v133_v32 = vmul.f32 0.03125, %v129_v31 }
 0x208   :  { %v135_v33 = vadd.f32 1e-05, %v133_v32 }
 0x209   :  { %v132_v34 = vpop.xlane.xlu1 %131 }
 0x20a   :  { %279 = vrsqrt.f32 %v135_v33  ;;  %v134_v35 = vmul.f32 0.03125, %v132_v34 }
 0x20c   :  { %v136_v36 = vadd.f32 1e-05, %v134_v35 }
 0x20e   :  { %281 = vrsqrt.f32 %v136_v36 }
 0x214   :  { %v280_v37 = vpop.eup %279 }
 0x215   :  { %v139_v39 = vmul.f32 %v280_v37, %v123_v21 }
 0x217   :  { %v147_v41 = vmul.f32 %v245_v38, %v139_v39 }
 0x218   :  { %v282_v42 = vpop.eup %281 }
 0x219   :  { %v140_v43 = vmul.f32 %v282_v42, %v124_v25  ;;  %v155_v44 = vadd.f32 %v246_v40, %v147_v41 }
 0x21b   :  { %v148_v45 = vmul.f32 %v245_v38, %v140_v43  ;;  %157 = vst.msk [vmem:[%s411_s9] sm:$0xff] %vm56_vm1, %v155_v44  ;;  %v161_v49 = vadd.f32 %v159_v46, %v155_v44 }
 0x21d   :  { %v156_v48 = vadd.f32 %v246_v40, %v148_v45 }
 0x21f   :  { %158 = vst.msk [vmem:[%s411_s9 + $0x8] sm:$0xff] %vm56_vm1, %v156_v48  ;;  %v162_v50 = vadd.f32 %v160_v47, %v156_v48 }
 0x221   :  { %v163_v51 = vpack.c.bf16 %v162_v50, %v161_v49 }
 0x223   :  { %270 = vmatmul.mubr.msk.bf16.vlgmr.msra.gmra.mrb[0].mxu1 %vm56_vm1, %v163_v51 }
 0x2f6   :  { %v224_v53 = vpop.f32.mrb[0].mxu1 }
 0x2f7   :  { %v225_v54 = vadd.f32 %v247_v52, %v224_v53  ;;  %v271_v55 = vpop.f32.mrb[1].mxu1 }
 0x2f8   :  { %v227_v56 = vpop.f32.mrb[2].mxu1 }
 0x2f9   :  { %231 = vst.msk [vmem:[%s414_s10] sm:$0xff] %vm56_vm1, %v225_v54  ;;  %v228_v57 = vadd.f32 %v247_v52, %v227_v56  ;;  %v272_v58 = vpop.f32.mrb[3].mxu1 }
 0x2fb   :  { %232 = vst.msk [vmem:[%s414_s10 + $0x8] sm:$0xff] %vm56_vm1, %v228_v57 }

// kernel: transformer_forward.32
= control target key start
LH: loop header
LB: loop body
LE: loop exit
PB: predicated region body
PF: predicated region fallthrough
CT: control target
= control target key end

     0   :  { %s956_s15 = smov 0   ;;  %s1061_s0 = inlined_call_operand.vmem [shape: f32[2,8,32], index: 0, kind: input, shape index: {}]   ;;  %s1062_s1 = inlined_call_operand.vmem [shape: f32[2,8,32], index: 1, kind: input, shape index: {}]   ;;  %s1063_s2 = inlined_call_operand.vmem [shape: f32[2,8,32], index: 2, kind: input, shape index: {}]   ;;  %s1064_s3 = inlined_call_operand.vmem [shape: f32[2,1,8], index: 3, kind: input, shape index: {}]   ;;  %s1065_s4 = inlined_call_operand.vmem [shape: f32[2,8,32], index: 4, kind: output, shape index: {}]  }
   0x1 LB: > { %s799_s16 = sadd.s32 4294967295, %s921_s15   ;;  %p803_p0 = scmp.ge.s32.totalorder %s921_s15, 1  ;;  %s921_s15 = sphi %s956_s15, %s14_s15  }
   0x2   : > { %p187_p1 = scmp.lt.s32.totalorder %s921_s15, 3 }
   0x4   : > { %p188_p2 = pnand %p803_p0, %p187_p1 }
   0x5   : > { %p222_p3 = scmp.lt.s32.totalorder (!%p188_p2), %s799_s16, 1  ;;  %v923_v0 = vmov (!%p188_p2), 0.0   ;;  %vm924_vm0 = vmmov (!%p188_p2), 0   ;;  %vm255_vm1 = vcmask (!%p188_p2), 64512   ;;  %s925_s27 = smov (!%p188_p2), 120   ;;  %vm317_vm2 = vcmask (!%p188_p2), 1043456  }
   0x6   : > { %191 = sbr.rel (%p188_p2) target bundleno = 1477 (0x5c5), region = 36  ;;  %835 = vmatprep.subr.bf16.mxu0 (!%p188_p2), %v923_v0  ;;  %837 = vmatprep.mubr.msk.bf16.mxu0 (!%p188_p2), %vm924_vm0, %v923_v0  ;;  %s926_s28 = smov (!%p188_p2), 112   ;;  %vm707_vm3 = vcmask (!%p188_p2), 130048   ;;  %vm709_vm4 = vcmask (!%p188_p2), 195584   ;;  %vm711_vm5 = vcmask (!%p188_p2), 261120  }
   0x7   : > { %841 = vmatprep.subr.bf16.mxu1 (!%p188_p2), %v923_v0  ;;  %843 = vmatprep.mubr.msk.bf16.mxu1 (!%p188_p2), %vm924_vm0, %v923_v0  ;;  %s927_s29 = smov (!%p188_p2), 104   ;;  %s928_s7 = smov (!%p188_p2), 8  }
   0x8   : > { %s929_s8 = smov (!%p188_p2), 16   ;;  %s930_s9 = smov (!%p188_p2), 24  }
   0xd   : > { %s1067_s16 = smov (!%p222_p3, %s799_s16), 1 }
   0xe   : > { %s970_s17 = sshll.u32 %s1067_s16, 3  ;;  %s236_s26 = scalar_lea.vmem %s1064_s3, %s1067_s16 }
   0xf   : > { %s229_s20 = scalar_lea.vmem %s1062_s1, %s970_s17  ;;  %s225_s23 = scalar_lea.vmem %s1061_s0, %s970_s17  ;;  %v988_v6 = vld [vmem:[%s236_s26] ss:$0 sm:$0xff] }
  0x10   : > { %v244_v1 = vld [vmem:[%s229_s20] sm:$0xff]  ;;  %s233_s6 = scalar_lea.vmem %s1063_s2, %s970_s17  ;;  %s240_s12 = scalar_lea.vmem %s1065_s4, %s970_s17 }
  0x11   : > { %v245_v2 = vpack.c.bf16 %v244_v1, %v244_v1  ;;  %v242_v4 = vld [vmem:[%s225_s23] sm:$0xff] }
  0x12   : > { %v243_v5 = vpack.c.bf16 %v242_v4, %v242_v4  ;;  %v246_v18 = vld [vmem:[%s233_s6] sm:$0xff] }
  0x13   : > { %v260_v3 = vsel %vm255_vm1, %v245_v2, 0  ;;  %365 = vrot.lane.b32.xlu1 %v245_v2, %s925_s27  ;;  %v1002_v19 = vpack.c.bf16 %v246_v18, %v246_v18 }
  0x14   : > { %836 = vmatpush3.bf16.xpose.msra.mxu0 %v260_v3 }
  0x15   : > { %853 = vmatprep.subr.bf16.mxu0 %v923_v0  ;;  %v319_v20 = vsel %vm317_vm2, %v1002_v19, 0 }
  0x16   : > { %842 = vmatpush3.bf16.msra.mxu1 %v319_v20 }
  0x17   : > { %362 = vrot.lane.b32.xlu1 %v243_v5, %s925_s27  ;;  %847 = vmatprep.subr.bf16.mxu1 %v923_v0 }
  0x1b   : > { %838 = vmatmul.mubr.msk.bf16.vlgmr.msra.gmra.mrb[0].mxu0 %vm255_vm1, %v243_v5  ;;  %474 = vrot.lane.b32.xlu1 %v243_v5, %s926_s28 }
  0x1c   : > { %855 = vmatprep.mubr.msk.bf16.mxu0 %vm924_vm0, %v923_v0 }
  0x1f   : > { %586 = vrot.lane.b32.xlu1 %v245_v2, %s927_s29 }
  0x23   : > { %584 = vrot.lane.b32.xlu1 %v243_v5, %s927_s29 }
  0x85   : > { %v366_v23 = vpop.permute.xlu1 %365 }
  0x86   : > { %v371_v25 = vsel %vm255_vm1, %v366_v23, 0 }
  0x89   : > { %v363_v27 = vpop.permute.xlu1 %362 }
  0x8d   : > { %v475_v29 = vpop.permute.xlu1 %474 }
  0x91   : > { %v587_v31 = vpop.permute.xlu1 %586 }
  0x92   : > { %v592_v32 = vsel %vm255_vm1, %v587_v31, 0 }
  0x95   : > { %v585_v33 = vpop.permute.xlu1 %584 }
  0xee   : > { %v296_v7 = vpop.f32.mrb[0].mxu0 }
  0xef   : > { %v297_v8 = vadd.f32 %v988_v6, %v296_v7  ;;  %v839_v9 = vpop.f32.mrb[1].mxu0 }
  0xf0   : > { %v299_v10 = vpop.f32.mrb[2].mxu0 }
  0xf1   : > { %v840_v11 = vpop.f32.mrb[3].mxu0  ;;  %v302_v12 = vsel %vm255_vm1, %v297_v8, -inf }
  0xf2   : > { %303 = vmax.xlane.f32.xlu0 %v302_v12 }
 0x17f   : > { %v304_v13 = vpop.xlane.xlu0 %303 }
 0x180   : > { %v305_v14 = vsub.f32 %v297_v8, %v304_v13 }
 0x182   : > { %v306_v15 = vmul.f32 1.442695, %v305_v14 }
 0x184   : > { %899 = vpow2.f32 %v306_v15 }
 0x18e   : > { %v900_v16 = vpop.eup %899 }
 0x18f   : > { %v308_v17 = vsel %vm255_vm1, %v900_v16, 0.0 }
 0x190   : > { %309 = vadd.xlane.f32.xlu0 %v308_v17 }
 0x1a6   : > { %476 = vrot.lane.b32.xlu0 %v245_v2, %s926_s28 }
 0x21d   : > { %v310_v21 = vpop.xlane.xlu0 %309 }
 0x21e   : > { %901 = vrcp.f32 %v310_v21 }
 0x221   : > { %v477_v28 = vpop.permute.xlu0 %476 }
 0x222   : > { %v482_v30 = vsel %vm255_vm1, %v477_v28, 0 }
 0x228   : > { %v902_v22 = vpop.eup %901 }
 0x229   : > { %v312_v24 = vmul.f32 %v902_v22, %v900_v16 }
 0x22b   : > { %v313_v26 = vpack.c.bf16 %v312_v24, %v312_v24 }
 0x22d   : > { %844 = vmatmul.mubr.msk.bf16.vlgmr.msra.gmra.mrb[0].mxu1 %vm255_vm1, %v313_v26 }
 0x22e   : > { %848 = vmatpush3.bf16.xpose.msra.mxu1 %v371_v25  ;;  %849 = vmatprep.mubr.msk.bf16.mxu1 %vm924_vm0, %v923_v0 }
 0x22f   : > { %859 = vmatprep.subr.bf16.mxu1 %v923_v0 }
 0x235   : > { %850 = vmatmul.mubr.msk.bf16.vlgmr.msra.gmra.mrb[4].mxu1 %vm255_vm1, %v363_v27 }
 0x236   : > { %860 = vmatpush3.bf16.xpose.msra.mxu1 %v482_v30  ;;  %861 = vmatprep.mubr.msk.bf16.mxu1 %vm924_vm0, %v923_v0 }
 0x237   : > { %871 = vmatprep.subr.bf16.mxu1 %v923_v0 }
 0x23d   : > { %862 = vmatmul.mubr.msk.bf16.vlgmr.msra.gmra.mrb[8].mxu1 %vm255_vm1, %v475_v29 }
 0x23e   : > { %872 = vmatpush3.bf16.xpose.msra.mxu1 %v592_v32  ;;  %873 = vmatprep.mubr.msk.bf16.mxu1 %vm924_vm0, %v923_v0 }
 0x245   : > { %874 = vmatmul.mubr.msk.bf16.vlgmr.msra.gmra.mrb[12].mxu1 %vm255_vm1, %v585_v33 }
 0x300   : > { %v1023_v34 = vpop.f32.mrb[0].mxu1 }
 0x301   : > { %v845_v35 = vpop.f32.mrb[1].mxu1 }
 0x302   : > { %v358_v36 = vpop.f32.mrb[2].mxu1 }
 0x303   : > { %v846_v37 = vpop.f32.mrb[3].mxu1 }
 0x308   : > { %v407_v38 = vpop.f32.mrb[4].mxu1 }
 0x309   : > { %v408_v39 = vadd.f32 %v988_v6, %v407_v38  ;;  %v851_v40 = vpop.f32.mrb[5].mxu1 }
 0x30a   : > { %v410_v41 = vpop.f32.mrb[6].mxu1 }
 0x30b   : > { %v852_v42 = vpop.f32.mrb[7].mxu1  ;;  %v413_v43 = vsel %vm255_vm1, %v408_v39, -inf }
 0x30c   : > { %414 = vmax.xlane.f32.xlu1 %v413_v43 }
 0x310   : > { %v518_v44 = vpop.f32.mrb[8].mxu1 }
 0x311   : > { %v519_v45 = vadd.f32 %v988_v6, %v518_v44  ;;  %v863_v46 = vpop.f32.mrb[9].mxu1 }
 0x312   : > { %v521_v47 = vpop.f32.mrb[10].mxu1 }
 0x313   : > { %v524_v48 = vsel %vm255_vm1, %v519_v45, -inf  ;;  %v864_v49 = vpop.f32.mrb[11].mxu1 }
 0x314   : > { %525 = vmax.xlane.f32.xlu0 %v524_v48 }
 0x318   : > { %v628_v50 = vpop.f32.mrb[12].mxu1 }
 0x319   : > { %v629_v51 = vadd.f32 %v988_v6, %v628_v50  ;;  %v875_v52 = vpop.f32.mrb[13].mxu1 }
 0x31a   : > { %v631_v53 = vpop.f32.mrb[14].mxu1 }
 0x31b   : > { %v634_v54 = vsel %vm255_vm1, %v629_v51, -inf  ;;  %v876_v55 = vpop.f32.mrb[15].mxu1 }
 0x31c   : > { %635 = vmax.xlane.f32.xlu1 %v634_v54 }
 0x399   : > { %v415_v56 = vpop.xlane.xlu1 %414 }
 0x39a   : > { %v416_v57 = vsub.f32 %v408_v39, %v415_v56 }
 0x39c   : > { %v417_v58 = vmul.f32 1.442695, %v416_v57 }
 0x39e   : > { %903 = vpow2.f32 %v417_v58 }
 0x3a1   : > { %v526_v59 = vpop.xlane.xlu0 %525 }
 0x3a2   : > { %v527_v60 = vsub.f32 %v519_v45, %v526_v59 }
 0x3a4   : > { %v528_v61 = vmul.f32 1.442695, %v527_v60 }
 0x3a6   : > { %905 = vpow2.f32 %v528_v61 }
 0x3a8   : > { %v904_v62 = vpop.eup %903 }
 0x3a9   : > { %v419_v63 = vsel %vm255_vm1, %v904_v62, 0.0  ;;  %v636_v3 = vpop.xlane.xlu1 %635 }
 0x3aa   : > { %420 = vadd.xlane.f32.xlu1 %v419_v63  ;;  %v637_v4 = vsub.f32 %v629_v51, %v636_v3 }
 0x3ac   : > { %v638_v5 = vmul.f32 1.442695, %v637_v4 }
 0x3ae   : > { %907 = vpow2.f32 %v638_v5 }
 0x3b0   : > { %v906_v1 = vpop.eup %905 }
 0x3b1   : > { %v530_v2 = vsel %vm255_vm1, %v906_v1, 0.0 }
 0x3b2   : > { %531 = vadd.xlane.f32.xlu0 %v530_v2 }
 0x3b8   : > { %v908_v6 = vpop.eup %907 }
 0x3b9   : > { %v640_v7 = vsel %vm255_vm1, %v908_v6, 0.0 }
 0x3bb   : > { %536 = vrot.lane.b32.xlu1 %v1002_v19, %s926_s28 }
 0x3c8   : > { %426 = vrot.lane.b32.xlu0 %v1002_v19, %s925_s27 }
 0x3df   : > { %641 = vadd.xlane.f32.xlu1 %v640_v7 }
 0x3f0   : > { %646 = vrot.lane.b32.xlu1 %v1002_v19, %s927_s29 }
 0x437   : > { %v421_v8 = vpop.xlane.xlu1 %420 }
 0x438   : > { %909 = vrcp.f32 %v421_v8 }
 0x43b   : > { %v537_v14 = vpop.permute.xlu1 %536 }
 0x43c   : > { %v542_v16 = vsel %vm317_vm2, %v537_v14, 0 }
 0x43f   : > { %v532_v9 = vpop.xlane.xlu0 %531 }
 0x440   : > { %911 = vrcp.f32 %v532_v9 }
 0x442   : > { %v910_v10 = vpop.eup %909 }
 0x443   : > { %v423_v11 = vmul.f32 %v910_v10, %v904_v62  ;;  %v427_v12 = vpop.permute.xlu0 %426 }
 0x444   : > { %v432_v13 = vsel %vm317_vm2, %v427_v12, 0 }
 0x445   : > { %854 = vmatpush3.bf16.msra.mxu0 %v432_v13  ;;  %v424_v15 = vpack.c.bf16 %v423_v11, %v423_v11 }
 0x446   : > { %865 = vmatprep.subr.bf16.mxu0 %v923_v0 }
 0x448   : > { %856 = vmatmul.mubr.msk.bf16.vlgmr.msra.gmra.mrb[4].mxu0 %vm255_vm1, %v424_v15 }
 0x449   : > { %866 = vmatpush3.bf16.msra.mxu0 %v542_v16  ;;  %867 = vmatprep.mubr.msk.bf16.mxu0 %vm924_vm0, %v923_v0 }
 0x44a   : > { %v912_v17 = vpop.eup %911  ;;  %877 = vmatprep.subr.bf16.mxu0 %v923_v0 }
 0x44b   : > { %v534_v18 = vmul.f32 %v912_v17, %v906_v1 }
 0x44d   : > { %v535_v19 = vpack.c.bf16 %v534_v18, %v534_v18 }
 0x450   : > { %868 = vmatmul.mubr.msk.bf16.vlgmr.msra.gmra.mrb[8].mxu0 %vm255_vm1, %v535_v19 }
 0x451   : > { %879 = vmatprep.mubr.msk.bf16.mxu0 %vm924_vm0, %v923_v0 }
 0x46c   : > { %v642_v20 = vpop.xlane.xlu1 %641 }
 0x46d   : > { %913 = vrcp.f32 %v642_v20 }
 0x470   : > { %v647_v21 = vpop.permute.xlu1 %646 }
 0x471   : > { %v652_v22 = vsel %vm317_vm2, %v647_v21, 0 }
 0x472   : > { %878 = vmatpush3.bf16.msra.mxu0 %v652_v22 }
 0x477   : > { %v914_v23 = vpop.eup %913 }
 0x478   : > { %v644_v24 = vmul.f32 %v914_v23, %v908_v6 }
 0x47a   : > { %v645_v25 = vpack.c.bf16 %v644_v24, %v644_v24 }
 0x47c   : > { %880 = vmatmul.mubr.msk.bf16.vlgmr.msra.gmra.mrb[12].mxu0 %vm255_vm1, %v645_v25 }
 0x51b   : > { %v468_v26 = vpop.f32.mrb[4].mxu0 }
 0x51c   : > { %695 = vrot.lane.b32.xlu0 %v468_v26, %s928_s7  ;;  %v857_v27 = vpop.f32.mrb[5].mxu0 }
 0x51d   : > { %v471_v28 = vpop.f32.mrb[6].mxu0 }
 0x51e   : > { %v858_v29 = vpop.f32.mrb[7].mxu0 }
 0x523   : > { %v578_v30 = vpop.f32.mrb[8].mxu0 }
 0x524   : > { %699 = vrot.lane.b32.xlu1 %v578_v30, %s929_s8  ;;  %v869_v0 = vpop.f32.mrb[9].mxu0 }
 0x525   : > { %v581_v31 = vpop.f32.mrb[10].mxu0 }
 0x526   : > { %v870_v32 = vpop.f32.mrb[11].mxu0 }
 0x54f   : > { %v688_v33 = vpop.f32.mrb[12].mxu0 }
 0x550   : > { %703 = vrot.lane.b32.xlu0 %v688_v33, %s930_s9  ;;  %v881_v35 = vpop.f32.mrb[13].mxu0 }
 0x551   : > { %v691_v36 = vpop.f32.mrb[14].mxu0 }
 0x552   : > { %v882_v37 = vpop.f32.mrb[15].mxu0 }
 0x58e   : > { %v696_v38 = vpop.permute.xlu0 %695 }
 0x58f   : > { %v706_v40 = vsel %vm255_vm1, %v1023_v34, %v696_v38 }
 0x596   : > { %v700_v39 = vpop.permute.xlu1 %699 }
 0x597   : > { %v708_v41 = vsel %vm707_vm3, %v706_v40, %v700_v39 }
 0x5c2   : > { %v704_v42 = vpop.permute.xlu0 %703 }
 0x5c3   : > { %v710_v43 = vsel %vm709_vm4, %v708_v41, %v704_v42 }
 0x5c4   : > { %712 = vst.msk [vmem:[%s240_s12] sm:$0xff] %vm711_vm5, %v710_v43 }
 0x5c5 PF: > { %s14_s15 = sadd.s32 1, %s921_s15  }
 0x5c6   : > { %p11_p4 = scmp.ge.s32.totalorder %s14_s15, 4  }
 0x5c8   :  { %13 = sbr.rel (!%p11_p4) target bundleno = 1 (0x1), region = 75 }

// kernel: transformer_forward.36
= control target key start
LH: loop header
LB: loop body
LE: loop exit
PB: predicated region body
PF: predicated region fallthrough
CT: control target
= control target key end

     0   :  { %v177_v0 = vmov 0.0   ;;  %vm178_vm0 = vmmov 0   ;;  %vm45_vm1 = vcmask 261120   ;;  %s254_s1 = inlined_call_operand.vmem [shape: bf16[32,32], index: 1, kind: input, shape index: {}]   ;;  %s255_s0 = inlined_call_operand.vmem [shape: f32[16,32], index: 0, kind: input, shape index: {}]   ;;  %s256_s3 = inlined_call_operand.vmem [shape: f32[16,32], index: 3, kind: input, shape index: {}]   ;;  %s257_s2 = inlined_call_operand.vmem [shape: f32[1,32], index: 2, kind: input, shape index: {}]   ;;  %s258_s4 = inlined_call_operand.vmem [shape: f32[1,32], index: 4, kind: input, shape index: {}]   ;;  %s259_s5 = inlined_call_operand.vmem [shape: f32[1,32], index: 5, kind: input, shape index: {}]   ;;  %s260_s6 = inlined_call_operand.vmem [shape: f32[16,32], index: 6, kind: output, shape index: {}]  }
   0x1   :  { %161 = vmatprep.subr.bf16.mxu0 %v177_v0  ;;  %v171_v1 = vld [vmem:[%s254_s1] sm:$0xff]   ;;  %165 = vmatprep.mubr.msk.bf16.mxu0 %vm178_vm0, %v177_v0  ;;  %v172_v2 = vld [vmem:[%s254_s1 + $0x8] sm:$0xff]  }
   0x2   :  { %162 = vmatpush3.bf16.msra.mxu0 %v171_v1  ;;  %v24_v3 = vld [vmem:[%s255_s0] sm:$0xff]  ;;  %v25_v4 = vld [vmem:[%s255_s0 + $0x8] sm:$0xff] }
   0x3   :  { %163 = vmatprep.subr.bf16.mxu0 %v177_v0  ;;  %v26_v5 = vpack.c.bf16 %v25_v4, %v24_v3  ;;  %v27_v6 = vld [vmem:[%s256_s3] sm:$0xff]  ;;  %v28_v8 = vld [vmem:[%s256_s3 + $0x8] sm:$0xff] }
   0x4   :  { %v155_v9 = vld [vmem:[%s257_s2] ss:$0 sm:$0xff] }
   0x5   :  { %v156_v36 = vld [vmem:[%s258_s4] ss:$0 sm:$0xff] }
   0x6   :  { %164 = vmatpush3.bf16.msra.mxu0 %v172_v2  ;;  %v157_v38 = vld [vmem:[%s259_s5] ss:$0 sm:$0xff] }
   0x9   :  { %166 = vmatmul.mubr.msk.bf16.vlgmr.msra.gmra.mrb[0].mxu0 %vm45_vm1, %v26_v5 }
  0xdc   :  { %v83_v7 = vpop.f32.mrb[0].mxu0 }
  0xdd   :  { %v90_v10 = vadd.f32 %v83_v7, %v27_v6  ;;  %v167_v11 = vpop.f32.mrb[1].mxu0 }
  0xde   :  { %v86_v12 = vpop.f32.mrb[2].mxu0 }
  0xdf   :  { %v91_v13 = vadd.f32 %v86_v12, %v28_v8  ;;  %v168_v14 = vpop.f32.mrb[3].mxu0  ;;  %v99_v15 = vadd.f32 %v155_v9, %v90_v10 }
  0xe1   :  { %v103_v16 = vsel %vm45_vm1, %v99_v15, 0.0  ;;  %v100_v17 = vadd.f32 %v155_v9, %v91_v13 }
  0xe2   :  { %104 = vadd.xlane.f32.xlu0 %v103_v16 }
  0xe3   :  { %v106_v18 = vsel %vm45_vm1, %v100_v17, 0.0 }
  0xe6   :  { %107 = vadd.xlane.f32.xlu0 %v106_v18 }
 0x16f   :  { %v105_v19 = vpop.xlane.xlu0 %104 }
 0x170   :  { %v110_v20 = vmul.f32 0.03125, %v105_v19 }
 0x172   :  { %v112_v21 = vsub.f32 %v99_v15, %v110_v20 }
 0x173   :  { %v108_v22 = vpop.xlane.xlu0 %107 }
 0x174   :  { %v111_v23 = vmul.f32 0.03125, %v108_v22  ;;  %v114_v24 = vmul.f32 %v112_v21, %v112_v21 }
 0x176   :  { %v113_v25 = vsub.f32 %v100_v17, %v111_v23  ;;  %v116_v26 = vsel %vm45_vm1, %v114_v24, 0.0 }
 0x177   :  { %117 = vadd.xlane.f32.xlu1 %v116_v26 }
 0x178   :  { %v115_v27 = vmul.f32 %v113_v25, %v113_v25 }
 0x17a   :  { %v119_v28 = vsel %vm45_vm1, %v115_v27, 0.0 }
 0x17b   :  { %120 = vadd.xlane.f32.xlu1 %v119_v28 }
 0x204   :  { %v118_v29 = vpop.xlane.xlu1 %117 }
 0x205   :  { %v122_v30 = vmul.f32 0.03125, %v118_v29 }
 0x207   :  { %v124_v31 = vadd.f32 1e-05, %v122_v30 }
 0x208   :  { %v121_v32 = vpop.xlane.xlu1 %120 }
 0x209   :  { %173 = vrsqrt.f32 %v124_v31  ;;  %v123_v33 = vmul.f32 0.03125, %v121_v32 }
 0x20b   :  { %v125_v34 = vadd.f32 1e-05, %v123_v33 }
 0x20d   :  { %175 = vrsqrt.f32 %v125_v34 }
 0x213   :  { %v174_v35 = vpop.eup %173 }
 0x214   :  { %v128_v37 = vmul.f32 %v174_v35, %v112_v21 }
 0x216   :  { %v136_v39 = vmul.f32 %v156_v36, %v128_v37 }
 0x217   :  { %v176_v40 = vpop.eup %175 }
 0x218   :  { %v144_v41 = vadd.f32 %v157_v38, %v136_v39  ;;  %v129_v42 = vmul.f32 %v176_v40, %v113_v25 }
 0x21a   :  { %146 = vst.msk [vmem:[%s260_s6] sm:$0xff] %vm45_vm1, %v144_v41  ;;  %v137_v43 = vmul.f32 %v156_v36, %v129_v42 }
 0x21c   :  { %v145_v44 = vadd.f32 %v157_v38, %v137_v43 }
 0x21e   :  { %147 = vst.msk [vmem:[%s260_s6 + $0x8] sm:$0xff] %vm45_vm1, %v145_v44 }

// kernel: transformer_forward.35
= control target key start
LH: loop header
LB: loop body
LE: loop exit
PB: predicated region body
PF: predicated region fallthrough
CT: control target
= control target key end

     0   :  { %s958_s15 = smov 0   ;;  %s1067_s0 = inlined_call_operand.vmem [shape: f32[2,8,32], index: 0, kind: input, shape index: {}]   ;;  %s1068_s1 = inlined_call_operand.vmem [shape: f32[2,16,32], index: 1, kind: input, shape index: {}]   ;;  %s1069_s2 = inlined_call_operand.vmem [shape: f32[2,16,32], index: 2, kind: input, shape index: {}]   ;;  %s1070_s3 = inlined_call_operand.vmem [shape: f32[2,1,16], index: 3, kind: input, shape index: {}]   ;;  %s1071_s4 = inlined_call_operand.vmem [shape: f32[2,8,32], index: 4, kind: output, shape index: {}]  }
   0x1 LB: > { %s797_s16 = sadd.s32 4294967295, %s923_s15   ;;  %p801_p0 = scmp.ge.s32.totalorder %s923_s15, 1  ;;  %s923_s15 = sphi %s958_s15, %s14_s15  }
   0x2   : > { %p189_p1 = scmp.lt.s32.totalorder %s923_s15, 3 }
   0x4   : > { %p190_p2 = pnand %p801_p0, %p189_p1 }
   0x5   : > { %p226_p3 = scmp.lt.s32.totalorder (!%p190_p2), %s797_s16, 1  ;;  %v925_v0 = vmov (!%p190_p2), 0.0   ;;  %vm926_vm0 = vmmov (!%p190_p2), 0   ;;  %vm263_vm1 = vcmask (!%p190_p2), 64512   ;;  %vm310_vm2 = vcmask (!%p190_p2), 130048   ;;  %s927_s28 = smov (!%p190_p2), 120  }
   0x6   : > { %193 = sbr.rel (%p190_p2) target bundleno = 1477 (0x5c5), region = 36  ;;  %837 = vmatprep.subr.bf16.mxu0 (!%p190_p2), %v925_v0  ;;  %839 = vmatprep.mubr.msk.bf16.mxu0 (!%p190_p2), %vm926_vm0, %v925_v0  ;;  %s928_s29 = smov (!%p190_p2), 112   ;;  %vm707_vm3 = vcmask (!%p190_p2), 195584   ;;  %vm709_vm4 = vcmask (!%p190_p2), 261120  }
   0x7   : > { %843 = vmatprep.subr.bf16.mxu1 (!%p190_p2), %v925_v0  ;;  %845 = vmatprep.mubr.msk.bf16.mxu1 (!%p190_p2), %vm926_vm0, %v925_v0  ;;  %s929_s30 = smov (!%p190_p2), 104   ;;  %s930_s8 = smov (!%p190_p2), 8  }
   0x8   : > { %s931_s9 = smov (!%p190_p2), 16   ;;  %s932_s10 = smov (!%p190_p2), 24  }
   0xd   : > { %s1073_s16 = smov (!%p226_p3, %s797_s16), 1 }
   0xe   : > { %s819_s17 = sshll.u32 %s1073_s16, 4  ;;  %s802_s18 = sshll.u32 %s1073_s16, 3 }
   0xf   : > { %s234_s21 = scalar_lea.vmem %s1068_s1, %s819_s17  ;;  %s229_s24 = scalar_lea.vmem %s1067_s0, %s802_s18 }
  0x10   : > { %v250_v1 = vld [vmem:[%s234_s21] sm:$0xff]  ;;  %v251_v2 = vld [vmem:[%s234_s21 + $0x8] sm:$0xff]  ;;  %s242_s27 = scalar_lea.vmem %s1070_s3, %s1073_s16  ;;  %s239_s7 = scalar_lea.vmem %s1069_s2, %s819_s17 }
  0x11   : > { %v252_v3 = vpack.c.bf16 %v251_v2, %v250_v1  ;;  %v248_v5 = vld [vmem:[%s229_s24] sm:$0xff]  ;;  %v254_v20 = vld [vmem:[%s239_s7 + $0x8] sm:$0xff]  ;;  %s246_s13 = scalar_lea.vmem %s1071_s4, %s802_s18 }
  0x12   : > { %v249_v6 = vpack.c.bf16 %v248_v5, %v248_v5  ;;  %v995_v7 = vld [vmem:[%s242_s27] ss:$0 sm:$0xff] }
  0x13   : > { %v268_v4 = vsel %vm263_vm1, %v252_v3, 0  ;;  %370 = vrot.lane.b32.xlu1 %v252_v3, %s927_s28  ;;  %v253_v19 = vld [vmem:[%s239_s7] sm:$0xff] }
  0x14   : > { %838 = vmatpush3.bf16.xpose.msra.mxu0 %v268_v4  ;;  %v1010_v21 = vpack.c.bf16 %v254_v20, %v253_v19 }
  0x15   : > { %855 = vmatprep.subr.bf16.mxu0 %v925_v0 }
  0x16   : > { %844 = vmatpush3.bf16.msra.mxu1 %v1010_v21 }
  0x17   : > { %367 = vrot.lane.b32.xlu1 %v249_v6, %s927_s28  ;;  %849 = vmatprep.subr.bf16.mxu1 %v925_v0 }
  0x1b   : > { %840 = vmatmul.mubr.msk.bf16.vlgmr.msra.gmra.mrb[0].mxu0 %vm263_vm1, %v249_v6  ;;  %477 = vrot.lane.b32.xlu1 %v249_v6, %s928_s29 }
  0x1c   : > { %857 = vmatprep.mubr.msk.bf16.mxu0 %vm926_vm0, %v925_v0 }
  0x1f   : > { %587 = vrot.lane.b32.xlu1 %v252_v3, %s929_s30 }
  0x23   : > { %585 = vrot.lane.b32.xlu1 %v249_v6, %s929_s30 }
  0x85   : > { %v371_v24 = vpop.permute.xlu1 %370 }
  0x86   : > { %v376_v26 = vsel %vm263_vm1, %v371_v24, 0 }
  0x89   : > { %v368_v28 = vpop.permute.xlu1 %367 }
  0x8d   : > { %v478_v30 = vpop.permute.xlu1 %477 }
  0x91   : > { %v588_v32 = vpop.permute.xlu1 %587 }
  0x92   : > { %v593_v33 = vsel %vm263_vm1, %v588_v32, 0 }
  0x95   : > { %v586_v34 = vpop.permute.xlu1 %585 }
  0xee   : > { %v304_v8 = vpop.f32.mrb[0].mxu0 }
  0xef   : > { %v305_v9 = vadd.f32 %v995_v7, %v304_v8  ;;  %v841_v10 = vpop.f32.mrb[1].mxu0 }
  0xf0   : > { %v307_v11 = vpop.f32.mrb[2].mxu0 }
  0xf1   : > { %v842_v12 = vpop.f32.mrb[3].mxu0  ;;  %v311_v13 = vsel %vm310_vm2, %v305_v9, -inf }
  0xf2   : > { %312 = vmax.xlane.f32.xlu0 %v311_v13 }
 0x17f   : > { %v313_v14 = vpop.xlane.xlu0 %312 }
 0x180   : > { %v314_v15 = vsub.f32 %v305_v9, %v313_v14 }
 0x182   : > { %v315_v16 = vmul.f32 1.442695, %v314_v15 }
 0x184   : > { %901 = vpow2.f32 %v315_v16 }
 0x18e   : > { %v902_v17 = vpop.eup %901 }
 0x18f   : > { %v317_v18 = vsel %vm310_vm2, %v902_v17, 0.0 }
 0x190   : > { %318 = vadd.xlane.f32.xlu0 %v317_v18 }
 0x1a6   : > { %479 = vrot.lane.b32.xlu0 %v252_v3, %s928_s29 }
 0x21d   : > { %v319_v22 = vpop.xlane.xlu0 %318 }
 0x21e   : > { %903 = vrcp.f32 %v319_v22 }
 0x221   : > { %v480_v29 = vpop.permute.xlu0 %479 }
 0x222   : > { %v485_v31 = vsel %vm263_vm1, %v480_v29, 0 }
 0x228   : > { %v904_v23 = vpop.eup %903 }
 0x229   : > { %v321_v25 = vmul.f32 %v904_v23, %v902_v17 }
 0x22b   : > { %v322_v27 = vpack.c.bf16 %v321_v25, %v321_v25 }
 0x22d   : > { %846 = vmatmul.mubr.msk.bf16.vlgmr.msra.gmra.mrb[0].mxu1 %vm310_vm2, %v322_v27 }
 0x22e   : > { %850 = vmatpush3.bf16.xpose.msra.mxu1 %v376_v26  ;;  %851 = vmatprep.mubr.msk.bf16.mxu1 %vm926_vm0, %v925_v0 }
 0x22f   : > { %861 = vmatprep.subr.bf16.mxu1 %v925_v0 }
 0x235   : > { %852 = vmatmul.mubr.msk.bf16.vlgmr.msra.gmra.mrb[4].mxu1 %vm263_vm1, %v368_v28 }
 0x236   : > { %862 = vmatpush3.bf16.xpose.msra.mxu1 %v485_v31  ;;  %863 = vmatprep.mubr.msk.bf16.mxu1 %vm926_vm0, %v925_v0 }
 0x237   : > { %873 = vmatprep.subr.bf16.mxu1 %v925_v0 }
 0x23d   : > { %864 = vmatmul.mubr.msk.bf16.vlgmr.msra.gmra.mrb[8].mxu1 %vm263_vm1, %v478_v30 }
 0x23e   : > { %874 = vmatpush3.bf16.xpose.msra.mxu1 %v593_v33  ;;  %875 = vmatprep.mubr.msk.bf16.mxu1 %vm926_vm0, %v925_v0 }
 0x245   : > { %876 = vmatmul.mubr.msk.bf16.vlgmr.msra.gmra.mrb[12].mxu1 %vm263_vm1, %v586_v34 }
 0x300   : > { %v1030_v35 = vpop.f32.mrb[0].mxu1 }
 0x301   : > { %v847_v36 = vpop.f32.mrb[1].mxu1 }
 0x302   : > { %v363_v37 = vpop.f32.mrb[2].mxu1 }
 0x303   : > { %v848_v38 = vpop.f32.mrb[3].mxu1 }
 0x308   : > { %v412_v39 = vpop.f32.mrb[4].mxu1 }
 0x309   : > { %v413_v40 = vadd.f32 %v995_v7, %v412_v39  ;;  %v853_v41 = vpop.f32.mrb[5].mxu1 }
 0x30a   : > { %v415_v42 = vpop.f32.mrb[6].mxu1 }
 0x30b   : > { %v854_v43 = vpop.f32.mrb[7].mxu1  ;;  %v418_v44 = vsel %vm310_vm2, %v413_v40, -inf }
 0x30c   : > { %419 = vmax.xlane.f32.xlu1 %v418_v44 }
 0x310   : > { %v521_v45 = vpop.f32.mrb[8].mxu1 }
 0x311   : > { %v522_v46 = vadd.f32 %v995_v7, %v521_v45  ;;  %v865_v47 = vpop.f32.mrb[9].mxu1 }
 0x312   : > { %v524_v48 = vpop.f32.mrb[10].mxu1 }
 0x313   : > { %v527_v49 = vsel %vm310_vm2, %v522_v46, -inf  ;;  %v866_v50 = vpop.f32.mrb[11].mxu1 }
 0x314   : > { %528 = vmax.xlane.f32.xlu0 %v527_v49 }
 0x318   : > { %v629_v51 = vpop.f32.mrb[12].mxu1 }
 0x319   : > { %v630_v52 = vadd.f32 %v995_v7, %v629_v51  ;;  %v877_v53 = vpop.f32.mrb[13].mxu1 }
 0x31a   : > { %v632_v54 = vpop.f32.mrb[14].mxu1 }
 0x31b   : > { %v635_v55 = vsel %vm310_vm2, %v630_v52, -inf  ;;  %v878_v56 = vpop.f32.mrb[15].mxu1 }
 0x31c   : > { %636 = vmax.xlane.f32.xlu1 %v635_v55 }
 0x399   : > { %v420_v57 = vpop.xlane.xlu1 %419 }
 0x39a   : > { %v421_v58 = vsub.f32 %v413_v40, %v420_v57 }
 0x39c   : > { %v422_v59 = vmul.f32 1.442695, %v421_v58 }
 0x39e   : > { %905 = vpow2.f32 %v422_v59 }
 0x3a1   : > { %v529_v60 = vpop.xlane.xlu0 %528 }
 0x3a2   : > { %v530_v61 = vsub.f32 %v522_v46, %v529_v60 }
 0x3a4   : > { %v531_v62 = vmul.f32 1.442695, %v530_v61 }
 0x3a6   : > { %907 = vpow2.f32 %v531_v62 }
 0x3a8   : > { %v906_v63 = vpop.eup %905 }
 0x3a9   : > { %v424_v1 = vsel %vm310_vm2, %v906_v63, 0.0  ;;  %v637_v4 = vpop.xlane.xlu1 %636 }
 0x3aa   : > { %425 = vadd.xlane.f32.xlu1 %v424_v1  ;;  %v638_v5 = vsub.f32 %v630_v52, %v637_v4 }
 0x3ac   : > { %v639_v6 = vmul.f32 1.442695, %v638_v5 }
 0x3ae   : > { %909 = vpow2.f32 %v639_v6 }
 0x3b0   : > { %v908_v2 = vpop.eup %907 }
 0x3b1   : > { %v533_v3 = vsel %vm310_vm2, %v908_v2, 0.0 }
 0x3b2   : > { %534 = vadd.xlane.f32.xlu0 %v533_v3 }
 0x3b8   : > { %v910_v7 = vpop.eup %909 }
 0x3b9   : > { %v641_v8 = vsel %vm310_vm2, %v910_v7, 0.0 }
 0x3bb   : > { %539 = vrot.lane.b32.xlu1 %v1010_v21, %s928_s29 }
 0x3c8   : > { %431 = vrot.lane.b32.xlu0 %v1010_v21, %s927_s28 }
 0x3df   : > { %642 = vadd.xlane.f32.xlu1 %v641_v8 }
 0x3f0   : > { %647 = vrot.lane.b32.xlu1 %v1010_v21, %s929_s30 }
 0x437   : > { %v426_v9 = vpop.xlane.xlu1 %425 }
 0x438   : > { %911 = vrcp.f32 %v426_v9 }
 0x43b   : > { %v540_v15 = vpop.permute.xlu1 %539 }
 0x43f   : > { %v535_v10 = vpop.xlane.xlu0 %534 }
 0x440   : > { %913 = vrcp.f32 %v535_v10 }
 0x442   : > { %v912_v11 = vpop.eup %911 }
 0x443   : > { %v428_v12 = vmul.f32 %v912_v11, %v906_v63  ;;  %v432_v13 = vpop.permute.xlu0 %431 }
 0x444   : > { %856 = vmatpush3.bf16.msra.mxu0 %v432_v13 }
 0x445   : > { %v429_v14 = vpack.c.bf16 %v428_v12, %v428_v12  ;;  %867 = vmatprep.subr.bf16.mxu0 %v925_v0 }
 0x447   : > { %858 = vmatmul.mubr.msk.bf16.vlgmr.msra.gmra.mrb[4].mxu0 %vm310_vm2, %v429_v14 }
 0x448   : > { %868 = vmatpush3.bf16.msra.mxu0 %v540_v15  ;;  %869 = vmatprep.mubr.msk.bf16.mxu0 %vm926_vm0, %v925_v0 }
 0x449   : > { %879 = vmatprep.subr.bf16.mxu0 %v925_v0 }
 0x44a   : > { %v914_v16 = vpop.eup %913 }
 0x44b   : > { %v537_v17 = vmul.f32 %v914_v16, %v908_v2 }
 0x44d   : > { %v538_v18 = vpack.c.bf16 %v537_v17, %v537_v17 }
 0x44f   : > { %870 = vmatmul.mubr.msk.bf16.vlgmr.msra.gmra.mrb[8].mxu0 %vm310_vm2, %v538_v18 }
 0x450   : > { %881 = vmatprep.mubr.msk.bf16.mxu0 %vm926_vm0, %v925_v0 }
 0x46c   : > { %v643_v19 = vpop.xlane.xlu1 %642 }
 0x46d   : > { %915 = vrcp.f32 %v643_v19 }
 0x470   : > { %v648_v20 = vpop.permute.xlu1 %647 }
 0x471   : > { %880 = vmatpush3.bf16.msra.mxu0 %v648_v20 }
 0x477   : > { %v916_v21 = vpop.eup %915 }
 0x478   : > { %v645_v22 = vmul.f32 %v916_v21, %v910_v7 }
 0x47a   : > { %v646_v23 = vpack.c.bf16 %v645_v22, %v645_v22 }
 0x47c   : > { %882 = vmatmul.mubr.msk.bf16.vlgmr.msra.gmra.mrb[12].mxu0 %vm310_vm2, %v646_v23 }
 0x51a   : > { %v471_v24 = vpop.f32.mrb[4].mxu0 }
 0x51b   : > { %694 = vrot.lane.b32.xlu0 %v471_v24, %s930_s8  ;;  %v859_v25 = vpop.f32.mrb[5].mxu0 }
 0x51c   : > { %v474_v26 = vpop.f32.mrb[6].mxu0 }
 0x51d   : > { %v860_v27 = vpop.f32.mrb[7].mxu0 }
 0x522   : > { %v579_v28 = vpop.f32.mrb[8].mxu0 }
 0x523   : > { %698 = vrot.lane.b32.xlu1 %v579_v28, %s931_s9  ;;  %v871_v0 = vpop.f32.mrb[9].mxu0 }
 0x524   : > { %v582_v29 = vpop.f32.mrb[10].mxu0 }
 0x525   : > { %v872_v30 = vpop.f32.mrb[11].mxu0 }
 0x54f   : > { %v687_v31 = vpop.f32.mrb[12].mxu0 }
 0x550   : > { %702 = vrot.lane.b32.xlu0 %v687_v31, %s932_s10  ;;  %v883_v32 = vpop.f32.mrb[13].mxu0 }
 0x551   : > { %v690_v33 = vpop.f32.mrb[14].mxu0 }
 0x552   : > { %v884_v34 = vpop.f32.mrb[15].mxu0 }
 0x58d   : > { %v695_v36 = vpop.permute.xlu0 %694 }
 0x58e   : > { %v705_v38 = vsel %vm263_vm1, %v1030_v35, %v695_v36 }
 0x595   : > { %v699_v37 = vpop.permute.xlu1 %698 }
 0x596   : > { %v706_v39 = vsel %vm310_vm2, %v705_v38, %v699_v37 }
 0x5c2   : > { %v703_v40 = vpop.permute.xlu0 %702 }
 0x5c3   : > { %v708_v41 = vsel %vm707_vm3, %v706_v39, %v703_v40 }
 0x5c4   : > { %710 = vst.msk [vmem:[%s246_s13] sm:$0xff] %vm709_vm4, %v708_v41 }
 0x5c5 PF: > { %s14_s15 = sadd.s32 1, %s923_s15  }
 0x5c6   : > { %p11_p4 = scmp.ge.s32.totalorder %s14_s15, 4  }
 0x5c8   :  { %13 = sbr.rel (!%p11_p4) target bundleno = 1 (0x1), region = 75 }

// kernel: transformer_forward.45
= control target key start
LH: loop header
LB: loop body
LE: loop exit
PB: predicated region body
PF: predicated region fallthrough
CT: control target
= control target key end

     0   :  { %vm19_vm0 = vcmask 261120   ;;  %s167_s0 = inlined_call_operand.vmem [shape: f32[16,32], index: 0, kind: input, shape index: {}]   ;;  %s168_s1 = inlined_call_operand.vmem [shape: f32[1,32], index: 1, kind: input, shape index: {}]   ;;  %s169_s2 = inlined_call_operand.vmem [shape: f32[1,32], index: 2, kind: input, shape index: {}]   ;;  %s170_s3 = inlined_call_operand.hbm [shape: f32[16,32], index: 3, kind: output, shape index: {}]  }
   0x1   :  { %v15_v0 = vld [vmem:[%s167_s0] sm:$0xff]  ;;  %v16_v1 = vld [vmem:[%s167_s0 + $0x8] sm:$0xff] }
   0x2   :  { %8 = vsyncpa [#allocation3], 0  ;;  %v20_v2 = vsel %vm19_vm0, %v15_v0, 0.0  ;;  %v23_v3 = vsel %vm19_vm0, %v16_v1, 0.0  ;;  %v81_v21 = vld [vmem:[%s168_s1] ss:$0 sm:$0xff] }
   0x3   :  { %21 = vadd.xlane.f32.xlu0 %v20_v2  ;;  %v82_v23 = vld [vmem:[%s169_s2] ss:$0 sm:$0xff]  ;;  %s114_s19 = smov [#allocation2]  }
   0x4   :  { %s70_s20 = sshll.u32 %s114_s19, 4  ;;  %s71_s20 = int_to_ptr.vmem [resolvable:$true] %s70_s20 }
   0x5   :  { %s90_s21 = scalar_lea.vmem %s71_s20, 256  ;;  %p95_p1 = scmp.lt.s32.totalorder %s71_s20, %s71_s20 }
   0x6   :  { %p91_p0 = scmp.ne.s32.totalorder %s71_s20, %s90_s21  ;;  %p96_p2 = scmp.lt.s32.totalorder %s90_s21, %s90_s21 }
   0x7   :  { %24 = vadd.xlane.f32.xlu0 %v23_v3 }
   0x8   :  { %p97_p3 = por %p96_p2, %p95_p1 }
   0xa   :  { %p98_p4 = pnand %p97_p3, %p91_p0 }
  0x90   :  { %v22_v4 = vpop.xlane.xlu0 %21 }
  0x91   :  { %v27_v5 = vmul.f32 0.03125, %v22_v4 }
  0x93   :  { %v29_v6 = vsub.f32 %v15_v0, %v27_v5 }
  0x94   :  { %v25_v7 = vpop.xlane.xlu0 %24 }
  0x95   :  { %v28_v8 = vmul.f32 0.03125, %v25_v7  ;;  %v31_v9 = vmul.f32 %v29_v6, %v29_v6 }
  0x97   :  { %v30_v10 = vsub.f32 %v16_v1, %v28_v8  ;;  %v33_v11 = vsel %vm19_vm0, %v31_v9, 0.0 }
  0x98   :  { %34 = vadd.xlane.f32.xlu1 %v33_v11 }
  0x99   :  { %v32_v12 = vmul.f32 %v30_v10, %v30_v10 }
  0x9b   :  { %v36_v13 = vsel %vm19_vm0, %v32_v12, 0.0 }
  0x9c   :  { %37 = vadd.xlane.f32.xlu1 %v36_v13 }
 0x125   :  { %v35_v14 = vpop.xlane.xlu1 %34 }
 0x126   :  { %v39_v15 = vmul.f32 0.03125, %v35_v14 }
 0x128   :  { %v41_v16 = vadd.f32 1e-05, %v39_v15 }
 0x129   :  { %v38_v17 = vpop.xlane.xlu1 %37 }
 0x12a   :  { %86 = vrsqrt.f32 %v41_v16  ;;  %v40_v18 = vmul.f32 0.03125, %v38_v17 }
 0x12c   :  { %v42_v19 = vadd.f32 1e-05, %v40_v18 }
 0x12e   :  { %88 = vrsqrt.f32 %v42_v19 }
 0x134   :  { %v87_v20 = vpop.eup %86 }
 0x135   :  { %v45_v22 = vmul.f32 %v87_v20, %v29_v6 }
 0x137   :  { %v53_v24 = vmul.f32 %v81_v21, %v45_v22 }
 0x138   :  { %v89_v25 = vpop.eup %88 }
 0x139   :  { %v46_v26 = vmul.f32 %v89_v25, %v30_v10  ;;  %v61_v27 = vadd.f32 %v82_v23, %v53_v24 }
 0x13b   :  { %v54_v28 = vmul.f32 %v81_v21, %v46_v26  ;;  %63 = vst.msk [vmem:[#allocation2] sm:$0xff] %vm19_vm0, %v61_v27 }
 0x13d   :  { %v62_v29 = vadd.f32 %v82_v23, %v54_v28 }
 0x13f   :  { %64 = vst.msk [vmem:[#allocation2 + $0x8] sm:$0xff] %vm19_vm0, %v62_v29 }
 0x140   :  { %101 = shalt.err (!%p98_p4)
}
 0x141   :  { %s102_s22 = scalar_lea.hbm %s170_s3, 256 }
 0x142   :  { %p103_p5 = scmp.ne.s32.totalorder %s170_s3, %s102_s22  ;;  %p106_p6 = scmp.lt.u32.totalorder %s102_s22, %s170_s3 }
 0x144   :  { %p108_p7 = pnand %p106_p6, %p103_p5 }
 0x146   :  { %111 = shalt.err (!%p108_p7)
}
 0x147   :  { %s115_s27 = smov 128   ;;  %s116_s28 = smov 8  }
 0x148   :  { %76 = dma.vmem_to_hbm [thread:$0]  %s71_s20, 256, %s170_s3, [#allocation3], %s115_s27, %s115_s27, %s116_s28  }
 0x149   :  { %112 = dma.done.wait [#allocation3], 256  }
 0x14a   :  { %113 = vsyncadd [#allocation3], 4294967040 }
 0x14b   :  { %80 = vsyncpa [#allocation3], 1 }

// kernel: transformer_forward.37
= control target key start
LH: loop header
LB: loop body
LE: loop exit
PB: predicated region body
PF: predicated region fallthrough
CT: control target
= control target key end

     0   :  { %v292_v0 = vmov 0.0   ;;  %vm293_vm0 = vmmov 0   ;;  %vm53_vm1 = vcmask 261120   ;;  %vm133_vm2 = vcmask 523264   ;;  %s383_s1 = inlined_call_operand.vmem [shape: bf16[32,64], index: 1, kind: input, shape index: {}]   ;;  %s384_s0 = inlined_call_operand.vmem [shape: f32[16,32], index: 0, kind: input, shape index: {}]   ;;  %s385_s3 = inlined_call_operand.vmem [shape: bf16[64,32], index: 3, kind: input, shape index: {}]   ;;  %s386_s2 = inlined_call_operand.vmem [shape: f32[1,64], index: 2, kind: input, shape index: {}]   ;;  %s387_s4 = inlined_call_operand.vmem [shape: f32[1,32], index: 4, kind: input, shape index: {}]   ;;  %s388_s5 = inlined_call_operand.vmem [shape: f32[1,32], index: 5, kind: input, shape index: {}]   ;;  %s389_s6 = inlined_call_operand.vmem [shape: f32[1,32], index: 6, kind: input, shape index: {}]   ;;  %s390_s7 = inlined_call_operand.vmem [shape: f32[16,32], index: 7, kind: output, shape index: {}]  }
   0x1   :  { %260 = vmatprep.subr.bf16.mxu0 %v292_v0  ;;  %v282_v1 = vld [vmem:[%s383_s1] sm:$0xff]   ;;  %264 = vmatprep.mubr.msk.bf16.mxu0 %vm293_vm0, %v292_v0  ;;  %v283_v2 = vld [vmem:[%s383_s1 + $0x8] sm:$0xff]   ;;  %v286_v8 = vld [vmem:[%s385_s3 + $0x10] sm:$0xff]  }
   0x2   :  { %268 = vmatprep.subr.bf16.mxu1 %v292_v0  ;;  %276 = vmatprep.mubr.msk.bf16.mxu1 %vm293_vm0, %v292_v0  ;;  %v27_v3 = vld [vmem:[%s384_s0] sm:$0xff]  ;;  %v28_v4 = vld [vmem:[%s384_s0 + $0x8] sm:$0xff]  ;;  %v287_v9 = vld [vmem:[%s385_s3 + $0x18] sm:$0xff]  }
   0x3   :  { %261 = vmatpush3.bf16.msra.mxu0 %v282_v1  ;;  %v284_v5 = vld [vmem:[%s385_s3] sm:$0xff]   ;;  %v285_v6 = vld [vmem:[%s385_s3 + $0x8] sm:$0xff]   ;;  %v29_v7 = vpack.c.bf16 %v28_v4, %v27_v3 }
   0x4   :  { %262 = vmatprep.subr.bf16.mxu0 %v292_v0  ;;  %269 = vmatpush3.bf16.msra.mxu1 %v284_v5  ;;  %v240_v10 = vld [vmem:[%s386_s2] ss:$0 sm:$0xff] }
   0x5   :  { %270 = vmatprep.subr.bf16.mxu1 %v292_v0  ;;  %v249_v21 = vld [vmem:[%s387_s4] ss:$0 sm:$0xff] }
   0x6   :  { %v250_v48 = vld [vmem:[%s388_s5] ss:$0 sm:$0xff] }
   0x7   :  { %263 = vmatpush3.bf16.msra.mxu0 %v283_v2  ;;  %v251_v50 = vld [vmem:[%s389_s6] ss:$0 sm:$0xff] }
   0x8   :  { %271 = vmatpush3.bf16.msra.mxu1 %v285_v6 }
   0x9   :  { %272 = vmatprep.subr.bf16.mxu1 %v292_v0 }
   0xa   :  { %265 = vmatmul.mubr.msk.bf16.vlgmr.msra.gmra.mrb[0].mxu0 %vm53_vm1, %v29_v7 }
   0xc   :  { %273 = vmatpush3.bf16.msra.mxu1 %v286_v8 }
   0xd   :  { %274 = vmatprep.subr.bf16.mxu1 %v292_v0 }
  0x10   :  { %275 = vmatpush3.bf16.msra.mxu1 %v287_v9 }
  0xdd   :  { %v91_v11 = vpop.f32.mrb[0].mxu0 }
  0xde   :  { %v92_v12 = vadd.f32 %v240_v10, %v91_v11  ;;  %v266_v13 = vpop.f32.mrb[1].mxu0 }
  0xdf   :  { %v94_v14 = vpop.f32.mrb[2].mxu0 }
  0xe0   :  { %v95_v15 = vadd.f32 %v240_v10, %v94_v14  ;;  %v267_v16 = vpop.f32.mrb[3].mxu0  ;;  %v98_v17 = vmax.f32 %v92_v12, 0.0 }
  0xe2   :  { %v99_v18 = vmax.f32 %v95_v15, 0.0 }
  0xe4   :  { %v100_v19 = vpack.c.bf16 %v99_v18, %v98_v17 }
  0xe6   :  { %277 = vmatmul.mubr.msk.bf16.vlgmr.msra.gmra.mrb[0].mxu1 %vm133_vm2, %v100_v19 }
 0x1b9   :  { %v171_v20 = vpop.f32.mrb[0].mxu1 }
 0x1ba   :  { %v178_v22 = vadd.f32 %v171_v20, %v27_v3  ;;  %v278_v23 = vpop.f32.mrb[1].mxu1 }
 0x1bb   :  { %v174_v24 = vpop.f32.mrb[2].mxu1 }
 0x1bc   :  { %v179_v25 = vadd.f32 %v174_v24, %v28_v4  ;;  %v279_v26 = vpop.f32.mrb[3].mxu1  ;;  %v187_v27 = vadd.f32 %v249_v21, %v178_v22 }
 0x1be   :  { %v191_v28 = vsel %vm53_vm1, %v187_v27, 0.0  ;;  %v188_v29 = vadd.f32 %v249_v21, %v179_v25 }
 0x1bf   :  { %192 = vadd.xlane.f32.xlu0 %v191_v28 }
 0x1c0   :  { %v194_v30 = vsel %vm53_vm1, %v188_v29, 0.0 }
 0x1c3   :  { %195 = vadd.xlane.f32.xlu0 %v194_v30 }
 0x24c   :  { %v193_v31 = vpop.xlane.xlu0 %192 }
 0x24d   :  { %v198_v32 = vmul.f32 0.03125, %v193_v31 }
 0x24f   :  { %v200_v33 = vsub.f32 %v187_v27, %v198_v32 }
 0x250   :  { %v196_v34 = vpop.xlane.xlu0 %195 }
 0x251   :  { %v199_v35 = vmul.f32 0.03125, %v196_v34  ;;  %v202_v36 = vmul.f32 %v200_v33, %v200_v33 }
 0x253   :  { %v201_v37 = vsub.f32 %v188_v29, %v199_v35  ;;  %v204_v38 = vsel %vm53_vm1, %v202_v36, 0.0 }
 0x254   :  { %205 = vadd.xlane.f32.xlu1 %v204_v38 }
 0x255   :  { %v203_v39 = vmul.f32 %v201_v37, %v201_v37 }
 0x257   :  { %v207_v40 = vsel %vm53_vm1, %v203_v39, 0.0 }
 0x258   :  { %208 = vadd.xlane.f32.xlu1 %v207_v40 }
 0x2e1   :  { %v206_v41 = vpop.xlane.xlu1 %205 }
 0x2e2   :  { %v210_v42 = vmul.f32 0.03125, %v206_v41 }
 0x2e4   :  { %v212_v43 = vadd.f32 1e-05, %v210_v42 }
 0x2e5   :  { %v209_v44 = vpop.xlane.xlu1 %208 }
 0x2e6   :  { %288 = vrsqrt.f32 %v212_v43  ;;  %v211_v45 = vmul.f32 0.03125, %v209_v44 }
 0x2e8   :  { %v213_v46 = vadd.f32 1e-05, %v211_v45 }
 0x2ea   :  { %290 = vrsqrt.f32 %v213_v46 }
 0x2f0   :  { %v289_v47 = vpop.eup %288 }
 0x2f1   :  { %v216_v49 = vmul.f32 %v289_v47, %v200_v33 }
 0x2f3   :  { %v224_v51 = vmul.f32 %v250_v48, %v216_v49 }
 0x2f4   :  { %v291_v52 = vpop.eup %290 }
 0x2f5   :  { %v232_v53 = vadd.f32 %v251_v50, %v224_v51  ;;  %v217_v54 = vmul.f32 %v291_v52, %v201_v37 }
 0x2f7   :  { %234 = vst.msk [vmem:[%s390_s7] sm:$0xff] %vm53_vm1, %v232_v53  ;;  %v225_v55 = vmul.f32 %v250_v48, %v217_v54 }
 0x2f9   :  { %v233_v56 = vadd.f32 %v251_v50, %v225_v55 }
 0x2fb   :  { %235 = vst.msk [vmem:[%s390_s7 + $0x8] sm:$0xff] %vm53_vm1, %v233_v56 }

</bundles_post_ra>
